<compile_context>
chip_gen: v7x
topology: tpu7x:2x2x1
jax: 0.10.0
libtpu: 0.0.40
codegen_flags: <defaults>
</compile_context>

<pallas_src>
import functools

import jax
import jax.numpy as jnp
from jax import lax
from jax.experimental import pallas as pl
from jax.experimental.pallas import tpu as pltpu

_SQRT2 = 1.4142135623730951


def _gelu_exact(x):
    return 0.5 * x * (1.0 + lax.erf(x / _SQRT2))


def _round_up(n, m):
    return ((n + m - 1) // m) * m


def _elementwise_dtype():
    """bf16 elementwise path on chips with bf16 VPU/XLU (v6e, v7x); f32 otherwise."""
    try:
        kind = jax.devices()[0].device_kind.lower()
    except Exception:
        return jnp.float32
    if ("v6" in kind) or ("v7" in kind) or ("7x" in kind):
        return jnp.bfloat16
    return jnp.float32


def _vmem_capacity_bytes():
    try:
        return int(pltpu.get_tpu_info().vmem_capacity_bytes)
    except Exception:
        return 64 << 20  # conservative fallback (v7x-sized)


def _pick_tile_h(H, W, Cmp, slab_budget_bytes, min_grid_steps):
    """Largest divisor of H whose (TH+2, W, Cmp) f32 slab fits the budget, keeping
    at least `min_grid_steps` row tiles so both v7x TensorCores get work."""
    divisors = [th for th in range(1, H + 1) if H % th == 0]
    fits = [th for th in divisors if (th + 2) * W * Cmp * 4 <= slab_budget_bytes]
    good = [th for th in fits if (H // th) >= min_grid_steps]
    if good:
        return max(good)
    if fits:
        return max(fits)
    return 1


def _mlp_kernel(x_ref, xt_ref, xb_ref, w1_ref, b1_ref, dw_ref, db_ref,
                w2_ref, b2_ref, o_ref, h_ref, *, TH, W, C, Cp, Cmp, eps, elem_dtype):
    i = pl.program_id(1)
    n_i = pl.num_programs(1)
    ed = elem_dtype

    # ---- LayerNorm (per-pixel over the REAL C channels) + fc1 + exact GELU.
    #      LN affine is folded into w1/b1.  Padded input lanes are zero, so sums
    #      over the full lane axis equal sums over the real channels; the padded
    #      lanes of xn are garbage but hit zero rows of w1.
    def ln_fc1_gelu(xblk):                       # xblk: (R, W, Cp)
        x = xblk.astype(jnp.float32)
        R = x.shape[0]
        if Cp == C:
            u = jnp.mean(x, axis=-1, keepdims=True)
            xc = x - u
            var = jnp.mean(xc * xc, axis=-1, keepdims=True)
        else:
            u = jnp.sum(x, axis=-1, keepdims=True) * (1.0 / C)
            xc = x - u
            ss = jnp.sum(xc * xc, axis=-1, keepdims=True)
            # remove the (Cp - C) padded-lane contributions ((-u)^2 each)
            var = jnp.maximum(ss - (Cp - C) * (u * u), 0.0) * (1.0 / C)
        xn = xc * lax.rsqrt(var + eps)
        h = jnp.dot(xn.reshape(R * W, Cp).astype(jnp.bfloat16), w1_ref[...],
                    preferred_element_type=jnp.float32) + b1_ref[...]
        return _gelu_exact(h).astype(ed).reshape(R, W, Cmp)

    h_main = ln_fc1_gelu(x_ref[0])               # (TH, W, Cmp)
    h_top = ln_fc1_gelu(xt_ref[0])               # (1, W, Cmp) halo row above
    h_bot = ln_fc1_gelu(xb_ref[0])               # (1, W, Cmp) halo row below

    # ---- assemble the (TH+2, W, Cmp) activation slab in VMEM scratch; the halo
    #      rows that correspond to the conv's zero padding are zeroed (only on the
    #      first / last row tile) instead of masking the whole tensor every tile.
    h_ref[pl.ds(1, TH)] = h_main

    @pl.when(i == 0)
    def _():
        h_ref[pl.ds(0, 1)] = jnp.zeros((1, W, Cmp), ed)

    @pl.when(i > 0)
    def _():
        h_ref[pl.ds(0, 1)] = h_top

    @pl.when(i == n_i - 1)
    def _():
        h_ref[pl.ds(TH + 1, 1)] = jnp.zeros((1, W, Cmp), ed)

    @pl.when(i < n_i - 1)
    def _():
        h_ref[pl.ds(TH + 1, 1)] = h_bot

    # ---- merged depthwise 3x3 conv (pos + sobel_x + sobel_y + laplacian), pad=1.
    #      Vertical taps = static row slices of the slab; horizontal taps = sublane
    #      roll (XLU) with a column mask folded into the per-channel tap weight.
    dw = dw_ref[...].astype(ed)                  # (9, Cmp) per-channel taps
    col = lax.broadcasted_iota(jnp.int32, (1, W, 1), 1)
    left_ok = col >= 1                           # west neighbor (dx = -1) valid
    right_ok = col <= W - 2                      # east neighbor (dx = +1) valid

    def mtap(k, ok):                             # (1, W, Cmp) masked tap weight
        return jnp.where(ok, dw[k], jnp.zeros((), ed))

    # center tap initializes the accumulator (no zeros materialization)
    acc = h_main * dw[4]
    acc = acc + pltpu.roll(h_main, 1, axis=1) * mtap(3, left_ok)
    acc = acc + pltpu.roll(h_main, W - 1, axis=1) * mtap(5, right_ok)
    for ky in (0, 2):
        v = h_ref[pl.ds(ky, TH)]                 # (TH, W, Cmp) vertical shift
        acc = acc + v * dw[ky * 3 + 1]
        acc = acc + pltpu.roll(v, 1, axis=1) * mtap(ky * 3 + 0, left_ok)
        acc = acc + pltpu.roll(v, W - 1, axis=1) * mtap(ky * 3 + 2, right_ok)

    # exact-erf GELU kept in f32 (matches nn.GELU numerics); residual x + act(out)
    out = _gelu_exact(acc.astype(jnp.float32) + db_ref[...])
    h2 = h_main.astype(jnp.float32) + out

    # ---- fc2 (1x1 conv) back to C channels (bf16 operands, f32 accumulation)
    y = jnp.dot(h2.reshape(TH * W, Cmp).astype(jnp.bfloat16), w2_ref[...],
                preferred_element_type=jnp.float32) + b2_ref[...]
    o_ref[0] = y.reshape(TH, W, Cp).astype(o_ref.dtype)


def mlp_forward_nhwc(x_nhwc, kp, tile_h=None):
    """x_nhwc: (B, H, W, C) float32.  kp: kernel-layout (lane-padded) params."""
    B, H, W, C = x_nhwc.shape
    Cp, Cmp = kp["w1"].shape                     # padded channel dims
    assert C <= Cp, "input channels exceed the (padded) fc1 weight"

    ed = _elementwise_dtype()
    vmem_cap = _vmem_capacity_bytes()

    if tile_h is None:
        min_steps = 1 if B >= 2 else min(2, H)   # keep >=2 grid steps for megacore
        TH = _pick_tile_h(H, W, Cmp, vmem_cap // 16, min_steps)
    else:
        TH = tile_h
    assert H % TH == 0, "tile_h must divide H"

    x_p = x_nhwc if Cp == C else jnp.pad(x_nhwc, ((0, 0), (0, 0), (0, 0), (0, Cp - C)))

    kernel = functools.partial(_mlp_kernel, TH=TH, W=W, C=C, Cp=Cp, Cmp=Cmp,
                               eps=1e-6, elem_dtype=ed)

    # Main row tile + two clamped 1-row halo tiles (block size 1 along H means the
    # block index equals the element row, so clamping is a simple min/max).
    x_spec = pl.BlockSpec((1, TH, W, Cp), lambda b, i: (b, i, 0, 0))
    top_spec = pl.BlockSpec((1, 1, W, Cp),
                            lambda b, i: (b, jnp.maximum(i * TH - 1, 0), 0, 0))
    bot_spec = pl.BlockSpec((1, 1, W, Cp),
                            lambda b, i: (b, jnp.minimum(i * TH + TH, H - 1), 0, 0))

    out = pl.pallas_call(
        kernel,
        out_shape=jax.ShapeDtypeStruct((B, H, W, Cp), x_nhwc.dtype),
        grid_spec=pltpu.PrefetchScalarGridSpec(
            num_scalar_prefetch=0,
            grid=(B, H // TH),
            in_specs=[
                x_spec,                                          # x main tile
                top_spec,                                        # x halo row above
                bot_spec,                                        # x halo row below
                pl.BlockSpec((Cp, Cmp), lambda b, i: (0, 0)),    # fc1 w (LN folded, bf16)
                pl.BlockSpec((1, Cmp), lambda b, i: (0, 0)),     # fc1 b (LN folded)
                pl.BlockSpec((9, Cmp), lambda b, i: (0, 0)),     # merged dw taps
                pl.BlockSpec((1, Cmp), lambda b, i: (0, 0)),     # merged dw bias
                pl.BlockSpec((Cmp, Cp), lambda b, i: (0, 0)),    # fc2 w (bf16)
                pl.BlockSpec((1, Cp), lambda b, i: (0, 0)),      # fc2 b
            ],
            out_specs=pl.BlockSpec((1, TH, W, Cp), lambda b, i: (b, i, 0, 0)),
            scratch_shapes=[pltpu.VMEM((TH + 2, W, Cmp), ed)],   # activation slab
        ),
        compiler_params=pltpu.CompilerParams(
            dimension_semantics=("parallel", "parallel"),
            vmem_limit_bytes=int(vmem_cap * 3 // 4),
        ),
    )(x_p, x_p, x_p, kp["w1"], kp["b1"], kp["dw"], kp["db"], kp["w2"], kp["b2"])

    return out if Cp == C else out[..., :C]


def mlp_forward(x_nchw, kp, tile_h=None):
    """NCHW wrapper (PyTorch layout).  Prefer mlp_forward_nhwc in a real model so
    the layout transposes are not re-done around every MLP call."""
    x = jnp.transpose(x_nchw, (0, 2, 3, 1))                       # NHWC
    y = mlp_forward_nhwc(x, kp, tile_h)
    return jnp.transpose(y, (0, 3, 1, 2))                         # back to NCHW


# ----------------------------------------------------------------------------
# Parameter construction (deterministic, mirrors the torch module's shapes).
# ----------------------------------------------------------------------------
def init_raw_params(key, dim, mlp_ratio=4):
    Cm = dim * mlp_ratio
    ks = jax.random.split(key, 14)
    f32 = jnp.float32
    mx = jnp.array([[0., 1., -1.], [2., 0., -2.], [1., 0., -1.]], f32)   # mask_sobel_x
    my = jnp.array([[1., 2., 1.], [0., 0., 0.], [-1., -2., -1.]], f32)   # mask_sobel_y
    ml = jnp.array([[1., 0., 0.], [1., -4., 1.], [0., 1., 0.]], f32)     # mask_laplacian
    raw = dict(
        # randomized (not the default ones/zeros) so the LN-affine fold is exercised
        ln_w=1.0 + 0.1 * jax.random.normal(ks[12], (dim,), f32),
        ln_b=0.1 * jax.random.normal(ks[13], (dim,), f32),
        fc1_w=jax.random.normal(ks[0], (Cm, dim), f32) * 0.1,     # torch (out,in) 1x1 conv
        fc1_b=jax.random.normal(ks[1], (Cm,), f32) * 0.1,
        pos_w=jax.random.normal(ks[2], (Cm, 1, 3, 3), f32) * 0.1,
        pos_b=jax.random.normal(ks[3], (Cm,), f32) * 0.1,
        fc2_w=jax.random.normal(ks[4], (dim, Cm), f32) * 0.1,
        fc2_b=jax.random.normal(ks[5], (dim,), f32) * 0.1,
        scale_sx=jax.random.normal(ks[6], (Cm, 1, 1, 1), f32) * 0.001,
        bias_sx=jax.random.normal(ks[7], (Cm,), f32) * 0.001,
        scale_sy=jax.random.normal(ks[8], (Cm, 1, 1, 1), f32) * 0.001,
        bias_sy=jax.random.normal(ks[9], (Cm,), f32) * 0.001,
        scale_l=jax.random.normal(ks[10], (Cm, 1, 1, 1), f32) * 0.001,
        bias_l=jax.random.normal(ks[11], (Cm,), f32) * 0.001,
        mask_sx=jnp.broadcast_to(mx, (Cm, 1, 3, 3)),
        mask_sy=jnp.broadcast_to(my, (Cm, 1, 3, 3)),
        mask_l=jnp.broadcast_to(ml, (Cm, 1, 3, 3)),
    )
    return raw


def to_kernel_params(raw, lane_multiple=128):
    Cm, dim = raw["fc1_w"].shape
    Cp = _round_up(dim, lane_multiple)
    Cmp = _round_up(Cm, lane_multiple)

    # Fold the three fixed-mask depthwise convs into the `pos` depthwise conv
    # (valid because the merge_kernel==False path just sums linear conv outputs).
    dw4 = (raw["pos_w"]
           + raw["scale_sx"] * raw["mask_sx"]
           + raw["scale_sy"] * raw["mask_sy"]
           + raw["scale_l"] * raw["mask_l"])                 # (Cm, 1, 3, 3)
    dw = jnp.transpose(dw4[:, 0], (1, 2, 0)).reshape(9, Cm)  # [ky*3+kx, c]
    db = raw["pos_b"] + raw["bias_sx"] + raw["bias_sy"] + raw["bias_l"]

    # Fold the LayerNorm affine into fc1:
    #   (g*xn + b) @ W1 + b1  ==  xn @ (diag(g) @ W1) + (b @ W1 + b1)
    w1 = raw["fc1_w"].T                                       # (dim, Cm), in x out
    w1f = raw["ln_w"][:, None] * w1
    b1f = raw["ln_b"] @ w1 + raw["fc1_b"]
    w2 = raw["fc2_w"].T                                       # (Cm, dim), in x out
    b2 = raw["fc2_b"]

    def pad2(a, r, c):
        return jnp.pad(a, ((0, r - a.shape[0]), (0, c - a.shape[1])))

    def pad1(a, n):
        return jnp.pad(a, ((0, n - a.shape[0]),))

    # Zero-padding to lane multiples: padded input rows / output cols are exactly
    # zero, so the extra lanes carry zeros through the whole pipeline.
    return dict(
        w1=pad2(w1f, Cp, Cmp).astype(jnp.bfloat16),            # MXU operand (bf16)
        b1=pad1(b1f, Cmp).reshape(1, Cmp).astype(jnp.float32),
        dw=pad2(dw, 9, Cmp).astype(jnp.float32),
        db=pad1(db, Cmp).reshape(1, Cmp).astype(jnp.float32),
        w2=pad2(w2, Cmp, Cp).astype(jnp.bfloat16),             # MXU operand (bf16)
        b2=pad1(b2, Cp).reshape(1, Cp).astype(jnp.float32),
    )


# ----------------------------------------------------------------------------
# Pure-JAX reference (mirrors the torch forward op-by-op, un-merged path, f32).
# ----------------------------------------------------------------------------
def mlp_reference(x, raw):
    eps = 1e-6
    u = jnp.mean(x, axis=1, keepdims=True)
    s = jnp.mean((x - u) ** 2, axis=1, keepdims=True)
    xn = (x - u) / jnp.sqrt(s + eps)
    xn = raw["ln_w"][None, :, None, None] * xn + raw["ln_b"][None, :, None, None]

    def conv1x1(v, w, b):
        return jnp.einsum("nchw,oc->nohw", v, w) + b[None, :, None, None]

    def depthwise(v, w, b):
        Cm = v.shape[1]
        y = lax.conv_general_dilated(
            v, w, window_strides=(1, 1), padding=((1, 1), (1, 1)),
            feature_group_count=Cm,
            dimension_numbers=("NCHW", "OIHW", "NCHW"))
        return y + b[None, :, None, None]

    gelu = lambda t: jax.nn.gelu(t, approximate=False)
    h = gelu(conv1x1(xn, raw["fc1_w"], raw["fc1_b"]))
    out = depthwise(h, raw["pos_w"], raw["pos_b"])
    out = out + depthwise(h, raw["scale_sx"] * raw["mask_sx"], raw["bias_sx"])
    out = out + depthwise(h, raw["scale_sy"] * raw["mask_sy"], raw["bias_sy"])
    out = out + depthwise(h, raw["scale_l"] * raw["mask_l"], raw["bias_l"])
    h = h + gelu(out)
    return conv1x1(h, raw["fc2_w"], raw["fc2_b"])


if __name__ == "__main__":
    B, dim, H, W = 2, 4, 16, 16
    key = jax.random.PRNGKey(0)
    kx, kp_key = jax.random.split(key)
    x = jax.random.normal(kx, (B, dim, H, W), jnp.float32)

    raw = init_raw_params(kp_key, dim, mlp_ratio=4)
    kparams = to_kernel_params(raw)

    y_ref = jax.block_until_ready(mlp_reference(x, raw))

    # Tolerance reflects bf16 MXU operands (f32 accumulation) plus the bf16
    # depthwise-tap path on v6e/v7x.
    def check(y, tag):
        err = float(jnp.max(jnp.abs(y - y_ref)))
        if not bool(jnp.allclose(y, y_ref, atol=5e-3, rtol=2e-2)):
            raise AssertionError(f"{tag}: mismatch, max abs err = {err}")

    # multi-tile path (exercises the pl.when halo handling: 2 row tiles of 8)
    y_tiled = jax.block_until_ready(mlp_forward(x, kparams, tile_h=8))
    check(y_tiled, "tile_h=8")

    # auto-picked tile (generation-aware budget)
    y_auto = jax.block_until_ready(mlp_forward(x, kparams))
    check(y_auto, "auto tile")

    print("KERNEL_OK")
</pallas_src>

<mosaic_0001>
module attributes {stable_mosaic.version = 11 : i64} {
  func.func @_mlp_kernel(%arg0: i32, %arg1: i32, %arg2: memref<1x8x16x128xf32, #tpu.memory_space<vmem>>, %arg3: memref<1x1x16x128xf32, #tpu.memory_space<vmem>>, %arg4: memref<1x1x16x128xf32, #tpu.memory_space<vmem>>, %arg5: memref<128x128xbf16, #tpu.memory_space<vmem>>, %arg6: memref<1x128xf32, #tpu.memory_space<vmem>>, %arg7: memref<9x128xf32, #tpu.memory_space<vmem>>, %arg8: memref<1x128xf32, #tpu.memory_space<vmem>>, %arg9: memref<128x128xbf16, #tpu.memory_space<vmem>>, %arg10: memref<1x128xf32, #tpu.memory_space<vmem>>, %arg11: memref<1x8x16x128xf32, #tpu.memory_space<vmem>>, %arg12: memref<10x16x128xf32, #tpu.memory_space<vmem>>) attributes {dimension_semantics = [#tpu.dimension_semantics<parallel>, #tpu.dimension_semantics<parallel>], iteration_bounds = array<i64: 2, 2>, scalar_prefetch = 0 : i64, scratch_operands = 1 : i64, tpu.core_type = #tpu.core_type<tc>, window_params = [{transform_indices = @transform_0, window_bounds = array<i64: 1, 8, 16, 128>}, {transform_indices = @transform_1, window_bounds = array<i64: 1, 1, 16, 128>}, {transform_indices = @transform_2, window_bounds = array<i64: 1, 1, 16, 128>}, {pipeline_mode = #tpu.pipeline_mode<synchronous>, transform_indices = @transform_3, window_bounds = array<i64: 128, 128>}, {pipeline_mode = #tpu.pipeline_mode<synchronous>, transform_indices = @transform_4, window_bounds = array<i64: 1, 128>}, {pipeline_mode = #tpu.pipeline_mode<synchronous>, transform_indices = @transform_5, window_bounds = array<i64: 9, 128>}, {pipeline_mode = #tpu.pipeline_mode<synchronous>, transform_indices = @transform_6, window_bounds = array<i64: 1, 128>}, {pipeline_mode = #tpu.pipeline_mode<synchronous>, transform_indices = @transform_7, window_bounds = array<i64: 128, 128>}, {pipeline_mode = #tpu.pipeline_mode<synchronous>, transform_indices = @transform_8, window_bounds = array<i64: 1, 128>}, {transform_indices = @transform_9, window_bounds = array<i64: 1, 8, 16, 128>}]} {
    %c0 = arith.constant 0 : index
    %c0_0 = arith.constant 0 : index
    %c0_1 = arith.constant 0 : index
    %c0_2 = arith.constant 0 : index
    %0 = vector.load %arg2[%c0, %c0_0, %c0_1, %c0_2] : memref<1x8x16x128xf32, #tpu.memory_space<vmem>>, vector<1x8x16x128xf32>
    %1 = vector.shape_cast %0 : vector<1x8x16x128xf32> to vector<8x16x128xf32>
    %cst = arith.constant dense<0.000000e+00> : vector<8x16xf32>
    %2 = vector.multi_reduction <add>, %1, %cst [2] : vector<8x16x128xf32> to vector<8x16xf32>
    %3 = vector.shape_cast %2 : vector<8x16xf32> to vector<8x16x1xf32>
    %cst_3 = arith.constant 2.500000e-01 : f32
    %4 = vector.broadcast %cst_3 : f32 to vector<8x16x1xf32>
    %5 = arith.mulf %3, %4 : vector<8x16x1xf32>
    %6 = vector.broadcast %5 : vector<8x16x1xf32> to vector<8x16x128xf32>
    %7 = arith.subf %1, %6 : vector<8x16x128xf32>
    %8 = arith.mulf %7, %7 : vector<8x16x128xf32>
    %cst_4 = arith.constant dense<0.000000e+00> : vector<8x16xf32>
    %9 = vector.multi_reduction <add>, %8, %cst_4 [2] : vector<8x16x128xf32> to vector<8x16xf32>
    %10 = vector.shape_cast %9 : vector<8x16xf32> to vector<8x16x1xf32>
    %11 = arith.mulf %5, %5 : vector<8x16x1xf32>
    %cst_5 = arith.constant 1.240000e+02 : f32
    %12 = vector.broadcast %cst_5 : f32 to vector<8x16x1xf32>
    %13 = arith.mulf %12, %11 : vector<8x16x1xf32>
    %14 = arith.subf %10, %13 : vector<8x16x1xf32>
    %cst_6 = arith.constant 0.000000e+00 : f32
    %15 = vector.broadcast %cst_6 : f32 to vector<8x16x1xf32>
    %16 = arith.maximumf %14, %15 : vector<8x16x1xf32>
    %cst_7 = arith.constant 2.500000e-01 : f32
    %17 = vector.broadcast %cst_7 : f32 to vector<8x16x1xf32>
    %18 = arith.mulf %16, %17 : vector<8x16x1xf32>
    %cst_8 = arith.constant 9.99999997E-7 : f32
    %19 = vector.broadcast %cst_8 : f32 to vector<8x16x1xf32>
    %20 = arith.addf %18, %19 : vector<8x16x1xf32>
    %21 = math.rsqrt %20 : vector<8x16x1xf32>
    %22 = vector.broadcast %21 : vector<8x16x1xf32> to vector<8x16x128xf32>
    %23 = arith.mulf %7, %22 : vector<8x16x128xf32>
    %24 = vector.shape_cast %23 : vector<8x16x128xf32> to vector<128x128xf32>
    %25 = arith.truncf %24 : vector<128x128xf32> to vector<128x128xbf16>
    %c0_9 = arith.constant 0 : index
    %c0_10 = arith.constant 0 : index
    %26 = vector.load %arg5[%c0_9, %c0_10] : memref<128x128xbf16, #tpu.memory_space<vmem>>, vector<128x128xbf16>
    %cst_11 = arith.constant dense<0.000000e+00> : vector<128x128xf32>
    %27 = tpu.matmul %25, %26, %cst_11 {dimension_numbers = #tpu.dot_dimension_numbers<[1], [0], [0], [1], [0, 0, 1, 1], [], []>} : vector<128x128xbf16>, vector<128x128xbf16>, vector<128x128xf32> -> vector<128x128xf32>
    %c0_12 = arith.constant 0 : index
    %c0_13 = arith.constant 0 : index
    %28 = vector.load %arg6[%c0_12, %c0_13] : memref<1x128xf32, #tpu.memory_space<vmem>>, vector<1x128xf32>
    %29 = vector.broadcast %28 : vector<1x128xf32> to vector<128x128xf32>
    %30 = arith.addf %27, %29 : vector<128x128xf32>
    %cst_14 = arith.constant 5.000000e-01 : f32
    %31 = vector.broadcast %cst_14 : f32 to vector<128x128xf32>
    %32 = arith.mulf %31, %30 : vector<128x128xf32>
    %cst_15 = arith.constant 1.41421354 : f32
    %33 = vector.broadcast %cst_15 : f32 to vector<128x128xf32>
    %34 = arith.divf %30, %33 : vector<128x128xf32>
    %35 = math.erf %34 : vector<128x128xf32>
    %cst_16 = arith.constant 1.000000e+00 : f32
    %36 = vector.broadcast %cst_16 : f32 to vector<128x128xf32>
    %37 = arith.addf %36, %35 : vector<128x128xf32>
    %38 = arith.mulf %32, %37 : vector<128x128xf32>
    %39 = vector.shape_cast %38 : vector<128x128xf32> to vector<8x16x128xf32>
    %c0_17 = arith.constant 0 : index
    %c0_18 = arith.constant 0 : index
    %c0_19 = arith.constant 0 : index
    %c0_20 = arith.constant 0 : index
    %40 = vector.load %arg3[%c0_17, %c0_18, %c0_19, %c0_20] : memref<1x1x16x128xf32, #tpu.memory_space<vmem>>, vector<1x1x16x128xf32>
    %41 = vector.shape_cast %40 : vector<1x1x16x128xf32> to vector<1x16x128xf32>
    %cst_21 = arith.constant dense<0.000000e+00> : vector<1x16xf32>
    %42 = vector.multi_reduction <add>, %41, %cst_21 [2] : vector<1x16x128xf32> to vector<1x16xf32>
    %43 = vector.shape_cast %42 : vector<1x16xf32> to vector<1x16x1xf32>
    %cst_22 = arith.constant 2.500000e-01 : f32
    %44 = vector.broadcast %cst_22 : f32 to vector<1x16x1xf32>
    %45 = arith.mulf %43, %44 : vector<1x16x1xf32>
    %46 = vector.broadcast %45 : vector<1x16x1xf32> to vector<1x16x128xf32>
    %47 = arith.subf %41, %46 : vector<1x16x128xf32>
    %48 = arith.mulf %47, %47 : vector<1x16x128xf32>
    %cst_23 = arith.constant dense<0.000000e+00> : vector<1x16xf32>
    %49 = vector.multi_reduction <add>, %48, %cst_23 [2] : vector<1x16x128xf32> to vector<1x16xf32>
    %50 = vector.shape_cast %49 : vector<1x16xf32> to vector<1x16x1xf32>
    %51 = arith.mulf %45, %45 : vector<1x16x1xf32>
    %cst_24 = arith.constant 1.240000e+02 : f32
    %52 = vector.broadcast %cst_24 : f32 to vector<1x16x1xf32>
    %53 = arith.mulf %52, %51 : vector<1x16x1xf32>
    %54 = arith.subf %50, %53 : vector<1x16x1xf32>
    %cst_25 = arith.constant 0.000000e+00 : f32
    %55 = vector.broadcast %cst_25 : f32 to vector<1x16x1xf32>
    %56 = arith.maximumf %54, %55 : vector<1x16x1xf32>
    %cst_26 = arith.constant 2.500000e-01 : f32
    %57 = vector.broadcast %cst_26 : f32 to vector<1x16x1xf32>
    %58 = arith.mulf %56, %57 : vector<1x16x1xf32>
    %cst_27 = arith.constant 9.99999997E-7 : f32
    %59 = vector.broadcast %cst_27 : f32 to vector<1x16x1xf32>
    %60 = arith.addf %58, %59 : vector<1x16x1xf32>
    %61 = math.rsqrt %60 : vector<1x16x1xf32>
    %62 = vector.broadcast %61 : vector<1x16x1xf32> to vector<1x16x128xf32>
    %63 = arith.mulf %47, %62 : vector<1x16x128xf32>
    %64 = vector.shape_cast %63 : vector<1x16x128xf32> to vector<16x128xf32>
    %65 = arith.truncf %64 : vector<16x128xf32> to vector<16x128xbf16>
    %c0_28 = arith.constant 0 : index
    %c0_29 = arith.constant 0 : index
    %66 = vector.load %arg5[%c0_28, %c0_29] : memref<128x128xbf16, #tpu.memory_space<vmem>>, vector<128x128xbf16>
    %cst_30 = arith.constant dense<0.000000e+00> : vector<16x128xf32>
    %67 = tpu.matmul %65, %66, %cst_30 {dimension_numbers = #tpu.dot_dimension_numbers<[1], [0], [0], [1], [0, 0, 1, 1], [], []>} : vector<16x128xbf16>, vector<128x128xbf16>, vector<16x128xf32> -> vector<16x128xf32>
    %c0_31 = arith.constant 0 : index
    %c0_32 = arith.constant 0 : index
    %68 = vector.load %arg6[%c0_31, %c0_32] : memref<1x128xf32, #tpu.memory_space<vmem>>, vector<1x128xf32>
    %69 = vector.broadcast %68 : vector<1x128xf32> to vector<16x128xf32>
    %70 = arith.addf %67, %69 : vector<16x128xf32>
    %cst_33 = arith.constant 5.000000e-01 : f32
    %71 = vector.broadcast %cst_33 : f32 to vector<16x128xf32>
    %72 = arith.mulf %71, %70 : vector<16x128xf32>
    %cst_34 = arith.constant 1.41421354 : f32
    %73 = vector.broadcast %cst_34 : f32 to vector<16x128xf32>
    %74 = arith.divf %70, %73 : vector<16x128xf32>
    %75 = math.erf %74 : vector<16x128xf32>
    %cst_35 = arith.constant 1.000000e+00 : f32
    %76 = vector.broadcast %cst_35 : f32 to vector<16x128xf32>
    %77 = arith.addf %76, %75 : vector<16x128xf32>
    %78 = arith.mulf %72, %77 : vector<16x128xf32>
    %79 = vector.shape_cast %78 : vector<16x128xf32> to vector<1x16x128xf32>
    %c0_36 = arith.constant 0 : index
    %c0_37 = arith.constant 0 : index
    %c0_38 = arith.constant 0 : index
    %c0_39 = arith.constant 0 : index
    %80 = vector.load %arg4[%c0_36, %c0_37, %c0_38, %c0_39] : memref<1x1x16x128xf32, #tpu.memory_space<vmem>>, vector<1x1x16x128xf32>
    %81 = vector.shape_cast %80 : vector<1x1x16x128xf32> to vector<1x16x128xf32>
    %cst_40 = arith.constant dense<0.000000e+00> : vector<1x16xf32>
    %82 = vector.multi_reduction <add>, %81, %cst_40 [2] : vector<1x16x128xf32> to vector<1x16xf32>
    %83 = vector.shape_cast %82 : vector<1x16xf32> to vector<1x16x1xf32>
    %cst_41 = arith.constant 2.500000e-01 : f32
    %84 = vector.broadcast %cst_41 : f32 to vector<1x16x1xf32>
    %85 = arith.mulf %83, %84 : vector<1x16x1xf32>
    %86 = vector.broadcast %85 : vector<1x16x1xf32> to vector<1x16x128xf32>
    %87 = arith.subf %81, %86 : vector<1x16x128xf32>
    %88 = arith.mulf %87, %87 : vector<1x16x128xf32>
    %cst_42 = arith.constant dense<0.000000e+00> : vector<1x16xf32>
    %89 = vector.multi_reduction <add>, %88, %cst_42 [2] : vector<1x16x128xf32> to vector<1x16xf32>
    %90 = vector.shape_cast %89 : vector<1x16xf32> to vector<1x16x1xf32>
    %91 = arith.mulf %85, %85 : vector<1x16x1xf32>
    %cst_43 = arith.constant 1.240000e+02 : f32
    %92 = vector.broadcast %cst_43 : f32 to vector<1x16x1xf32>
    %93 = arith.mulf %92, %91 : vector<1x16x1xf32>
    %94 = arith.subf %90, %93 : vector<1x16x1xf32>
    %cst_44 = arith.constant 0.000000e+00 : f32
    %95 = vector.broadcast %cst_44 : f32 to vector<1x16x1xf32>
    %96 = arith.maximumf %94, %95 : vector<1x16x1xf32>
    %cst_45 = arith.constant 2.500000e-01 : f32
    %97 = vector.broadcast %cst_45 : f32 to vector<1x16x1xf32>
    %98 = arith.mulf %96, %97 : vector<1x16x1xf32>
    %cst_46 = arith.constant 9.99999997E-7 : f32
    %99 = vector.broadcast %cst_46 : f32 to vector<1x16x1xf32>
    %100 = arith.addf %98, %99 : vector<1x16x1xf32>
    %101 = math.rsqrt %100 : vector<1x16x1xf32>
    %102 = vector.broadcast %101 : vector<1x16x1xf32> to vector<1x16x128xf32>
    %103 = arith.mulf %87, %102 : vector<1x16x128xf32>
    %104 = vector.shape_cast %103 : vector<1x16x128xf32> to vector<16x128xf32>
    %105 = arith.truncf %104 : vector<16x128xf32> to vector<16x128xbf16>
    %c0_47 = arith.constant 0 : index
    %c0_48 = arith.constant 0 : index
    %106 = vector.load %arg5[%c0_47, %c0_48] : memref<128x128xbf16, #tpu.memory_space<vmem>>, vector<128x128xbf16>
    %cst_49 = arith.constant dense<0.000000e+00> : vector<16x128xf32>
    %107 = tpu.matmul %105, %106, %cst_49 {dimension_numbers = #tpu.dot_dimension_numbers<[1], [0], [0], [1], [0, 0, 1, 1], [], []>} : vector<16x128xbf16>, vector<128x128xbf16>, vector<16x128xf32> -> vector<16x128xf32>
    %c0_50 = arith.constant 0 : index
    %c0_51 = arith.constant 0 : index
    %108 = vector.load %arg6[%c0_50, %c0_51] : memref<1x128xf32, #tpu.memory_space<vmem>>, vector<1x128xf32>
    %109 = vector.broadcast %108 : vector<1x128xf32> to vector<16x128xf32>
    %110 = arith.addf %107, %109 : vector<16x128xf32>
    %cst_52 = arith.constant 5.000000e-01 : f32
    %111 = vector.broadcast %cst_52 : f32 to vector<16x128xf32>
    %112 = arith.mulf %111, %110 : vector<16x128xf32>
    %cst_53 = arith.constant 1.41421354 : f32
    %113 = vector.broadcast %cst_53 : f32 to vector<16x128xf32>
    %114 = arith.divf %110, %113 : vector<16x128xf32>
    %115 = math.erf %114 : vector<16x128xf32>
    %cst_54 = arith.constant 1.000000e+00 : f32
    %116 = vector.broadcast %cst_54 : f32 to vector<16x128xf32>
    %117 = arith.addf %116, %115 : vector<16x128xf32>
    %118 = arith.mulf %112, %117 : vector<16x128xf32>
    %119 = vector.shape_cast %118 : vector<16x128xf32> to vector<1x16x128xf32>
    %c1 = arith.constant 1 : index
    %c0_55 = arith.constant 0 : index
    %c0_56 = arith.constant 0 : index
    %120 = vector.load %arg12[%c1, %c0_55, %c0_56] : memref<10x16x128xf32, #tpu.memory_space<vmem>>, vector<8x16x128xf32>
    tpu.vector_store %arg12[%c1, %c0_55, %c0_56], %39 {strides = array<i32>} : memref<10x16x128xf32, #tpu.memory_space<vmem>>, vector<8x16x128xf32>,
    %c0_i32 = arith.constant 0 : i32
    %121 = arith.cmpi eq, %arg1, %c0_i32 : i32
    %122 = arith.extui %121 : i1 to i32
    %c0_i32_57 = arith.constant 0 : i32
    %123 = arith.cmpi ne, %122, %c0_i32_57 : i32
    scf.if %123 {
      %cst_96 = arith.constant 0.000000e+00 : f32
      %254 = vector.broadcast %cst_96 : f32 to vector<1x16x128xf32>
      %c0_97 = arith.constant 0 : index
      %c0_98 = arith.constant 0 : index
      %c0_99 = arith.constant 0 : index
      %255 = vector.load %arg12[%c0_97, %c0_98, %c0_99] : memref<10x16x128xf32, #tpu.memory_space<vmem>>, vector<1x16x128xf32>
      tpu.vector_store %arg12[%c0_97, %c0_98, %c0_99], %254 {strides = array<i32>} : memref<10x16x128xf32, #tpu.memory_space<vmem>>, vector<1x16x128xf32>,
    } else {
    }
    %c0_i32_58 = arith.constant 0 : i32
    %124 = arith.cmpi sgt, %arg1, %c0_i32_58 : i32
    %125 = arith.extui %124 : i1 to i32
    %c0_i32_59 = arith.constant 0 : i32
    %126 = arith.cmpi ne, %125, %c0_i32_59 : i32
    scf.if %126 {
      %c0_96 = arith.constant 0 : index
      %c0_97 = arith.constant 0 : index
      %c0_98 = arith.constant 0 : index
      %254 = vector.load %arg12[%c0_96, %c0_97, %c0_98] : memref<10x16x128xf32, #tpu.memory_space<vmem>>, vector<1x16x128xf32>
      tpu.vector_store %arg12[%c0_96, %c0_97, %c0_98], %79 {strides = array<i32>} : memref<10x16x128xf32, #tpu.memory_space<vmem>>, vector<1x16x128xf32>,
    } else {
    }
    %c1_i32 = arith.constant 1 : i32
    %127 = arith.cmpi eq, %arg1, %c1_i32 : i32
    %128 = arith.extui %127 : i1 to i32
    %c0_i32_60 = arith.constant 0 : i32
    %129 = arith.cmpi ne, %128, %c0_i32_60 : i32
    scf.if %129 {
      %cst_96 = arith.constant 0.000000e+00 : f32
      %254 = vector.broadcast %cst_96 : f32 to vector<1x16x128xf32>
      %c9 = arith.constant 9 : index
      %c0_97 = arith.constant 0 : index
      %c0_98 = arith.constant 0 : index
      %255 = vector.load %arg12[%c9, %c0_97, %c0_98] : memref<10x16x128xf32, #tpu.memory_space<vmem>>, vector<1x16x128xf32>
      tpu.vector_store %arg12[%c9, %c0_97, %c0_98], %254 {strides = array<i32>} : memref<10x16x128xf32, #tpu.memory_space<vmem>>, vector<1x16x128xf32>,
    } else {
    }
    %c1_i32_61 = arith.constant 1 : i32
    %130 = arith.cmpi slt, %arg1, %c1_i32_61 : i32
    %131 = arith.extui %130 : i1 to i32
    %c0_i32_62 = arith.constant 0 : i32
    %132 = arith.cmpi ne, %131, %c0_i32_62 : i32
    scf.if %132 {
      %c9 = arith.constant 9 : index
      %c0_96 = arith.constant 0 : index
      %c0_97 = arith.constant 0 : index
      %254 = vector.load %arg12[%c9, %c0_96, %c0_97] : memref<10x16x128xf32, #tpu.memory_space<vmem>>, vector<1x16x128xf32>
      tpu.vector_store %arg12[%c9, %c0_96, %c0_97], %119 {strides = array<i32>} : memref<10x16x128xf32, #tpu.memory_space<vmem>>, vector<1x16x128xf32>,
    } else {
    }
    %c0_63 = arith.constant 0 : index
    %c0_64 = arith.constant 0 : index
    %133 = vector.load %arg7[%c0_63, %c0_64] : memref<9x128xf32, #tpu.memory_space<vmem>>, vector<9x128xf32>
    %134 = tpu.iota {dimensions = array<i32: 1>} : vector<1x16x1xi32>
    %c1_i32_65 = arith.constant 1 : i32
    %135 = vector.broadcast %c1_i32_65 : i32 to vector<1x16x1xi32>
    %136 = arith.cmpi sge, %134, %135 : vector<1x16x1xi32>
    %c14_i32 = arith.constant 14 : i32
    %137 = vector.broadcast %c14_i32 : i32 to vector<1x16x1xi32>
    %138 = arith.cmpi sle, %134, %137 : vector<1x16x1xi32>
    %139 = vector.extract_strided_slice %133 {offsets = [4, 0], sizes = [1, 128], strides = [1, 1]} : vector<9x128xf32> to vector<1x128xf32>
    %140 = vector.shape_cast %139 : vector<1x128xf32> to vector<128xf32>
    %141 = vector.shape_cast %140 : vector<128xf32> to vector<1x1x128xf32>
    %142 = vector.broadcast %141 : vector<1x1x128xf32> to vector<8x16x128xf32>
    %143 = arith.mulf %39, %142 : vector<8x16x128xf32>
    %c1_i32_66 = arith.constant 1 : i32
    %144 = tpu.dynamic_rotate %39 by %c1_i32_66 dim 1 : vector<8x16x128xf32>, i32 -> vector<8x16x128xf32>
    %145 = vector.extract_strided_slice %133 {offsets = [3, 0], sizes = [1, 128], strides = [1, 1]} : vector<9x128xf32> to vector<1x128xf32>
    %146 = vector.shape_cast %145 : vector<1x128xf32> to vector<128xf32>
    %cst_67 = arith.constant 0.000000e+00 : f32
    %147 = vector.shape_cast %136 : vector<1x16x1xi1> to vector<1x16x1xi1>
    %148 = vector.broadcast %147 : vector<1x16x1xi1> to vector<1x16x128xi1>
    %149 = vector.shape_cast %146 : vector<128xf32> to vector<1x1x128xf32>
    %150 = vector.broadcast %149 : vector<1x1x128xf32> to vector<1x16x128xf32>
    %151 = vector.broadcast %cst_67 : f32 to vector<1x16x128xf32>
    %152 = arith.select %148, %150, %151 : vector<1x16x128xi1>, vector<1x16x128xf32>
    %153 = vector.broadcast %152 : vector<1x16x128xf32> to vector<8x16x128xf32>
    %154 = arith.mulf %144, %153 : vector<8x16x128xf32>
    %155 = arith.addf %143, %154 : vector<8x16x128xf32>
    %c15_i32 = arith.constant 15 : i32
    %156 = tpu.dynamic_rotate %39 by %c15_i32 dim 1 : vector<8x16x128xf32>, i32 -> vector<8x16x128xf32>
    %157 = vector.extract_strided_slice %133 {offsets = [5, 0], sizes = [1, 128], strides = [1, 1]} : vector<9x128xf32> to vector<1x128xf32>
    %158 = vector.shape_cast %157 : vector<1x128xf32> to vector<128xf32>
    %cst_68 = arith.constant 0.000000e+00 : f32
    %159 = vector.shape_cast %138 : vector<1x16x1xi1> to vector<1x16x1xi1>
    %160 = vector.broadcast %159 : vector<1x16x1xi1> to vector<1x16x128xi1>
    %161 = vector.shape_cast %158 : vector<128xf32> to vector<1x1x128xf32>
    %162 = vector.broadcast %161 : vector<1x1x128xf32> to vector<1x16x128xf32>
    %163 = vector.broadcast %cst_68 : f32 to vector<1x16x128xf32>
    %164 = arith.select %160, %162, %163 : vector<1x16x128xi1>, vector<1x16x128xf32>
    %165 = vector.broadcast %164 : vector<1x16x128xf32> to vector<8x16x128xf32>
    %166 = arith.mulf %156, %165 : vector<8x16x128xf32>
    %167 = arith.addf %155, %166 : vector<8x16x128xf32>
    %c0_69 = arith.constant 0 : index
    %c0_70 = arith.constant 0 : index
    %c0_71 = arith.constant 0 : index
    %168 = vector.load %arg12[%c0_69, %c0_70, %c0_71] : memref<10x16x128xf32, #tpu.memory_space<vmem>>, vector<8x16x128xf32>
    %169 = vector.extract_strided_slice %133 {offsets = [1, 0], sizes = [1, 128], strides = [1, 1]} : vector<9x128xf32> to vector<1x128xf32>
    %170 = vector.shape_cast %169 : vector<1x128xf32> to vector<128xf32>
    %171 = vector.shape_cast %170 : vector<128xf32> to vector<1x1x128xf32>
    %172 = vector.broadcast %171 : vector<1x1x128xf32> to vector<8x16x128xf32>
    %173 = arith.mulf %168, %172 : vector<8x16x128xf32>
    %174 = arith.addf %167, %173 : vector<8x16x128xf32>
    %c1_i32_72 = arith.constant 1 : i32
    %175 = tpu.dynamic_rotate %168 by %c1_i32_72 dim 1 : vector<8x16x128xf32>, i32 -> vector<8x16x128xf32>
    %176 = vector.extract_strided_slice %133 {offsets = [0, 0], sizes = [1, 128], strides = [1, 1]} : vector<9x128xf32> to vector<1x128xf32>
    %177 = vector.shape_cast %176 : vector<1x128xf32> to vector<128xf32>
    %cst_73 = arith.constant 0.000000e+00 : f32
    %178 = vector.shape_cast %136 : vector<1x16x1xi1> to vector<1x16x1xi1>
    %179 = vector.broadcast %178 : vector<1x16x1xi1> to vector<1x16x128xi1>
    %180 = vector.shape_cast %177 : vector<128xf32> to vector<1x1x128xf32>
    %181 = vector.broadcast %180 : vector<1x1x128xf32> to vector<1x16x128xf32>
    %182 = vector.broadcast %cst_73 : f32 to vector<1x16x128xf32>
    %183 = arith.select %179, %181, %182 : vector<1x16x128xi1>, vector<1x16x128xf32>
    %184 = vector.broadcast %183 : vector<1x16x128xf32> to vector<8x16x128xf32>
    %185 = arith.mulf %175, %184 : vector<8x16x128xf32>
    %186 = arith.addf %174, %185 : vector<8x16x128xf32>
    %c15_i32_74 = arith.constant 15 : i32
    %187 = tpu.dynamic_rotate %168 by %c15_i32_74 dim 1 : vector<8x16x128xf32>, i32 -> vector<8x16x128xf32>
    %188 = vector.extract_strided_slice %133 {offsets = [2, 0], sizes = [1, 128], strides = [1, 1]} : vector<9x128xf32> to vector<1x128xf32>
    %189 = vector.shape_cast %188 : vector<1x128xf32> to vector<128xf32>
    %cst_75 = arith.constant 0.000000e+00 : f32
    %190 = vector.shape_cast %138 : vector<1x16x1xi1> to vector<1x16x1xi1>
    %191 = vector.broadcast %190 : vector<1x16x1xi1> to vector<1x16x128xi1>
    %192 = vector.shape_cast %189 : vector<128xf32> to vector<1x1x128xf32>
    %193 = vector.broadcast %192 : vector<1x1x128xf32> to vector<1x16x128xf32>
    %194 = vector.broadcast %cst_75 : f32 to vector<1x16x128xf32>
    %195 = arith.select %191, %193, %194 : vector<1x16x128xi1>, vector<1x16x128xf32>
    %196 = vector.broadcast %195 : vector<1x16x128xf32> to vector<8x16x128xf32>
    %197 = arith.mulf %187, %196 : vector<8x16x128xf32>
    %198 = arith.addf %186, %197 : vector<8x16x128xf32>
    %c2 = arith.constant 2 : index
    %c0_76 = arith.constant 0 : index
    %c0_77 = arith.constant 0 : index
    %199 = vector.load %arg12[%c2, %c0_76, %c0_77] : memref<10x16x128xf32, #tpu.memory_space<vmem>>, vector<8x16x128xf32>
    %200 = vector.extract_strided_slice %133 {offsets = [7, 0], sizes = [1, 128], strides = [1, 1]} : vector<9x128xf32> to vector<1x128xf32>
    %201 = vector.shape_cast %200 : vector<1x128xf32> to vector<128xf32>
    %202 = vector.shape_cast %201 : vector<128xf32> to vector<1x1x128xf32>
    %203 = vector.broadcast %202 : vector<1x1x128xf32> to vector<8x16x128xf32>
    %204 = arith.mulf %199, %203 : vector<8x16x128xf32>
    %205 = arith.addf %198, %204 : vector<8x16x128xf32>
    %c1_i32_78 = arith.constant 1 : i32
    %206 = tpu.dynamic_rotate %199 by %c1_i32_78 dim 1 : vector<8x16x128xf32>, i32 -> vector<8x16x128xf32>
    %207 = vector.extract_strided_slice %133 {offsets = [6, 0], sizes = [1, 128], strides = [1, 1]} : vector<9x128xf32> to vector<1x128xf32>
    %208 = vector.shape_cast %207 : vector<1x128xf32> to vector<128xf32>
    %cst_79 = arith.constant 0.000000e+00 : f32
    %209 = vector.shape_cast %136 : vector<1x16x1xi1> to vector<1x16x1xi1>
    %210 = vector.broadcast %209 : vector<1x16x1xi1> to vector<1x16x128xi1>
    %211 = vector.shape_cast %208 : vector<128xf32> to vector<1x1x128xf32>
    %212 = vector.broadcast %211 : vector<1x1x128xf32> to vector<1x16x128xf32>
    %213 = vector.broadcast %cst_79 : f32 to vector<1x16x128xf32>
    %214 = arith.select %210, %212, %213 : vector<1x16x128xi1>, vector<1x16x128xf32>
    %215 = vector.broadcast %214 : vector<1x16x128xf32> to vector<8x16x128xf32>
    %216 = arith.mulf %206, %215 : vector<8x16x128xf32>
    %217 = arith.addf %205, %216 : vector<8x16x128xf32>
    %c15_i32_80 = arith.constant 15 : i32
    %218 = tpu.dynamic_rotate %199 by %c15_i32_80 dim 1 : vector<8x16x128xf32>, i32 -> vector<8x16x128xf32>
    %219 = vector.extract_strided_slice %133 {offsets = [8, 0], sizes = [1, 128], strides = [1, 1]} : vector<9x128xf32> to vector<1x128xf32>
    %220 = vector.shape_cast %219 : vector<1x128xf32> to vector<128xf32>
    %cst_81 = arith.constant 0.000000e+00 : f32
    %221 = vector.shape_cast %138 : vector<1x16x1xi1> to vector<1x16x1xi1>
    %222 = vector.broadcast %221 : vector<1x16x1xi1> to vector<1x16x128xi1>
    %223 = vector.shape_cast %220 : vector<128xf32> to vector<1x1x128xf32>
    %224 = vector.broadcast %223 : vector<1x1x128xf32> to vector<1x16x128xf32>
    %225 = vector.broadcast %cst_81 : f32 to vector<1x16x128xf32>
    %226 = arith.select %222, %224, %225 : vector<1x16x128xi1>, vector<1x16x128xf32>
    %227 = vector.broadcast %226 : vector<1x16x128xf32> to vector<8x16x128xf32>
    %228 = arith.mulf %218, %227 : vector<8x16x128xf32>
    %229 = arith.addf %217, %228 : vector<8x16x128xf32>
    %c0_82 = arith.constant 0 : index
    %c0_83 = arith.constant 0 : index
    %230 = vector.load %arg8[%c0_82, %c0_83] : memref<1x128xf32, #tpu.memory_space<vmem>>, vector<1x128xf32>
    %231 = vector.shape_cast %230 : vector<1x128xf32> to vector<1x1x128xf32>
    %232 = vector.broadcast %231 : vector<1x1x128xf32> to vector<8x16x128xf32>
    %233 = arith.addf %229, %232 : vector<8x16x128xf32>
    %cst_84 = arith.constant 5.000000e-01 : f32
    %234 = vector.broadcast %cst_84 : f32 to vector<8x16x128xf32>
    %235 = arith.mulf %234, %233 : vector<8x16x128xf32>
    %cst_85 = arith.constant 1.41421354 : f32
    %236 = vector.broadcast %cst_85 : f32 to vector<8x16x128xf32>
    %237 = arith.divf %233, %236 : vector<8x16x128xf32>
    %238 = math.erf %237 : vector<8x16x128xf32>
    %cst_86 = arith.constant 1.000000e+00 : f32
    %239 = vector.broadcast %cst_86 : f32 to vector<8x16x128xf32>
    %240 = arith.addf %239, %238 : vector<8x16x128xf32>
    %241 = arith.mulf %235, %240 : vector<8x16x128xf32>
    %242 = arith.addf %39, %241 : vector<8x16x128xf32>
    %243 = vector.shape_cast %242 : vector<8x16x128xf32> to vector<128x128xf32>
    %244 = arith.truncf %243 : vector<128x128xf32> to vector<128x128xbf16>
    %c0_87 = arith.constant 0 : index
    %c0_88 = arith.constant 0 : index
    %245 = vector.load %arg9[%c0_87, %c0_88] : memref<128x128xbf16, #tpu.memory_space<vmem>>, vector<128x128xbf16>
    %cst_89 = arith.constant dense<0.000000e+00> : vector<128x128xf32>
    %246 = tpu.matmul %244, %245, %cst_89 {dimension_numbers = #tpu.dot_dimension_numbers<[1], [0], [0], [1], [0, 0, 1, 1], [], []>} : vector<128x128xbf16>, vector<128x128xbf16>, vector<128x128xf32> -> vector<128x128xf32>
    %c0_90 = arith.constant 0 : index
    %c0_91 = arith.constant 0 : index
    %247 = vector.load %arg10[%c0_90, %c0_91] : memref<1x128xf32, #tpu.memory_space<vmem>>, vector<1x128xf32>
    %248 = vector.broadcast %247 : vector<1x128xf32> to vector<128x128xf32>
    %249 = arith.addf %246, %248 : vector<128x128xf32>
    %250 = vector.shape_cast %249 : vector<128x128xf32> to vector<8x16x128xf32>
    %c0_92 = arith.constant 0 : index
    %c0_93 = arith.constant 0 : index
    %c0_94 = arith.constant 0 : index
    %c0_95 = arith.constant 0 : index
    %251 = vector.load %arg11[%c0_92, %c0_93, %c0_94, %c0_95] : memref<1x8x16x128xf32, #tpu.memory_space<vmem>>, vector<1x8x16x128xf32>
    %252 = vector.shape_cast %251 : vector<1x8x16x128xf32> to vector<8x16x128xf32>
    %253 = vector.shape_cast %250 : vector<8x16x128xf32> to vector<1x8x16x128xf32>
    tpu.vector_store %arg11[%c0_92, %c0_93, %c0_94, %c0_95], %253 {strides = array<i32>} : memref<1x8x16x128xf32, #tpu.memory_space<vmem>>, vector<1x8x16x128xf32>,
    return
  }
  func.func @transform_0(%arg0: i32, %arg1: i32) -> (i32, i32, i32, i32) {
    %c0_i32 = arith.constant 0 : i32
    %c0_i32_0 = arith.constant 0 : i32
    %c0_i32_1 = arith.constant 0 : i32
    return %arg0, %arg1, %c0_i32, %c0_i32_0 : i32, i32, i32, i32
  }
  func.func @transform_1(%arg0: i32, %arg1: i32) -> (i32, i32, i32, i32) {
    %c8_i32 = arith.constant 8 : i32
    %0 = arith.muli %arg1, %c8_i32 : i32
    %c1_i32 = arith.constant 1 : i32
    %1 = arith.subi %0, %c1_i32 : i32
    %c0_i32 = arith.constant 0 : i32
    %2 = arith.maxsi %1, %c0_i32 : i32
    %c0_i32_0 = arith.constant 0 : i32
    %c0_i32_1 = arith.constant 0 : i32
    %c0_i32_2 = arith.constant 0 : i32
    return %arg0, %2, %c0_i32_0, %c0_i32_1 : i32, i32, i32, i32
  }
  func.func @transform_2(%arg0: i32, %arg1: i32) -> (i32, i32, i32, i32) {
    %c8_i32 = arith.constant 8 : i32
    %0 = arith.muli %arg1, %c8_i32 : i32
    %c8_i32_0 = arith.constant 8 : i32
    %1 = arith.addi %0, %c8_i32_0 : i32
    %c15_i32 = arith.constant 15 : i32
    %2 = arith.minsi %1, %c15_i32 : i32
    %c0_i32 = arith.constant 0 : i32
    %c0_i32_1 = arith.constant 0 : i32
    %c0_i32_2 = arith.constant 0 : i32
    return %arg0, %2, %c0_i32, %c0_i32_1 : i32, i32, i32, i32
  }
  func.func @transform_3(%arg0: i32, %arg1: i32) -> (i32, i32) {
    %c0_i32 = arith.constant 0 : i32
    %c0_i32_0 = arith.constant 0 : i32
    %c0_i32_1 = arith.constant 0 : i32
    return %c0_i32, %c0_i32_0 : i32, i32
  }
  func.func @transform_4(%arg0: i32, %arg1: i32) -> (i32, i32) {
    %c0_i32 = arith.constant 0 : i32
    %c0_i32_0 = arith.constant 0 : i32
    %c0_i32_1 = arith.constant 0 : i32
    return %c0_i32, %c0_i32_0 : i32, i32
  }
  func.func @transform_5(%arg0: i32, %arg1: i32) -> (i32, i32) {
    %c0_i32 = arith.constant 0 : i32
    %c0_i32_0 = arith.constant 0 : i32
    %c0_i32_1 = arith.constant 0 : i32
    return %c0_i32, %c0_i32_0 : i32, i32
  }
  func.func @transform_6(%arg0: i32, %arg1: i32) -> (i32, i32) {
    %c0_i32 = arith.constant 0 : i32
    %c0_i32_0 = arith.constant 0 : i32
    %c0_i32_1 = arith.constant 0 : i32
    return %c0_i32, %c0_i32_0 : i32, i32
  }
  func.func @transform_7(%arg0: i32, %arg1: i32) -> (i32, i32) {
    %c0_i32 = arith.constant 0 : i32
    %c0_i32_0 = arith.constant 0 : i32
    %c0_i32_1 = arith.constant 0 : i32
    return %c0_i32, %c0_i32_0 : i32, i32
  }
  func.func @transform_8(%arg0: i32, %arg1: i32) -> (i32, i32) {
    %c0_i32 = arith.constant 0 : i32
    %c0_i32_0 = arith.constant 0 : i32
    %c0_i32_1 = arith.constant 0 : i32
    return %c0_i32, %c0_i32_0 : i32, i32
  }
  func.func @transform_9(%arg0: i32, %arg1: i32) -> (i32, i32, i32, i32) {
    %c0_i32 = arith.constant 0 : i32
    %c0_i32_0 = arith.constant 0 : i32
    %c0_i32_1 = arith.constant 0 : i32
    return %arg0, %arg1, %c0_i32, %c0_i32_0 : i32, i32, i32, i32
  }
}

</mosaic_0001>

<bundles_post_ra>
// kernel: tpu_custom_call.1
= control target key start
LH: loop header
LB: loop body
LE: loop exit
PB: predicated region body
PF: predicated region fallthrough
CT: control target
= control target key end

     0   :  { %s4822_s0 = inlined_call_operand.hbm [shape: f32[2,16,16,128], index: 0, kind: input, shape index: {}]   ;;  %s4823_s1 = inlined_call_operand.hbm [shape: f32[2,16,16,128], index: 1, kind: input, shape index: {}]   ;;  %s4824_s2 = inlined_call_operand.hbm [shape: f32[2,16,16,128], index: 2, kind: input, shape index: {}]   ;;  %s4825_s3 = inlined_call_operand.hbm [shape: bf16[128,128], index: 3, kind: input, shape index: {}]   ;;  %s4826_s4 = inlined_call_operand.vmem [shape: f32[1,128], index: 4, kind: input, shape index: {}]   ;;  %s4827_s5 = inlined_call_operand.vmem [shape: f32[9,128], index: 5, kind: input, shape index: {}]   ;;  %s4828_s6 = inlined_call_operand.vmem [shape: f32[1,128], index: 6, kind: input, shape index: {}]   ;;  %s4829_s7 = inlined_call_operand.hbm [shape: bf16[128,128], index: 7, kind: input, shape index: {}]   ;;  %s4830_s8 = inlined_call_operand.vmem [shape: f32[1,128], index: 8, kind: input, shape index: {}]   ;;  %s4831_s9 = inlined_call_operand.hbm [shape: f32[2,16,16,128], index: 9, kind: output, shape index: {}]  }
   0x1   :  { %4881 = sst [smem:[#allocation41_spill]] %s4822_s0 }
   0x2   :  { %4882 = sst [smem:[#allocation42_spill]] %s4823_s1 }
   0x3   :  { %4883 = sst [smem:[#allocation43_spill]] %s4824_s2 }
   0x4   :  { %4884 = sst [smem:[#allocation44_spill]] %s4825_s3 }
   0x5   :  { %4885 = sst [smem:[#allocation45_spill]] %s4826_s4 }
   0x6   :  { %4886 = sst [smem:[#allocation46_spill]] %s4827_s5 }
   0x7   :  { %4887 = sst [smem:[#allocation47_spill]] %s4828_s6 }
   0x8   :  { %4888 = sst [smem:[#allocation48_spill]] %s4829_s7 }
   0x9   :  { %4889 = sst [smem:[#allocation49_spill]] %s4830_s8 }
   0xa   :  { %4890 = sst [smem:[#allocation50_spill]] %s4831_s9 }
   0xb   :  { %14 = vsyncpa [#allocation4], 0 }
   0xc   :  { %16 = vsyncpa [#allocation4 + $0x1], 0 }
   0xd   :  { %17 = vsyncpa [#allocation7], 0 }
   0xe   :  { %19 = vsyncpa [#allocation7 + $0x1], 0 }
   0xf   :  { %20 = vsyncpa [#allocation10], 0 }
  0x10   :  { %21 = vsyncpa [#allocation5], 0 }
  0x11   :  { %23 = vsyncpa [#allocation5 + $0x1], 0  ;;  %s3183_s30 = smov 0   ;;  %s3185_s10 = smov 0  }
  0x12   :  { %s3187_s11 = smov 0   ;;  %s3189_s12 = smov 0  }
  0x13   :  { %s3191_s13 = smov 0   ;;  %s3193_s14 = smov 0  }
  0x14   :  { %s3195_s15 = smov 0   ;;  %s3197_s16 = smov 0  }
  0x15   :  { %s3199_s17 = smov 0   ;;  %s3201_s18 = smov 0  }
  0x16   :  { %s3203_s19 = smov 0   ;;  %s3205_s20 = smov 0  }
  0x17   :  { %s3207_s21 = smov 0   ;;  %s3209_s22 = smov 0  }
  0x18 LB: > { %4891 = sst [smem:[#allocation18_spill]] %s3063_s30  ;;  %s3254_s23 = sadd.s32 4294967295, %s3115_s22   ;;  %s3115_s22 = sphi %s3209_s22, %s29_s22   ;;  %s3111_s21 = sphi %s3207_s21, %s5010_s21   ;;  %s3107_s20 = sphi %s3205_s20, %s5009_s20   ;;  %s3103_s19 = sphi %s3203_s19, %s5008_s19   ;;  %s3099_s18 = sphi %s3201_s18, %s5007_s18   ;;  %s3095_s17 = sphi %s3199_s17, %s5006_s17   ;;  %s3091_s16 = sphi %s3197_s16, %s5005_s16   ;;  %s3087_s15 = sphi %s3195_s15, %s5004_s15   ;;  %s3083_s14 = sphi %s3193_s14, %s5003_s14   ;;  %s3079_s13 = sphi %s3191_s13, %s5002_s13   ;;  %s3075_s12 = sphi %s3189_s12, %s5001_s12   ;;  %s3071_s11 = sphi %s3187_s11, %s5000_s11   ;;  %s3067_s10 = sphi %s3185_s10, %s4992_s10   ;;  %s3063_s30 = sphi %s3183_s30, %s4991_s30  }
  0x19   : > { %4892 = sst [smem:[#allocation19_spill]] %s3067_s10  ;;  %p2301_p0 = scmp.ge.s32.totalorder %s3115_s22, 1 }
  0x1a   : > { %4893 = sst [smem:[#allocation20_spill]] %s3071_s11  ;;  %p4833_p1 = scmp.eq.s32.totalorder %s3254_s23, 0 }
  0x1b   : > { %4894 = sst [smem:[#allocation21_spill]] %s3079_s13  ;;  %p300_p3 = scmp.lt.s32.totalorder %s3115_s22, 5 }
  0x1c   : > { %4895 = sst [smem:[#allocation22_spill]] %s3099_s18  ;;  %s3117_s25 = smov [#allocation9]  }
  0x1d   : > { %4896 = sst [smem:[#allocation23_spill]] %s3103_s19  ;;  %p3260_p4 = pnand %p2301_p0, %p300_p3 }
  0x1e   : > { %4897 = sst [smem:[#allocation24_spill]] %s3107_s20  ;;  %s312_s26 = sshll.u32 %s3117_s25, 4  ;;  %s313_s26 = int_to_ptr.vmem [resolvable:$true] %s312_s26 }
  0x1f   : > { %4898 = sst [smem:[#allocation25_spill]] %s3111_s21  ;;  %p2531_p5 = pneg %p3260_p4 }
  0x20   : > { %s4899_s24 = scalar_select %p3260_p4, 1, 0 }
  0x21   : > { %p3268_p6 = pnand %p2531_p5, %p4833_p1  ;;  %s4902_s3 = sld [smem:[#allocation44_spill]] }
  0x22   : > { %4900 = sst [smem:[#allocation26_spill]] %s4899_s24 }
  0x23   : > { %p4850_p8 = pneg %p3268_p6 }
  0x27   : > { %s2811_s9 = scalar_lea.hbm %s4902_s3, 1024 }
  0x28   : > { %p2812_p7 = scmp.ne.s32.totalorder %s4902_s3, %s2811_s9  ;;  %p2818_p11 = scmp.lt.u32.totalorder %s2811_s9, %s4902_s3 }
  0x2a   : > { %p2814_p9 = pnand %p4850_p8, %p2812_p7 }
  0x2c   : > { %p2815_p10 = pneg %p2814_p9 }
  0x2e   : > { %p2820_p12 = pnand %p2818_p11, %p2815_p10 }
  0x30   : > { %2823 = shalt.err (!%p2820_p12)
}
  0x31   : > { %s2824_s28 = scalar_lea.vmem %s313_s26, 1024  ;;  %p2832_p5 = scmp.lt.s32.totalorder %s313_s26, %s313_s26 }
  0x32   : > { %p2825_p13 = scmp.ne.s32.totalorder %s313_s26, %s2824_s28  ;;  %p2833_p2 = scmp.lt.s32.totalorder %s2824_s28, %s2824_s28 }
  0x34   : > { %p2827_p0 = pnand %p2825_p13, %p4850_p8  ;;  %p2834_p1 = por %p2833_p2, %p2832_p5 }
  0x36   : > { %p2828_p3 = pneg %p2827_p0 }
  0x38   : > { %p2835_p4 = pnand %p2834_p1, %p2828_p3 }
  0x3a   : > { %2838 = shalt.err (!%p2835_p4)
}
  0x3b   : > { %s4836_s8 = smov 64   ;;  %s4837_s6 = smov 4  }
  0x3c   : > { %2534 = dma.hbm_to_vmem [thread:$0]  (!%p3268_p6), %s4902_s3, 1024, %s313_s26, [#allocation10], %s4836_s8, %s4836_s8, %s4837_s6  }
  0x3d   : > { %s38_s29 = sadd.s32 1, %s3107_s20  ;;  %s41_s25 = sadd.s32 1, %s3111_s21 }
  0x3e   : > { %p39_p1 = scmp.ge.s32.totalorder %s38_s29, 2  ;;  %p4849_p2 = scmp.eq.s32.totalorder %s3115_s22, 0 }
  0x3f   : > { %s2295_s28 = sshll.u32 %s3107_s20, 3  ;;  %s86_s5 = sadd.s32 1, %s3083_s14 }
  0x40   : > { %s5012_s29 = smov (%p39_p1, %s38_s29), 0  ;;  %s5014_s25 = smov (!%p39_p1, %s41_s25), %s3111_s21 }
  0x41   : > { %4903 = sst [smem:[#allocation27_spill]] %s5012_s29  ;;  %s46_s18 = ssub.s32 %s3107_s20, %s5012_s29 }
  0x42   : > { %s2296_s4 = sadd.s32 4294967295, %s2295_s28  ;;  %p43_p4 = scmp.ge.s32.totalorder %s5014_s25, 2 }
  0x43   : > { %p75_p7 = scmp.gt.s32.totalorder %s2296_s4, 0  ;;  %s2297_s26 = sshll.u32 %s5012_s29, 3 }
  0x44   : > { %p93_p9 = scmp.ne.s32.totalorder %s3083_s14, %s3079_s13  ;;  %s5016_s25 = smov (%p43_p4, %s5014_s25), 0 }
  0x45   : > { %4904 = sst [smem:[#allocation28_spill]] %s5016_s25  ;;  %s5018_s4 = smov (!%p75_p7, %s2296_s4), 0 }
  0x46   : > { %s3314_s9 = ssub.s32 %s3111_s21, %s5016_s25  ;;  %s2298_s19 = sadd.s32 4294967295, %s2297_s26 }
  0x47   : > { %4905 = sst [smem:[#allocation29_spill]] %s3314_s9  ;;  %s3317_s8 = sor.u32 %s46_s18, %s3314_s9 }
  0x48   : > { %p79_p10 = scmp.gt.s32.totalorder %s2298_s19, 0  ;;  %p3322_p12 = por %p93_p9, %p4849_p2 }
  0x49   : > { %p99_p13 = scmp.ne.s32.totalorder %s3079_s13, %s3075_s12  ;;  %s3328_s3 = sadd.s32 8, %s2295_s28 }
  0x4a   : > { %s5020_s19 = smov (!%p79_p10, %s2298_s19), 0  ;;  %p4907_p3 = scmp.eq.s32.totalorder %s3254_s23, 0 }
  0x4b   : > { %s82_s25 = ssub.s32 %s5018_s4, %s5020_s19  ;;  %s3338_s24 = sadd.s32 8, %s2297_s26 }
  0x4c   : > { %s83_s18 = sor.u32 %s82_s25, %s3314_s9  ;;  %p3334_p5 = por %p99_p13, %p4907_p3 }
  0x4d   : > { %p84_p1 = scmp.eq.s32.totalorder %s83_s18, 0  ;;  %p4848_p7 = scmp.lt.s32.totalorder %s3115_s22, 4 }
  0x4e   : > { %s4908_s29 = scalar_select %p3334_p5, 1, 0 }
  0x4f   : > { %s3343_s12 = scalar_select %p84_p1, %s3083_s14, %s86_s5  }
  0x50   : > { %4909 = sst [smem:[#allocation30_spill]] %s4908_s29  ;;  %s3346_s28 = sshll.u32 %s3111_s21, 5 }
  0x51   : > { %s375_s19 = sand.u32 1, %s3115_s22   ;;  %s377_s25 = sand.u32 1, %s3083_s14  }
  0x52   : > { %s2310_s13 = sshll.u32 %s377_s25, 4  ;;  %s2313_s2 = sshll.u32 %s5018_s4, 1 }
  0x53   : > { %s389_s9 = sadd.s32 %s2313_s2, %s3346_s28  ;;  %s379_s29 = scalar_lea.vmem [#allocation6], %s2310_s13 }
  0x54   : > { %s2315_s30 = sshll.u32 %s389_s9, 7  ;;  %s392_s18 = sshll.u32 %s379_s29, 4  ;;  %s3356_s18 = int_to_ptr.vmem [resolvable:$true] %s392_s18 }
  0x55   : > { %s4910_s1 = sld [smem:[#allocation42_spill]]  ;;  %p3362_p9 = pnand %p4848_p7, %p3322_p12 }
  0x56   : > { %s3120_s2 = smov [#allocation11]  }
  0x57   : > { %s334_s4 = sshll.u32 %s3120_s2, 4  ;;  %p2841_p13 = pneg %p3362_p9  ;;  %s3366_s4 = int_to_ptr.vmem [resolvable:$true] %s334_s4 }
  0x5b   : > { %s3354_s26 = scalar_lea.hbm %s4910_s1, %s2315_s30  ;;  %s3368_s30 = scalar_lea.sflag [#allocation7], %s375_s19 }
  0x5c   : > { %s2839_s10 = scalar_lea.hbm %s3354_s26, 256  ;;  %s2844_s6 = scalar_lea.hbm %s4910_s1, 8192 }
  0x5d   : > { %p2840_p10 = scmp.ne.s32.totalorder %s3354_s26, %s2839_s10  ;;  %p2845_p12 = scmp.lt.u32.totalorder %s3354_s26, %s4910_s1 }
  0x5e   : > { %p2846_p4 = scmp.lt.u32.totalorder %s2844_s6, %s2839_s10  ;;  %p2848_p7 = scmp.lt.u32.totalorder %s2839_s10, %s3354_s26 }
  0x5f   : > { %p2842_p3 = pnand %p2841_p13, %p2840_p10 }
  0x60   : > { %p2847_p0 = por %p2846_p4, %p2845_p12 }
  0x61   : > { %p2843_p1 = pneg %p2842_p3 }
  0x62   : > { %p2849_p2 = por %p2848_p7, %p2847_p0 }
  0x64   : > { %p2850_p11 = pnand %p2849_p2, %p2843_p1 }
  0x66   : > { %2853 = shalt.err (!%p2850_p11)
}
  0x67   : > { %s2854_s19 = scalar_lea.vmem %s3356_s18, 256  ;;  %s3121_s25 = smov [#allocation6]  }
  0x68   : > { %p2855_p10 = scmp.ne.s32.totalorder %s3356_s18, %s2854_s19  ;;  %s2859_s2 = sshll.u32 %s3121_s25, 4  ;;  %s2860_s2 = int_to_ptr.vmem [resolvable:$false] %s2859_s2 }
  0x69   : > { %s2861_s11 = scalar_lea.vmem %s2860_s2, 512  ;;  %p2862_p5 = scmp.lt.s32.totalorder %s3356_s18, %s2860_s2 }
  0x6a   : > { %p2857_p3 = pnand %p2855_p10, %p2841_p13  ;;  %p2863_p4 = scmp.lt.s32.totalorder %s2861_s11, %s2854_s19 }
  0x6c   : > { %p2858_p8 = pneg %p2857_p3  ;;  %p2864_p12 = por %p2863_p4, %p2862_p5 }
  0x6e   : > { %p2865_p0 = pnand %p2864_p12, %p2858_p8 }
  0x70   : > { %2868 = shalt.err (!%p2865_p0)
}
  0x71   : > { %s4852_s10 = smov 128   ;;  %s4854_s13 = smov 8  }
  0x72   : > { %2544 = dma.hbm_to_vmem [thread:$0]  (!%p3362_p9), %s3354_s26, 256, %s3356_s18, %s3368_s30, %s4852_s10, %s4852_s10, %s4854_s13  }
  0x73   : > { %s4912_s7 = sld [smem:[#allocation48_spill]]  ;;  %p4913_p2 = pneg %p3268_p6 }
  0x79   : > { %s2869_s9 = scalar_lea.hbm %s4912_s7, 1024 }
  0x7a   : > { %p2870_p8 = scmp.ne.s32.totalorder %s4912_s7, %s2869_s9  ;;  %p2876_p7 = scmp.lt.u32.totalorder %s2869_s9, %s4912_s7 }
  0x7c   : > { %p2872_p11 = pnand %p2870_p8, %p4913_p2 }
  0x7e   : > { %p2873_p5 = pneg %p2872_p11 }
  0x80   : > { %p2878_p13 = pnand %p2876_p7, %p2873_p5 }
  0x82   : > { %2881 = shalt.err (!%p2878_p13)
}
  0x83   : > { %s2882_s18 = scalar_lea.vmem %s3366_s4, 1024  ;;  %p4914_p1 = pmov %p4913_p2 }
  0x84   : > { %p2883_p9 = scmp.ne.s32.totalorder %s3366_s4, %s2882_s18  ;;  %p2890_p4 = scmp.lt.s32.totalorder %s3366_s4, %s3366_s4 }
  0x85   : > { %p2891_p12 = scmp.lt.s32.totalorder %s2882_s18, %s2882_s18 }
  0x86   : > { %p2885_p10 = pnand %p2883_p9, %p4914_p1 }
  0x87   : > { %p2892_p0 = por %p2891_p12, %p2890_p4 }
  0x88   : > { %p2886_p3 = pneg %p2885_p10 }
  0x8a   : > { %p2893_p8 = pnand %p2892_p0, %p2886_p3 }
  0x8c   : > { %2896 = shalt.err (!%p2893_p8)
}
  0x8d   : > { %s4915_s26 = smov 4   ;;  %s4916_s5 = smov 64  }
  0x8e   : > { %2537 = dma.hbm_to_vmem [thread:$0]  (!%p3268_p6), %s4912_s7, 1024, %s3366_s4, [#allocation10], %s4916_s5, %s4916_s5, %s4915_s26  }
  0x8f   : > { %s2294_s27 = sadd.s32 4294967294, %s3115_s22   ;;  %s50_s9 = sadd.s32 1, %s3095_s17 }
  0x90   : > { %p57_p2 = scmp.ne.s32.totalorder %s3095_s17, %s3091_s16  ;;  %p4917_p11 = scmp.eq.s32.totalorder %s3317_s8, 0 }
  0x91   : > { %p4918_p5 = scmp.eq.s32.totalorder %s3115_s22, 0  ;;  %p63_p13 = scmp.ne.s32.totalorder %s3091_s16, %s3087_s15 }
  0x92   : > { %s3434_s19 = scalar_select %p4917_p11, %s3095_s17, %s50_s9  }
  0x93   : > { %p3438_p7 = por %p4918_p5, %p57_p2  ;;  %p4920_p9 = scmp.eq.s32.totalorder %s3254_s23, 3 }
  0x94   : > { %p293_p6 = scmp.eq.s32.totalorder %s2294_s27, 3  ;;  %p4923_p10 = scmp.eq.s32.totalorder %s3254_s23, 0 }
  0x95   : > { %p3446_p1 = por %p4920_p9, %p57_p2  ;;  %s351_s8 = sand.u32 1, %s3095_s17  }
  0x96   : > { %p3452_p3 = por %p4923_p10, %p63_p13  ;;  %p3457_p4 = por %p293_p6, %p63_p13 }
  0x97   : > { %s4921_s2 = scalar_select %p3446_p1, 1, 0 }
  0x98   : > { %s4925_s11 = scalar_select %p3457_p4, 1, 0 }
  0x99   : > { %4922 = sst [smem:[#allocation31_spill]] %s4921_s2  ;;  %s2305_s18 = sshll.u32 %s351_s8, 7 }
  0x9a   : > { %s2359_s26 = sshll.u32 %s3107_s20, 4  ;;  %s355_s29 = scalar_lea.vmem [#allocation3], %s2305_s18 }
  0x9b   : > { %s362_s5 = sadd.s32 %s2359_s26, %s3346_s28  ;;  %s365_s9 = sshll.u32 %s355_s29, 4  ;;  %s3468_s9 = int_to_ptr.vmem [resolvable:$true] %s365_s9 }
  0x9c   : > { %s2309_s6 = sshll.u32 %s362_s5, 7  ;;  %s4926_s0 = sld [smem:[#allocation41_spill]] }
  0x9d   : > { %p4927_p12 = scmp.lt.s32.totalorder %s3115_s22, 4  ;;  %s3478_s18 = scalar_lea.sflag [#allocation4], %s351_s8 }
  0x9f   : > { %p3474_p0 = pnand %p4927_p12, %p3438_p7 }
  0xa1   : > { %p2899_p2 = pneg %p3474_p0 }
  0xa2   : > { %s3466_s27 = scalar_lea.hbm %s4926_s0, %s2309_s6  ;;  %s2902_s25 = scalar_lea.hbm %s4926_s0, 8192 }
  0xa3   : > { %s2897_s26 = scalar_lea.hbm %s3466_s27, 2048  ;;  %p2903_p7 = scmp.lt.u32.totalorder %s3466_s27, %s4926_s0 }
  0xa4   : > { %p2898_p8 = scmp.ne.s32.totalorder %s3466_s27, %s2897_s26  ;;  %p2904_p13 = scmp.lt.u32.totalorder %s2902_s25, %s2897_s26 }
  0xa5   : > { %p2906_p6 = scmp.lt.u32.totalorder %s2897_s26, %s3466_s27 }
  0xa6   : > { %p2900_p11 = pnand %p2899_p2, %p2898_p8  ;;  %p2905_p9 = por %p2904_p13, %p2903_p7 }
  0xa8   : > { %p2901_p5 = pneg %p2900_p11  ;;  %p2907_p10 = por %p2906_p6, %p2905_p9 }
  0xaa   : > { %p2908_p12 = pnand %p2907_p10, %p2901_p5 }
  0xac   : > { %2911 = shalt.err (!%p2908_p12)
}
  0xad   : > { %s2912_s8 = scalar_lea.vmem %s3468_s9, 2048  ;;  %s3124_s29 = smov [#allocation3]  }
  0xae   : > { %p2913_p8 = scmp.ne.s32.totalorder %s3468_s9, %s2912_s8  ;;  %s2917_s10 = sshll.u32 %s3124_s29, 4  ;;  %s2918_s10 = int_to_ptr.vmem [resolvable:$false] %s2917_s10 }
  0xaf   : > { %s2919_s13 = scalar_lea.vmem %s2918_s10, 4096  ;;  %p2920_p1 = scmp.lt.s32.totalorder %s3468_s9, %s2918_s10 }
  0xb0   : > { %p2915_p11 = pnand %p2913_p8, %p2899_p2  ;;  %p2921_p7 = scmp.lt.s32.totalorder %s2919_s13, %s2912_s8 }
  0xb2   : > { %p2916_p4 = pneg %p2915_p11  ;;  %p2922_p13 = por %p2921_p7, %p2920_p1 }
  0xb4   : > { %p2923_p9 = pnand %p2922_p13, %p2916_p4 }
  0xb6   : > { %2926 = shalt.err (!%p2923_p9)
}
  0xb7   : > { %s4929_s26 = smov 8   ;;  %s4930_s25 = smov 128  }
  0xb8   : > { %s4931_s5 = sld [smem:[#allocation20_spill]]  ;;  %s4932_s6 = sld [smem:[#allocation19_spill]] }
  0xb9   : > { %s4933_s29 = sld [smem:[#allocation18_spill]]  ;;  %s4934_s8 = sld [smem:[#allocation29_spill]] }
  0xba   : > { %2541 = dma.hbm_to_vmem [thread:$0]  (!%p3474_p0), %s3466_s27, 2048, %s3468_s9, %s3478_s18, %s4930_s25, %s4930_s25, %s4929_s26  }
  0xbb   : > { %p4935_p1 = scmp.lt.s32.totalorder %s3328_s3, 15  ;;  %p4936_p4 = scmp.lt.s32.totalorder %s3338_s24, 15 }
  0xbc   : > { %p4937_p6 = scmp.eq.s32.totalorder %s3115_s22, 0  ;;  %p4939_p8 = scmp.eq.s32.totalorder %s3254_s23, 0 }
  0xbd   : > { %s5022_s3 = smov (!%p4935_p1, %s3328_s3), 15  ;;  %s5024_s24 = smov (!%p4936_p4, %s3338_s24), 15 }
  0xbe   : > { %s122_s1 = sadd.s32 1, %s4931_s5  ;;  %p129_p2 = scmp.ne.s32.totalorder %s4931_s5, %s4932_s6 }
  0xbf   : > { %s118_s10 = ssub.s32 %s5022_s3, %s5024_s24  ;;  %p135_p5 = scmp.ne.s32.totalorder %s4932_s6, %s4933_s29 }
  0xc0   : > { %s119_s13 = sor.u32 %s118_s10, %s4934_s8  ;;  %p3523_p10 = por %p129_p2, %p4937_p6 }
  0xc1   : > { %p120_p12 = scmp.eq.s32.totalorder %s119_s13, 0  ;;  %p3529_p11 = por %p135_p5, %p4939_p8 }
  0xc2   : > { %s404_s27 = sand.u32 1, %s4931_s5   ;;  %s2318_s18 = sshll.u32 %s5022_s3, 1 }
  0xc3   : > { %s4940_s9 = scalar_select %p3529_p11, 1, 0 }
  0xc4   : > { %s5026_s5 = smov (!%p120_p12, %s4931_s5), %s122_s1  ;;  %s2316_s24 = sshll.u32 %s404_s27, 4 }
  0xc5   : > { %s416_s7 = sadd.s32 %s2318_s18, %s3346_s28  ;;  %s4941_s10 = sld [smem:[#allocation43_spill]] }
  0xc6   : > { %s2320_s6 = sshll.u32 %s416_s7, 7  ;;  %s406_s13 = scalar_lea.vmem [#allocation8], %s2316_s24 }
  0xc7   : > { %s419_s20 = sshll.u32 %s406_s13, 4  ;;  %p4943_p0 = scmp.lt.s32.totalorder %s3115_s22, 4  ;;  %s3543_s20 = int_to_ptr.vmem [resolvable:$true] %s419_s20 }
  0xc9   : > { %p3549_p7 = pnand %p4943_p0, %p3523_p10 }
  0xcb   : > { %s4942_s2 = smov %s4941_s10  ;;  %s3541_s21 = scalar_lea.hbm %s4941_s10, %s2320_s6 }
  0xcc   : > { %s2927_s7 = scalar_lea.hbm %s3541_s21, 256  ;;  %p2929_p9 = pneg %p3549_p7 }
  0xcd   : > { %p2928_p13 = scmp.ne.s32.totalorder %s3541_s21, %s2927_s7  ;;  %s2932_s27 = scalar_lea.hbm %s4942_s2, 8192 }
  0xce   : > { %p2933_p2 = scmp.lt.u32.totalorder %s3541_s21, %s4942_s2  ;;  %p2934_p5 = scmp.lt.u32.totalorder %s2932_s27, %s2927_s7 }
  0xcf   : > { %p2930_p1 = pnand %p2929_p9, %p2928_p13  ;;  %p2936_p10 = scmp.lt.u32.totalorder %s2927_s7, %s3541_s21 }
  0xd0   : > { %p2935_p6 = por %p2934_p5, %p2933_p2 }
  0xd1   : > { %p2931_p4 = pneg %p2930_p1 }
  0xd2   : > { %p2937_p12 = por %p2936_p10, %p2935_p6 }
  0xd4   : > { %p2938_p8 = pnand %p2937_p12, %p2931_p4 }
  0xd6   : > { %2941 = shalt.err (!%p2938_p8)
}
  0xd7   : > { %s2942_s24 = scalar_lea.vmem %s3543_s20, 256  ;;  %s3125_s6 = smov [#allocation8]  }
  0xd8   : > { %p2943_p0 = scmp.ne.s32.totalorder %s3543_s20, %s2942_s24  ;;  %s2947_s29 = sshll.u32 %s3125_s6, 4  ;;  %s2948_s29 = int_to_ptr.vmem [resolvable:$false] %s2947_s29 }
  0xd9   : > { %s2949_s8 = scalar_lea.vmem %s2948_s29, 512  ;;  %p2950_p11 = scmp.lt.s32.totalorder %s3543_s20, %s2948_s29 }
  0xda   : > { %p2945_p13 = pnand %p2943_p0, %p2929_p9  ;;  %p2951_p2 = scmp.lt.s32.totalorder %s2949_s8, %s2942_s24 }
  0xdc   : > { %p2946_p1 = pneg %p2945_p13  ;;  %p2952_p5 = por %p2951_p2, %p2950_p11 }
  0xde   : > { %p2953_p6 = pnand %p2952_p5, %p2946_p1 }
  0xe0   : > { %2956 = shalt.err (!%p2953_p6)
}
  0xe1   : > { %2547 = dma.hbm_to_vmem [thread:$0]  (!%p3549_p7), %s3541_s21, 256, %s3543_s20, %s3368_s30, %s4930_s25, %s4930_s25, %s4929_s26  }
  0xe2   : > { %s4945_s10 = sld [smem:[#allocation26_spill]] }
  0xe8   : > { %p4946_p9 = scmp.ne.s32.totalorder %s4945_s10, 0 }
  0xea   : > { %431 = sbr.rel (%p4946_p9) target bundleno = 1297 (0x511), region = 56 }
  0xf1   : > { %s3585_s13 = sand.u32 1, %s3091_s16  }
  0xf2   : > { %s2322_s7 = sshll.u32 %s3585_s13, 7  ;;  %s434_s28 = scalar_lea.sflag [#allocation4], %s3585_s13 }
  0xf3   : > { %s3591_s3 = scalar_lea.vmem [#allocation3], %s2322_s7 }
  0xf4   : > { %3042 = dma.done.wait (%p3452_p3), %s434_s28, 2048  }
  0xf5   : > { %3044 = vsyncadd (%p3452_p3), %s434_s28, 4294965248  ;;  %s4947_s20 = sld [smem:[#allocation21_spill]]  ;;  %s4948_s21 = sld [smem:[#allocation30_spill]] }
  0xf6   : > { %s442_s30 = sand.u32 1, %s3254_s23  }
  0xf7   : > { %s443_s1 = scalar_lea.sflag [#allocation7], %s442_s30 }
  0xfb   : > { %s444_s26 = sand.u32 1, %s4947_s20   ;;  %p4949_p11 = scmp.ne.s32.totalorder %s4948_s21, 0 }
  0xfc   : > { %s3599_s25 = sshll.u32 %s444_s26, 4 }
  0xfd   : > { %s446_s27 = scalar_lea.vmem [#allocation6], %s3599_s25 }
  0xfe   : > { %3046 = dma.done.wait (%p4949_p11), %s443_s1, 256  }
  0xff   : > { %3048 = vsyncadd (%p4949_p11), %s443_s1, 4294967040  ;;  %s4950_s0 = sld [smem:[#allocation19_spill]]  ;;  %p4951_p3 = scmp.ne.s32.totalorder %s4940_s9, 0 }
 0x105   : > { %s453_s18 = sand.u32 1, %s4950_s0  }
 0x106   : > { %s3607_s4 = sshll.u32 %s453_s18, 4 }
 0x107   : > { %s455_s24 = scalar_lea.vmem [#allocation8], %s3607_s4 }
 0x108   : > { %3050 = dma.done.wait (%p4951_p3), %s443_s1, 256  }
 0x109   : > { %3052 = vsyncadd (%p4951_p3), %s443_s1, 4294967040  ;;  %p4952_p7 = scmp.eq.s32.totalorder %s3254_s23, 0 }
 0x10b   : > { %3054 = dma.done.wait (%p4952_p7), [#allocation10], 2048   ;;  %p4953_p4 = pmov %p4952_p7 }
 0x10c   : > { %v519_v0 = vld [vmem:[%s3591_s3] sm:$0xff]  ;;  %v521_v1 = vld [vmem:[%s3591_s3 + $0x10] sm:$0xff]  ;;  %v520_v2 = vld [vmem:[%s3591_s3 + $0x8] sm:$0xff]  ;;  %vm3127_vm0 = vmmov 0   ;;  %s4957_s6 = sld [smem:[#allocation45_spill]]  ;;  %s4069_s29 = scalar_lea.vmem [#allocation12], %s2322_s7 }
 0x10d   : > { %3056 = vsyncadd (%p4953_p4), [#allocation10], 4294965248  ;;  %535 = vadd.xlane.f32.xlu0 %v519_v0  ;;  %539 = vadd.xlane.f32.xlu1 %v521_v1  ;;  %v522_v3 = vld [vmem:[%s3591_s3 + $0x18] sm:$0xff]  ;;  %v523_v4 = vld [vmem:[%s3591_s3 + $0x20] sm:$0xff]  ;;  %s4967_s8 = sld [smem:[#allocation22_spill]] }
 0x10e   : > { %v524_v5 = vld [vmem:[%s3591_s3 + $0x28] sm:$0xff]  ;;  %v3625_v6 = vld [vmem:[%s3591_s3 + $0x30] sm:$0xff]  ;;  %v3628_v7 = vld [vmem:[%s3591_s3 + $0x38] sm:$0xff] }
 0x10f   : > { %v3633_v8 = vld [vmem:[%s3591_s3 + $0x40] sm:$0xff]  ;;  %v3636_v9 = vld [vmem:[%s3591_s3 + $0x48] sm:$0xff]  ;;  %v3641_v10 = vld [vmem:[%s3591_s3 + $0x50] sm:$0xff] }
 0x110   : > { %v3644_v11 = vld [vmem:[%s3591_s3 + $0x58] sm:$0xff]  ;;  %v3649_v12 = vld [vmem:[%s3591_s3 + $0x60] sm:$0xff]  ;;  %v3652_v13 = vld [vmem:[%s3591_s3 + $0x68] sm:$0xff] }
 0x111   : > { %537 = vadd.xlane.f32.xlu0 %v520_v2  ;;  %541 = vadd.xlane.f32.xlu1 %v522_v3  ;;  %v3657_v14 = vld [vmem:[%s3591_s3 + $0x70] sm:$0xff]  ;;  %v3660_v15 = vld [vmem:[%s3591_s3 + $0x78] sm:$0xff]  ;;  %v3684_v20 = vld [vmem:[#allocation9] sm:$0xff]  }
 0x112   : > { %v3666_v16 = vld [vmem:[%s446_s27] sm:$0xff]  ;;  %v3670_v17 = vld [vmem:[%s446_s27 + $0x8] sm:$0xff]  ;;  %2411 = vmatprep.subr.bf16.mxu0 %v3684_v20 }
 0x113   : > { %v3676_v18 = vld [vmem:[%s455_s24] sm:$0xff]  ;;  %v3680_v19 = vld [vmem:[%s455_s24 + $0x8] sm:$0xff]  ;;  %2412 = vmatpush3.bf16.msra.mxu0 %v3684_v20  ;;  %p2337_p10 = scmp.ne.s32.totalorder %s4967_s8, 0 }
 0x115   : > { %543 = vadd.xlane.f32.xlu0 %v523_v4  ;;  %545 = vadd.xlane.f32.xlu1 %v524_v5 }
 0x119   : > { %547 = vadd.xlane.f32.xlu0 %v3625_v6  ;;  %549 = vadd.xlane.f32.xlu1 %v3628_v7 }
 0x11d   : > { %551 = vadd.xlane.f32.xlu0 %v3633_v8  ;;  %553 = vadd.xlane.f32.xlu1 %v3636_v9 }
 0x121   : > { %555 = vadd.xlane.f32.xlu0 %v3641_v10  ;;  %557 = vadd.xlane.f32.xlu1 %v3644_v11 }
 0x125   : > { %559 = vadd.xlane.f32.xlu0 %v3649_v12  ;;  %561 = vadd.xlane.f32.xlu1 %v3652_v13 }
 0x129   : > { %563 = vadd.xlane.f32.xlu0 %v3657_v14  ;;  %565 = vadd.xlane.f32.xlu1 %v3660_v15 }
 0x12d   : > { %1034 = vadd.xlane.f32.xlu0 %v3666_v16  ;;  %1036 = vadd.xlane.f32.xlu1 %v3670_v17 }
 0x131   : > { %1118 = vadd.xlane.f32.xlu0 %v3676_v18  ;;  %1120 = vadd.xlane.f32.xlu1 %v3680_v19 }
 0x19a   : > { %v536_v21 = vpop.xlane.xlu0 %535  ;;  %v540_v22 = vpop.xlane.xlu1 %539 }
 0x19b   : > { %v3688_v23 = vmul.f32 0.25, %v536_v21  ;;  %v3690_v24 = vmul.f32 0.25, %v540_v22  ;;  %v3794_v21 = vld [vmem:[#allocation9 + $0x10] sm:$0xff]  }
 0x19d   : > { %v3693_v25 = vsub.f32 %v519_v0, %v3688_v23  ;;  %v3696_v26 = vsub.f32 %v521_v1, %v3690_v24 }
 0x19e   : > { %v538_v27 = vpop.xlane.xlu0 %537  ;;  %v542_v28 = vpop.xlane.xlu1 %541 }
 0x19f   : > { %v3698_v29 = vmul.f32 0.25, %v538_v27  ;;  %v599_v30 = vmul.f32 %v3693_v25, %v3693_v25  ;;  %v3702_v31 = vmul.f32 0.25, %v542_v28  ;;  %v601_v34 = vmul.f32 %v3696_v26, %v3696_v26 }
 0x1a1   : > { %v3705_v32 = vsub.f32 %v520_v2, %v3698_v29  ;;  %615 = vadd.xlane.f32.xlu0 %v599_v30  ;;  %v3708_v33 = vsub.f32 %v522_v3, %v3702_v31  ;;  %v3774_v3 = vld [vmem:[#allocation9 + $0x8] sm:$0xff]  }
 0x1a2   : > { %v544_v35 = vpop.xlane.xlu0 %543  ;;  %v546_v36 = vpop.xlane.xlu1 %545  ;;  %2413 = vmatprep.subr.bf16.mxu0 %v3774_v3 }
 0x1a3   : > { %v3712_v37 = vmul.f32 0.25, %v544_v35  ;;  %v600_v38 = vmul.f32 %v3705_v32, %v3705_v32  ;;  %v3716_v39 = vmul.f32 0.25, %v546_v36  ;;  %v602_v42 = vmul.f32 %v3708_v33, %v3708_v33  ;;  %2414 = vmatpush3.bf16.msra.mxu0 %v3774_v3  ;;  %v3814_v36 = vld [vmem:[#allocation9 + $0x18] sm:$0xff]  }
 0x1a4   : > { %2415 = vmatprep.subr.bf16.mxu0 %v3794_v21 }
 0x1a5   : > { %v3719_v40 = vsub.f32 %v523_v4, %v3712_v37  ;;  %619 = vadd.xlane.f32.xlu0 %v601_v34  ;;  %617 = vadd.xlane.f32.xlu1 %v600_v38  ;;  %v3722_v41 = vsub.f32 %v524_v5, %v3716_v39 }
 0x1a6   : > { %v548_v43 = vpop.xlane.xlu0 %547  ;;  %v550_v44 = vpop.xlane.xlu1 %549 }
 0x1a7   : > { %v3726_v45 = vmul.f32 0.25, %v548_v43  ;;  %v603_v46 = vmul.f32 %v3719_v40, %v3719_v40  ;;  %v3730_v47 = vmul.f32 0.25, %v550_v44  ;;  %v604_v50 = vmul.f32 %v3722_v41, %v3722_v41  ;;  %2416 = vmatpush3.bf16.msra.mxu0 %v3794_v21 }
 0x1a8   : > { %2417 = vmatprep.subr.bf16.mxu0 %v3814_v36 }
 0x1a9   : > { %v3734_v48 = vsub.f32 %v3625_v6, %v3726_v45  ;;  %621 = vadd.xlane.f32.xlu1 %v602_v42  ;;  %623 = vadd.xlane.f32.xlu0 %v603_v46  ;;  %v3738_v49 = vsub.f32 %v3628_v7, %v3730_v47 }
 0x1aa   : > { %v552_v51 = vpop.xlane.xlu0 %551  ;;  %v554_v52 = vpop.xlane.xlu1 %553 }
 0x1ab   : > { %v3742_v53 = vmul.f32 0.25, %v552_v51  ;;  %v605_v54 = vmul.f32 %v3734_v48, %v3734_v48  ;;  %v3746_v55 = vmul.f32 0.25, %v554_v52  ;;  %v606_v58 = vmul.f32 %v3738_v49, %v3738_v49  ;;  %2418 = vmatpush3.bf16.msra.mxu0 %v3814_v36  ;;  %v3834_v51 = vld [vmem:[#allocation9 + $0x20] sm:$0xff]  }
 0x1ac   : > { %2419 = vmatprep.subr.bf16.mxu0 %v3834_v51 }
 0x1ad   : > { %v3750_v56 = vsub.f32 %v3633_v8, %v3742_v53  ;;  %625 = vadd.xlane.f32.xlu1 %v604_v50  ;;  %627 = vadd.xlane.f32.xlu0 %v605_v54  ;;  %v3754_v57 = vsub.f32 %v3636_v9, %v3746_v55 }
 0x1ae   : > { %v556_v59 = vpop.xlane.xlu0 %555  ;;  %v558_v60 = vpop.xlane.xlu1 %557 }
 0x1af   : > { %v3758_v61 = vmul.f32 0.25, %v556_v59  ;;  %v607_v62 = vmul.f32 %v3750_v56, %v3750_v56  ;;  %v3762_v63 = vmul.f32 0.25, %v558_v60  ;;  %v608_v2 = vmul.f32 %v3754_v57, %v3754_v57  ;;  %2420 = vmatpush3.bf16.msra.mxu0 %v3834_v51 }
 0x1b1   : > { %v3766_v0 = vsub.f32 %v3641_v10, %v3758_v61  ;;  %629 = vadd.xlane.f32.xlu1 %v606_v58  ;;  %631 = vadd.xlane.f32.xlu0 %v607_v62  ;;  %v3770_v1 = vsub.f32 %v3644_v11, %v3762_v63 }
 0x1b2   : > { %v560_v4 = vpop.xlane.xlu0 %559  ;;  %v562_v5 = vpop.xlane.xlu1 %561 }
 0x1b3   : > { %v3776_v6 = vmul.f32 0.25, %v560_v4  ;;  %v609_v7 = vmul.f32 %v3766_v0, %v3766_v0  ;;  %v3780_v8 = vmul.f32 0.25, %v562_v5  ;;  %v610_v11 = vmul.f32 %v3770_v1, %v3770_v1  ;;  %v3862_v5 = vld [vmem:[#allocation9 + $0x30] sm:$0xff]  }
 0x1b5   : > { %v3786_v9 = vsub.f32 %v3649_v12, %v3776_v6  ;;  %633 = vadd.xlane.f32.xlu1 %v608_v2  ;;  %635 = vadd.xlane.f32.xlu0 %v609_v7  ;;  %v3790_v10 = vsub.f32 %v3652_v13, %v3780_v8  ;;  %v3854_v2 = vld [vmem:[#allocation9 + $0x28] sm:$0xff]   ;;  %v4862_v7 = vmov 0.0  }
 0x1b6   : > { %v564_v22 = vpop.xlane.xlu0 %563  ;;  %v566_v27 = vpop.xlane.xlu1 %565  ;;  %2421 = vmatprep.subr.bf16.mxu0 %v3854_v2  ;;  %2443 = vmatprep.subr.bf16.mxu1 %v4862_v7 }
 0x1b7   : > { %v3796_v28 = vmul.f32 0.25, %v564_v22  ;;  %v611_v30 = vmul.f32 %v3786_v9, %v3786_v9  ;;  %v3800_v12 = vmul.f32 0.25, %v566_v27  ;;  %v612_v35 = vmul.f32 %v3790_v10, %v3790_v10  ;;  %2422 = vmatpush3.bf16.msra.mxu0 %v3854_v2  ;;  %2444 = vmatpush3.bf16.msra.mxu1 %v3684_v20 }
 0x1b8   : > { %2423 = vmatprep.subr.bf16.mxu0 %v3862_v5  ;;  %2445 = vmatprep.subr.bf16.mxu1 %v4862_v7  ;;  %v649_v22 = vmul.f32 %v3690_v24, %v3690_v24  ;;  %v648_v27 = vmul.f32 %v3698_v29, %v3698_v29  ;;  %v652_v29 = vmul.f32 %v3716_v39, %v3716_v39 }
 0x1b9   : > { %v3806_v13 = vsub.f32 %v3657_v14, %v3796_v28  ;;  %637 = vadd.xlane.f32.xlu1 %v610_v11  ;;  %639 = vadd.xlane.f32.xlu0 %v611_v30  ;;  %v3810_v34 = vsub.f32 %v3660_v15, %v3800_v12  ;;  %v647_v11 = vmul.f32 %v3688_v23, %v3688_v23 }
 0x1ba   : > { %v1035_v38 = vpop.xlane.xlu0 %1034  ;;  %v1037_v42 = vpop.xlane.xlu1 %1036  ;;  %2459 = vmatprep.mubr.msk.bf16.mxu1 %vm3127_vm0, %v4862_v7 }
 0x1bb   : > { %v3816_v43 = vmul.f32 0.25, %v1035_v38  ;;  %v613_v44 = vmul.f32 %v3806_v13, %v3806_v13  ;;  %v3820_v14 = vmul.f32 0.25, %v1037_v42  ;;  %v614_v50 = vmul.f32 %v3810_v34, %v3810_v34  ;;  %2424 = vmatpush3.bf16.msra.mxu0 %v3862_v5  ;;  %2446 = vmatpush3.bf16.msra.mxu1 %v3774_v3 }
 0x1bc   : > { %2447 = vmatprep.subr.bf16.mxu1 %v4862_v7  ;;  %v663_v30 = vmul.f32 124.0, %v647_v11  ;;  %v650_v42 = vmul.f32 %v3702_v31, %v3702_v31 }
 0x1bd   : > { %v3826_v15 = vsub.f32 %v3666_v16, %v3816_v43  ;;  %641 = vadd.xlane.f32.xlu1 %v612_v35  ;;  %643 = vadd.xlane.f32.xlu0 %v613_v44  ;;  %v3830_v46 = vsub.f32 %v3670_v17, %v3820_v14 }
 0x1be   : > { %v1119_v52 = vpop.xlane.xlu0 %1118  ;;  %v1121_v54 = vpop.xlane.xlu1 %1120 }
 0x1bf   : > { %v3836_v58 = vmul.f32 0.25, %v1119_v52  ;;  %v1042_v59 = vmul.f32 %v3826_v15, %v3826_v15  ;;  %v3840_v16 = vmul.f32 0.25, %v1121_v54  ;;  %v1043_v62 = vmul.f32 %v3830_v46, %v3830_v46  ;;  %2448 = vmatpush3.bf16.msra.mxu1 %v3794_v21 }
 0x1c0   : > { %2449 = vmatprep.subr.bf16.mxu1 %v4862_v7  ;;  %v665_v52 = vmul.f32 124.0, %v649_v22  ;;  %v651_v54 = vmul.f32 %v3712_v37, %v3712_v37 }
 0x1c1   : > { %v3846_v17 = vsub.f32 %v3676_v18, %v3836_v58  ;;  %645 = vadd.xlane.f32.xlu1 %v614_v50  ;;  %1044 = vadd.xlane.f32.xlu0 %v1042_v59  ;;  %v3850_v60 = vsub.f32 %v3680_v19, %v3840_v16  ;;  %v3866_v19 = vld [vmem:[#allocation9 + $0x38] sm:$0xff]   ;;  %v664_v50 = vmul.f32 124.0, %v648_v27 }
 0x1c2   : > { %4954 = vst [vmem:[#allocation32_spill] sm:$0xff] %v3866_v19  ;;  %2425 = vmatprep.subr.bf16.mxu0 %v3866_v19  ;;  %v667_v22 = vmul.f32 124.0, %v651_v54 }
 0x1c3   : > { %v1126_v4 = vmul.f32 %v3846_v17, %v3846_v17  ;;  %v1127_v18 = vmul.f32 %v3850_v60, %v3850_v60  ;;  %2426 = vmatpush3.bf16.msra.mxu0 %v3866_v19  ;;  %2450 = vmatpush3.bf16.msra.mxu1 %v3814_v36 }
 0x1c4   : > { %2463 = vmatprep.subr.bf16.mxu0 %v4862_v7  ;;  %2451 = vmatprep.subr.bf16.mxu1 %v4862_v7 }
 0x1c5   : > { %1046 = vadd.xlane.f32.xlu1 %v1043_v62  ;;  %1128 = vadd.xlane.f32.xlu0 %v1126_v4 }
 0x1c7   : > { %2452 = vmatpush3.bf16.msra.mxu1 %v3834_v51 }
 0x1c8   : > { %2453 = vmatprep.subr.bf16.mxu1 %v4862_v7 }
 0x1c9   : > { %1130 = vadd.xlane.f32.xlu1 %v1127_v18  ;;  %v653_v18 = vmul.f32 %v3726_v45, %v3726_v45 }
 0x1cb   : > { %2454 = vmatpush3.bf16.msra.mxu1 %v3854_v2 }
 0x1cc   : > { %2455 = vmatprep.subr.bf16.mxu1 %v4862_v7 }
 0x1cf   : > { %2456 = vmatpush3.bf16.msra.mxu1 %v3862_v5 }
 0x1d0   : > { %2457 = vmatprep.subr.bf16.mxu1 %v4862_v7 }
 0x1d3   : > { %2458 = vmatpush3.bf16.msra.mxu1 %v3866_v19 }
 0x22e   : > { %v616_v35 = vpop.xlane.xlu0 %615 }
 0x22f   : > { %v679_v38 = vsub.f32 %v616_v35, %v663_v30  ;;  %v666_v35 = vmul.f32 124.0, %v650_v42  ;;  %v656_v42 = vmul.f32 %v3746_v55, %v3746_v55 }
 0x231   : > { %v695_v44 = vmax.f32 %v679_v38, 0.0 }
 0x232   : > { %v618_v59 = vpop.xlane.xlu1 %617  ;;  %v620_v23 = vpop.xlane.xlu0 %619 }
 0x233   : > { %v711_v62 = vmul.f32 0.25, %v695_v44  ;;  %v680_v4 = vsub.f32 %v618_v59, %v664_v50  ;;  %v681_v24 = vsub.f32 %v620_v23, %v665_v52  ;;  %v654_v44 = vmul.f32 %v3730_v47, %v3730_v47 }
 0x234   : > { %v668_v52 = vmul.f32 124.0, %v652_v29  ;;  %v669_v59 = vmul.f32 124.0, %v653_v18  ;;  %v657_v29 = vmul.f32 %v3758_v61, %v3758_v61  ;;  %v659_v61 = vmul.f32 %v3776_v6, %v3776_v6 }
 0x235   : > { %v727_v11 = vadd.f32 1e-06, %v711_v62  ;;  %v696_v30 = vmax.f32 %v680_v4, 0.0  ;;  %v697_v31 = vmax.f32 %v681_v24, 0.0  ;;  %v655_v62 = vmul.f32 %v3742_v53, %v3742_v53 }
 0x236   : > { %v622_v27 = vpop.xlane.xlu1 %621  ;;  %v624_v38 = vpop.xlane.xlu0 %623  ;;  %v658_v53 = vmul.f32 %v3762_v63, %v3762_v63 }
 0x237   : > { %v712_v7 = vmul.f32 0.25, %v696_v30  ;;  %v713_v37 = vmul.f32 0.25, %v697_v31  ;;  %v682_v19 = vsub.f32 %v622_v27, %v666_v35  ;;  %v683_v50 = vsub.f32 %v624_v38, %v667_v22 }
 0x238   : > { %2690 = vrsqrt.f32 %v727_v11  ;;  %v671_v22 = vmul.f32 124.0, %v655_v62  ;;  %v661_v62 = vmul.f32 %v3796_v28, %v3796_v28 }
 0x239   : > { %v728_v39 = vadd.f32 1e-06, %v712_v7  ;;  %v729_v23 = vadd.f32 1e-06, %v713_v37  ;;  %v698_v45 = vmax.f32 %v682_v19, 0.0  ;;  %v699_v54 = vmax.f32 %v683_v50, 0.0 }
 0x23a   : > { %v626_v4 = vpop.xlane.xlu1 %625  ;;  %v628_v24 = vpop.xlane.xlu0 %627  ;;  %v670_v7 = vmul.f32 124.0, %v654_v44  ;;  %v672_v37 = vmul.f32 124.0, %v656_v42  ;;  %v660_v44 = vmul.f32 %v3780_v8, %v3780_v8  ;;  %v662_v8 = vmul.f32 %v3800_v12, %v3800_v12 }
 0x23b   : > { %2692 = vrsqrt.f32 %v728_v39  ;;  %v714_v30 = vmul.f32 0.25, %v698_v45  ;;  %v684_v31 = vsub.f32 %v626_v4, %v668_v52  ;;  %v685_v47 = vsub.f32 %v628_v24, %v669_v59 }
 0x23c   : > { %v715_v18 = vmul.f32 0.25, %v699_v54  ;;  %2694 = vrsqrt.f32 %v729_v23  ;;  %v673_v23 = vmul.f32 124.0, %v657_v29 }
 0x23d   : > { %v730_v19 = vadd.f32 1e-06, %v714_v30  ;;  %v700_v11 = vmax.f32 %v684_v31, 0.0  ;;  %v701_v35 = vmax.f32 %v685_v47, 0.0  ;;  %v674_v30 = vmul.f32 124.0, %v658_v53 }
 0x23e   : > { %v731_v55 = vadd.f32 1e-06, %v715_v18  ;;  %v630_v27 = vpop.xlane.xlu1 %629  ;;  %v632_v38 = vpop.xlane.xlu0 %631 }
 0x23f   : > { %2696 = vrsqrt.f32 %v730_v19  ;;  %v716_v50 = vmul.f32 0.25, %v700_v11  ;;  %v717_v52 = vmul.f32 0.25, %v701_v35  ;;  %v686_v59 = vsub.f32 %v630_v27, %v670_v7 }
 0x240   : > { %v687_v39 = vsub.f32 %v632_v38, %v671_v22  ;;  %2698 = vrsqrt.f32 %v731_v55  ;;  %v675_v7 = vmul.f32 124.0, %v659_v61  ;;  %v676_v19 = vmul.f32 124.0, %v660_v44 }
 0x241   : > { %v732_v45 = vadd.f32 1e-06, %v716_v50  ;;  %v733_v63 = vadd.f32 1e-06, %v717_v52  ;;  %v702_v54 = vmax.f32 %v686_v59, 0.0  ;;  %v1048_v61 = vmul.f32 %v3816_v43, %v3816_v43 }
 0x242   : > { %v703_v42 = vmax.f32 %v687_v39, 0.0  ;;  %v634_v4 = vpop.xlane.xlu1 %633  ;;  %v636_v24 = vpop.xlane.xlu0 %635 }
 0x243   : > { %v2691_v31 = vpop.eup %2690  ;;  %2700 = vrsqrt.f32 %v732_v45  ;;  %v718_v47 = vmul.f32 0.25, %v702_v54  ;;  %v688_v6 = vsub.f32 %v634_v4, %v672_v37  ;;  %v689_v18 = vsub.f32 %v636_v24, %v673_v23 }
 0x244   : > { %v719_v29 = vmul.f32 0.25, %v703_v42  ;;  %2702 = vrsqrt.f32 %v733_v63  ;;  %v759_v53 = vmul.f32 %v2691_v31, %v3693_v25  ;;  %v677_v37 = vmul.f32 124.0, %v661_v62 }
 0x245   : > { %v2693_v11 = vpop.eup %2692  ;;  %v734_v35 = vadd.f32 1e-06, %v718_v47  ;;  %v704_v55 = vmax.f32 %v688_v6, 0.0  ;;  %v705_v28 = vmax.f32 %v689_v18, 0.0  ;;  %v678_v45 = vmul.f32 124.0, %v662_v8 }
 0x246   : > { %v735_v27 = vadd.f32 1e-06, %v719_v29  ;;  %v638_v22 = vpop.xlane.xlu1 %637  ;;  %v640_v38 = vpop.xlane.xlu0 %639  ;;  %v760_v50 = vmul.f32 %v2693_v11, %v3705_v32  ;;  %v1049_v25 = vmul.f32 %v3820_v14, %v3820_v14  ;;  %v1132_v8 = vmul.f32 %v3836_v58, %v3836_v58 }
 0x247   : > { %v2695_v52 = vpop.eup %2694  ;;  %2704 = vrsqrt.f32 %v734_v35  ;;  %v720_v59 = vmul.f32 0.25, %v704_v55  ;;  %v721_v12 = vmul.f32 0.25, %v705_v28  ;;  %v690_v39 = vsub.f32 %v638_v22, %v674_v30 }
 0x248   : > { %v691_v44 = vsub.f32 %v640_v38, %v675_v7  ;;  %v775_v23 = vpack.c.bf16 %v760_v50, %v759_v53  ;;  %2706 = vrsqrt.f32 %v735_v27  ;;  %v761_v30 = vmul.f32 %v2695_v52, %v3696_v26 }
 0x249   : > { %v2697_v63 = vpop.eup %2696  ;;  %v736_v54 = vadd.f32 1e-06, %v720_v59  ;;  %v737_v42 = vadd.f32 1e-06, %v721_v12  ;;  %v706_v4 = vmax.f32 %v690_v39, 0.0  ;;  %v1050_v11 = vmul.f32 124.0, %v1048_v61 }
 0x24a   : > { %v707_v32 = vmax.f32 %v691_v44, 0.0  ;;  %v642_v62 = vpop.xlane.xlu1 %641  ;;  %2427 = vmatprep.mubr.bf16.mxu0 %v775_v23  ;;  %v644_v24 = vpop.xlane.xlu0 %643  ;;  %v762_v31 = vmul.f32 %v2697_v63, %v3708_v33  ;;  %v1051_v22 = vmul.f32 124.0, %v1049_v25  ;;  %v1133_v52 = vmul.f32 %v3840_v16, %v3840_v16 }
 0x24b   : > { %v2699_v43 = vpop.eup %2698  ;;  %2708 = vrsqrt.f32 %v736_v54  ;;  %v722_v47 = vmul.f32 0.25, %v706_v4  ;;  %v692_v6 = vsub.f32 %v642_v62, %v676_v19  ;;  %v693_v18 = vsub.f32 %v644_v24, %v677_v37 }
 0x24c   : > { %v723_v29 = vmul.f32 0.25, %v707_v32  ;;  %v776_v7 = vpack.c.bf16 %v762_v31, %v761_v30  ;;  %2710 = vrsqrt.f32 %v737_v42  ;;  %v763_v38 = vmul.f32 %v2699_v43, %v3719_v40 }
 0x24d   : > { %v2701_v14 = vpop.eup %2700  ;;  %v738_v35 = vadd.f32 1e-06, %v722_v47  ;;  %v708_v55 = vmax.f32 %v692_v6, 0.0  ;;  %v709_v28 = vmax.f32 %v693_v18, 0.0  ;;  %v4955_v12 = vmov 0.0  }
 0x24e   : > { %v739_v27 = vadd.f32 1e-06, %v723_v29  ;;  %v646_v26 = vpop.xlane.xlu1 %645  ;;  %2428 = vmatmul.mubr.bf16.vlgmr.msra.gmra.mrb[0].mxu0 %v776_v7  ;;  %v1045_v33 = vpop.xlane.xlu0 %1044  ;;  %v764_v19 = vmul.f32 %v2701_v14, %v3722_v41  ;;  %v1134_v61 = vmul.f32 124.0, %v1132_v8  ;;  %v1135_v24 = vmul.f32 124.0, %v1133_v52 }
 0x24f   : > { %v2703_v53 = vpop.eup %2702  ;;  %2712 = vrsqrt.f32 %v738_v35  ;;  %v724_v58 = vmul.f32 0.25, %v708_v55  ;;  %v725_v50 = vmul.f32 0.25, %v709_v28  ;;  %v694_v37 = vsub.f32 %v646_v26, %v678_v45  ;;  %2464 = vmatpush3.bf16.msra.mxu0 %v3684_v20 }
 0x250   : > { %v1052_v59 = vsub.f32 %v1045_v33, %v1050_v11  ;;  %2465 = vmatprep.subr.bf16.mxu0 %v4955_v12  ;;  %v777_v39 = vpack.c.bf16 %v764_v19, %v763_v38  ;;  %2714 = vrsqrt.f32 %v739_v27  ;;  %v765_v45 = vmul.f32 %v2703_v53, %v3734_v48 }
 0x251   : > { %v2705_v44 = vpop.eup %2704  ;;  %v740_v40 = vadd.f32 1e-06, %v724_v58  ;;  %v741_v23 = vadd.f32 1e-06, %v725_v50  ;;  %v710_v41 = vmax.f32 %v694_v37, 0.0 }
 0x252   : > { %v1054_v63 = vmax.f32 %v1052_v59, 0.0  ;;  %v1047_v54 = vpop.xlane.xlu1 %1046  ;;  %2431 = vmatprep.mubr.bf16.mxu0 %v777_v39  ;;  %v1129_v42 = vpop.xlane.xlu0 %1128  ;;  %v766_v20 = vmul.f32 %v2705_v44, %v3738_v49 }
 0x253   : > { %v2707_v4 = vpop.eup %2706  ;;  %2716 = vrsqrt.f32 %v740_v40  ;;  %v726_v16 = vmul.f32 0.25, %v710_v41  ;;  %v1053_v25 = vsub.f32 %v1047_v54, %v1051_v22  ;;  %2466 = vmatpush3.bf16.msra.mxu0 %v3774_v3  ;;  %v1136_v32 = vsub.f32 %v1129_v42, %v1134_v61  ;;  %v4956_v61 = vld [vmem:[#allocation32_spill] sm:$0xff] }
 0x254   : > { %v1056_v62 = vmul.f32 0.25, %v1054_v63  ;;  %2467 = vmatprep.subr.bf16.mxu0 %v4955_v12  ;;  %v778_v30 = vpack.c.bf16 %v766_v20, %v765_v45  ;;  %2718 = vrsqrt.f32 %v741_v23  ;;  %v767_v49 = vmul.f32 %v2707_v4, %v3750_v56 }
 0x255   : > { %v2709_v31 = vpop.eup %2708  ;;  %v742_v43 = vadd.f32 1e-06, %v726_v16  ;;  %v1055_v47 = vmax.f32 %v1053_v25, 0.0  ;;  %v1138_v6 = vmax.f32 %v1136_v32, 0.0 }
 0x256   : > { %v1058_v48 = vadd.f32 1e-06, %v1056_v62  ;;  %v1131_v18 = vpop.xlane.xlu1 %1130  ;;  %2432 = vmatmul.mubr.bf16.gmra.mrb[4].mxu0 %v778_v30  ;;  %v768_v8 = vmul.f32 %v2709_v31, %v3754_v57  ;;  %v2711_v29 = vpop.eup %2710 }
 0x257   : > { %2720 = vrsqrt.f32 %v742_v43  ;;  %v1057_v3 = vmul.f32 0.25, %v1055_v47  ;;  %v1140_v7 = vmul.f32 0.25, %v1138_v6  ;;  %v1137_v11 = vsub.f32 %v1131_v18, %v1135_v24  ;;  %2468 = vmatpush3.bf16.msra.mxu0 %v3794_v21 }
 0x258   : > { %2469 = vmatprep.subr.bf16.mxu0 %v4955_v12  ;;  %v779_v14 = vpack.c.bf16 %v768_v8, %v767_v49  ;;  %2722 = vrsqrt.f32 %v1058_v48  ;;  %v769_v56 = vmul.f32 %v2711_v29, %v3766_v0 }
 0x259   : > { %v2713_v35 = vpop.eup %2712  ;;  %v1059_v55 = vadd.f32 1e-06, %v1057_v3  ;;  %v1142_v28 = vadd.f32 1e-06, %v1140_v7  ;;  %v1139_v27 = vmax.f32 %v1137_v11, 0.0 }
 0x25a   : > { %2435 = vmatprep.mubr.bf16.mxu0 %v779_v14  ;;  %v770_v57 = vmul.f32 %v2713_v35, %v3770_v1  ;;  %v2715_v26 = vpop.eup %2714 }
 0x25b   : > { %2724 = vrsqrt.f32 %v1059_v55  ;;  %v1141_v33 = vmul.f32 0.25, %v1139_v27  ;;  %2470 = vmatpush3.bf16.msra.mxu0 %v3814_v36  ;;  %v771_v19 = vmul.f32 %v2715_v26, %v3786_v9 }
 0x25c   : > { %2471 = vmatprep.subr.bf16.mxu0 %v4955_v12  ;;  %v780_v21 = vpack.c.bf16 %v770_v57, %v769_v56  ;;  %2726 = vrsqrt.f32 %v1142_v28 }
 0x25d   : > { %v2717_v22 = vpop.eup %2716  ;;  %v1143_v38 = vadd.f32 1e-06, %v1141_v33 }
 0x25e   : > { %2436 = vmatmul.mubr.bf16.gmra.mrb[8].mxu0 %v780_v21  ;;  %v772_v53 = vmul.f32 %v2717_v22, %v3790_v10  ;;  %v2719_v58 = vpop.eup %2718 }
 0x25f   : > { %2728 = vrsqrt.f32 %v1143_v38  ;;  %2472 = vmatpush3.bf16.msra.mxu0 %v3834_v51  ;;  %v773_v36 = vmul.f32 %v2719_v58, %v3806_v13 }
 0x260   : > { %2473 = vmatprep.subr.bf16.mxu0 %v4955_v12  ;;  %v781_v0 = vpack.c.bf16 %v772_v53, %v771_v19 }
 0x261   : > { %v2721_v1 = vpop.eup %2720 }
 0x262   : > { %2439 = vmatprep.mubr.bf16.mxu0 %v781_v0  ;;  %v774_v50 = vmul.f32 %v2721_v1, %v3810_v34  ;;  %v2723_v37 = vpop.eup %2722 }
 0x263   : > { %2474 = vmatpush3.bf16.msra.mxu0 %v3854_v2  ;;  %v1062_v52 = vmul.f32 %v2723_v37, %v3826_v15 }
 0x264   : > { %2475 = vmatprep.subr.bf16.mxu0 %v4955_v12  ;;  %v782_v9 = vpack.c.bf16 %v774_v50, %v773_v36 }
 0x265   : > { %v2725_v10 = vpop.eup %2724 }
 0x266   : > { %2440 = vmatmul.mubr.bf16.gmra.mrb[12].mxu0 %v782_v9  ;;  %v1063_v51 = vmul.f32 %v2725_v10, %v3830_v46  ;;  %v2727_v59 = vpop.eup %2726  ;;  %v3969_v46 = vld [vmem:[%s4957_s6] ss:$0 sm:$0xff] }
 0x267   : > { %2476 = vmatpush3.bf16.msra.mxu0 %v3862_v5  ;;  %2479 = vmatprep.mubr.msk.bf16.mxu0 %vm3127_vm0, %v4955_v12  ;;  %v1146_v2 = vmul.f32 %v2727_v59, %v3846_v17 }
 0x268   : > { %2477 = vmatprep.subr.bf16.mxu0 %v4955_v12  ;;  %v1064_v13 = vpack.c.bf16 %v1063_v51, %v1062_v52 }
 0x269   : > { %v2729_v34 = vpop.eup %2728 }
 0x26a   : > { %v1147_v39 = vmul.f32 %v2729_v34, %v3850_v60  ;;  %2460 = vmatmul.mubr.bf16.vlgmr.msra.gmra.mrb[0].mxu1 %v1064_v13 }
 0x26b   : > { %2478 = vmatpush3.bf16.msra.mxu0 %v4956_v61 }
 0x26c   : > { %v1148_v15 = vpack.c.bf16 %v1147_v39, %v1146_v2 }
 0x26e   : > { %2480 = vmatmul.mubr.bf16.vlgmr.msra.gmra.mrb[16].mxu0 %v1148_v15 }
 0x321   : > { %v2429_v5 = vpop.f32.mrb[0].mxu0 }
 0x322   : > { %v897_v44 = vadd.f32 %v2429_v5, %v3969_v46  ;;  %v888_v12 = vpop.f32.mrb[1].mxu0 }
 0x323   : > { %v889_v40 = vadd.f32 %v3969_v46, %v888_v12  ;;  %v2430_v23 = vpop.f32.mrb[2].mxu0 }
 0x324   : > { %v970_v17 = vmul.f32 0.70710677, %v897_v44  ;;  %v900_v60 = vadd.f32 %v2430_v23, %v3969_v46  ;;  %v891_v41 = vpop.f32.mrb[3].mxu0  ;;  %v953_v49 = vmul.f32 0.5, %v897_v44 }
 0x325   : > { %v968_v63 = vmul.f32 0.70710677, %v889_v40  ;;  %v892_v54 = vadd.f32 %v3969_v46, %v891_v41  ;;  %v951_v7 = vmul.f32 0.5, %v889_v40 }
 0x326   : > { %2730 = verf.f32 %v970_v17  ;;  %v971_v42 = vmul.f32 0.70710677, %v900_v60  ;;  %v954_v27 = vmul.f32 0.5, %v900_v60 }
 0x327   : > { %2732 = verf.f32 %v968_v63  ;;  %v969_v45 = vmul.f32 0.70710677, %v892_v54  ;;  %v952_v21 = vmul.f32 0.5, %v892_v54 }
 0x328   : > { %2734 = verf.f32 %v971_v42 }
 0x329   : > { %2736 = verf.f32 %v969_v45  ;;  %v2433_v20 = vpop.f32.mrb[4].mxu0 }
 0x32a   : > { %v913_v4 = vadd.f32 %v2433_v20, %v3969_v46  ;;  %v904_v16 = vpop.f32.mrb[5].mxu0 }
 0x32b   : > { %v905_v25 = vadd.f32 %v3969_v46, %v904_v16  ;;  %v2434_v32 = vpop.f32.mrb[6].mxu0 }
 0x32c   : > { %v974_v62 = vmul.f32 0.70710677, %v913_v4  ;;  %v916_v24 = vadd.f32 %v2434_v32, %v3969_v46  ;;  %v907_v30 = vpop.f32.mrb[7].mxu0  ;;  %v957_v52 = vmul.f32 0.5, %v913_v4 }
 0x32d   : > { %v972_v31 = vmul.f32 0.70710677, %v905_v25  ;;  %v908_v43 = vadd.f32 %v3969_v46, %v907_v30  ;;  %v955_v34 = vmul.f32 0.5, %v905_v25 }
 0x32e   : > { %2738 = verf.f32 %v974_v62  ;;  %v975_v47 = vmul.f32 0.70710677, %v916_v24  ;;  %v958_v44 = vmul.f32 0.5, %v916_v24 }
 0x32f   : > { %2740 = verf.f32 %v972_v31  ;;  %v973_v6 = vmul.f32 0.70710677, %v908_v43  ;;  %v956_v60 = vmul.f32 0.5, %v908_v43 }
 0x330   : > { %v2731_v48 = vpop.eup %2730  ;;  %2742 = verf.f32 %v975_v47 }
 0x331   : > { %v2733_v18 = vpop.eup %2732  ;;  %v1002_v8 = vadd.f32 1.0, %v2731_v48  ;;  %2744 = verf.f32 %v973_v6  ;;  %v2437_v29 = vpop.f32.mrb[8].mxu0 }
 0x332   : > { %v2735_v3 = vpop.eup %2734  ;;  %v1000_v11 = vadd.f32 1.0, %v2733_v18  ;;  %v3980_v14 = vadd.f32 %v2437_v29, %v3969_v46  ;;  %v920_v35 = vpop.f32.mrb[9].mxu0 }
 0x333   : > { %v2737_v55 = vpop.eup %2736  ;;  %v3982_v28 = vmul.f32 %v1002_v8, %v953_v49  ;;  %v1003_v56 = vadd.f32 1.0, %v2735_v3  ;;  %v3985_v57 = vadd.f32 %v3969_v46, %v920_v35  ;;  %v2438_v26 = vpop.f32.mrb[10].mxu0 }
 0x334   : > { %v3987_v33 = vmul.f32 %v1000_v11, %v951_v7  ;;  %v1001_v22 = vadd.f32 1.0, %v2737_v55  ;;  %v978_v38 = vmul.f32 0.70710677, %v3980_v14  ;;  %v923_v19 = vpop.f32.mrb[11].mxu0  ;;  %v3995_v0 = vadd.f32 %v2438_v26, %v3969_v46 }
 0x335   : > { %1203 = vst [vmem:[#allocation2 + $0x20] sm:$0xff] %v3982_v28  ;;  %v3991_v53 = vmul.f32 %v1003_v56, %v954_v27  ;;  %v976_v58 = vmul.f32 0.70710677, %v3985_v57  ;;  %v4001_v36 = vadd.f32 %v3969_v46, %v923_v19  ;;  %v961_v48 = vmul.f32 0.5, %v3980_v14 }
 0x336   : > { %1201 = vst [vmem:[#allocation2 + $0x10] sm:$0xff] %v3987_v33  ;;  %v3998_v1 = vmul.f32 %v1001_v22, %v952_v21  ;;  %2746 = verf.f32 %v978_v38  ;;  %v979_v50 = vmul.f32 0.70710677, %v3995_v0  ;;  %v959_v3 = vmul.f32 0.5, %v3985_v57 }
 0x337   : > { %1204 = vst [vmem:[#allocation2 + $0x28] sm:$0xff] %v3991_v53  ;;  %2748 = verf.f32 %v976_v58  ;;  %v977_v9 = vmul.f32 0.70710677, %v4001_v36  ;;  %v962_v22 = vmul.f32 0.5, %v3995_v0  ;;  %v960_v57 = vmul.f32 0.5, %v4001_v36 }
 0x338   : > { %v2739_v37 = vpop.eup %2738  ;;  %1202 = vst [vmem:[#allocation2 + $0x18] sm:$0xff] %v3998_v1  ;;  %2750 = verf.f32 %v979_v50 }
 0x339   : > { %v2741_v10 = vpop.eup %2740  ;;  %v1006_v51 = vadd.f32 1.0, %v2739_v37  ;;  %v2441_v59 = vpop.f32.mrb[12].mxu0  ;;  %2752 = verf.f32 %v977_v9 }
 0x33a   : > { %v2743_v13 = vpop.eup %2742  ;;  %v1004_v2 = vadd.f32 1.0, %v2741_v10  ;;  %v4008_v39 = vadd.f32 %v2441_v59, %v3969_v46  ;;  %v936_v61 = vpop.f32.mrb[13].mxu0 }
 0x33b   : > { %v2745_v15 = vpop.eup %2744  ;;  %v4010_v5 = vmul.f32 %v1006_v51, %v957_v52  ;;  %v1007_v12 = vadd.f32 1.0, %v2743_v13  ;;  %v4013_v40 = vadd.f32 %v3969_v46, %v936_v61  ;;  %v2442_v23 = vpop.f32.mrb[14].mxu0 }
 0x33c   : > { %v4015_v17 = vmul.f32 %v1004_v2, %v955_v34  ;;  %v1005_v41 = vadd.f32 1.0, %v2745_v15  ;;  %v982_v63 = vmul.f32 0.70710677, %v4008_v39  ;;  %v939_v54 = vpop.f32.mrb[15].mxu0  ;;  %v948_v20 = vadd.f32 %v2442_v23, %v3969_v46 }
 0x33d   : > { %1207 = vst [vmem:[#allocation2 + $0x40] sm:$0xff] %v4010_v5  ;;  %v4019_v42 = vmul.f32 %v1007_v12, %v958_v44  ;;  %v980_v45 = vmul.f32 0.70710677, %v4013_v40  ;;  %v1099_v4 = vpop.f32.mrb[0].mxu1  ;;  %v940_v25 = vadd.f32 %v3969_v46, %v939_v54  ;;  %v965_v36 = vmul.f32 0.5, %v4008_v39 }
 0x33e   : > { %4958 = vst [vmem:[#allocation32_spill] sm:$0xff] %v4015_v17  ;;  %1205 = vst [vmem:[#allocation2 + $0x30] sm:$0xff] %v4015_v17  ;;  %v4024_v16 = vmul.f32 %v1005_v41, %v956_v60  ;;  %2754 = verf.f32 %v982_v63  ;;  %v4028_v32 = vadd.f32 %v3969_v46, %v1099_v4  ;;  %v2461_v62 = vpop.f32.mrb[1].mxu1  ;;  %v983_v24 = vmul.f32 0.70710677, %v948_v20 }
 0x33f   : > { %1208 = vst [vmem:[#allocation2 + $0x48] sm:$0xff] %v4019_v42  ;;  %2756 = verf.f32 %v980_v45  ;;  %v1102_v30 = vpop.f32.mrb[2].mxu1  ;;  %v981_v43 = vmul.f32 0.70710677, %v940_v25  ;;  %v966_v44 = vmul.f32 0.5, %v948_v20  ;;  %v964_v60 = vmul.f32 0.5, %v940_v25 }
 0x340   : > { %4959 = vst [vmem:[#allocation33_spill] sm:$0xff] %v4024_v16  ;;  %v2747_v31 = vpop.eup %2746  ;;  %1206 = vst [vmem:[#allocation2 + $0x38] sm:$0xff] %v4024_v16  ;;  %v1108_v47 = vmul.f32 0.70710677, %v4028_v32  ;;  %2758 = verf.f32 %v983_v24  ;;  %v1103_v49 = vadd.f32 %v3969_v46, %v1102_v30  ;;  %v2462_v8 = vpop.f32.mrb[3].mxu1 }
 0x341   : > { %v2749_v6 = vpop.eup %2748  ;;  %v1010_v18 = vadd.f32 1.0, %v2747_v31  ;;  %v1183_v29 = vpop.f32.mrb[16].mxu0  ;;  %2760 = verf.f32 %v981_v43 }
 0x342   : > { %v1008_v7 = vadd.f32 1.0, %v2749_v6  ;;  %v1184_v11 = vadd.f32 %v3969_v46, %v1183_v29  ;;  %v2481_v35 = vpop.f32.mrb[17].mxu0  ;;  %v2751_v55 = vpop.eup %2750  ;;  %2762 = verf.f32 %v1108_v47  ;;  %v1109_v56 = vmul.f32 0.70710677, %v1103_v49 }
 0x343   : > { %v4037_v27 = vmul.f32 %v1010_v18, %v961_v48  ;;  %v1186_v26 = vpop.f32.mrb[18].mxu0  ;;  %v2753_v14 = vpop.eup %2752  ;;  %v1011_v38 = vadd.f32 1.0, %v2751_v55  ;;  %v1107_v62 = vmul.f32 0.5, %v1103_v49  ;;  %v3128_v18 = vmov (!%p2337_p10), 0.0  }
 0x344   : > { %v4039_v21 = vmul.f32 %v1008_v7, %v959_v3  ;;  %v1192_v19 = vmul.f32 0.70710677, %v1184_v11  ;;  %v2482_v58 = vpop.f32.mrb[19].mxu0  ;;  %v1009_v50 = vadd.f32 1.0, %v2753_v14  ;;  %2764 = verf.f32 %v1109_v56  ;;  %1221 = vst [vmem:[#allocation2] sm:$0xff] (!%p2337_p10), %v3128_v18  ;;  %1222 = vst [vmem:[#allocation2 + $0x8] sm:$0xff] (!%p2337_p10), %v3128_v18 }
 0x345   : > { %4960 = vst [vmem:[#allocation34_spill] sm:$0xff] %v4037_v27  ;;  %1211 = vst [vmem:[#allocation2 + $0x60] sm:$0xff] %v4037_v27  ;;  %v1187_v37 = vadd.f32 %v3969_v46, %v1186_v26  ;;  %v4046_v9 = vmul.f32 %v1011_v38, %v962_v22  ;;  %v963_v46 = vmul.f32 0.5, %v4013_v40  ;;  %v1106_v40 = vmul.f32 0.5, %v4028_v32 }
 0x346   : > { %1209 = vst [vmem:[#allocation2 + $0x50] sm:$0xff] %v4039_v21  ;;  %2766 = verf.f32 %v1192_v19  ;;  %v4048_v10 = vmul.f32 %v1009_v50, %v960_v57  ;;  %v1190_v25 = vmul.f32 0.5, %v1184_v11 }
 0x347   : > { %4961 = vst [vmem:[#allocation35_spill] sm:$0xff] %v4046_v9  ;;  %v1193_v52 = vmul.f32 0.70710677, %v1187_v37  ;;  %1212 = vst [vmem:[#allocation2 + $0x68] sm:$0xff] %v4046_v9  ;;  %v1191_v6 = vmul.f32 0.5, %v1187_v37 }
 0x348   : > { %4962 = vst [vmem:[#allocation36_spill] sm:$0xff] %v4048_v10  ;;  %v2755_v0 = vpop.eup %2754  ;;  %1210 = vst [vmem:[#allocation2 + $0x58] sm:$0xff] %v4048_v10 }
 0x349   : > { %v2757_v51 = vpop.eup %2756  ;;  %v1014_v59 = vadd.f32 1.0, %v2755_v0  ;;  %2768 = verf.f32 %v1193_v52 }
 0x34a   : > { %v1012_v13 = vadd.f32 1.0, %v2757_v51  ;;  %v2759_v34 = vpop.eup %2758 }
 0x34b   : > { %v4054_v2 = vmul.f32 %v1014_v59, %v965_v36  ;;  %v2761_v61 = vpop.eup %2760  ;;  %v1015_v12 = vadd.f32 1.0, %v2759_v34 }
 0x34c   : > { %v4056_v15 = vmul.f32 %v1012_v13, %v963_v46  ;;  %v2763_v23 = vpop.eup %2762  ;;  %v1013_v41 = vadd.f32 1.0, %v2761_v61 }
 0x34d   : > { %4963 = vst [vmem:[#allocation37_spill] sm:$0xff] %v4054_v2  ;;  %1215 = vst [vmem:[#allocation2 + $0x80] sm:$0xff] %v4054_v2  ;;  %v4060_v39 = vmul.f32 %v1015_v12, %v966_v44  ;;  %v1112_v63 = vadd.f32 1.0, %v2763_v23 }
 0x34e   : > { %4964 = vst [vmem:[#allocation38_spill] sm:$0xff] %v4056_v15  ;;  %1213 = vst [vmem:[#allocation2 + $0x70] sm:$0xff] %v4056_v15  ;;  %v2765_v54 = vpop.eup %2764  ;;  %v4063_v45 = vmul.f32 %v1013_v41, %v964_v60 }
 0x34f   : > { %4965 = vst [vmem:[#allocation39_spill] sm:$0xff] %v4060_v39  ;;  %1216 = vst [vmem:[#allocation2 + $0x88] sm:$0xff] %v4060_v39  ;;  %v1114_v20 = vmul.f32 %v1112_v63, %v1106_v40  ;;  %v1113_v24 = vadd.f32 1.0, %v2765_v54 }
 0x350   : > { %4966 = vst [vmem:[#allocation40_spill] sm:$0xff] %v4063_v45  ;;  %v2767_v4 = vpop.eup %2766  ;;  %1214 = vst [vmem:[#allocation2 + $0x78] sm:$0xff] %v4063_v45  ;;  %1220 = sbr.rel (%p2337_p10) target bundleno = 855 (0x357), region = 80 }
 0x351   : > { %v1196_v30 = vadd.f32 1.0, %v2767_v4  ;;  %v1115_v31 = vmul.f32 %v1113_v24, %v1107_v62 }
 0x353   : > { %v2769_v43 = vpop.eup %2768  ;;  %v1198_v47 = vmul.f32 %v1196_v30, %v1190_v25 }
 0x354   : > { %v1197_v32 = vadd.f32 1.0, %v2769_v43 }
 0x356   : > { %v1199_v48 = vmul.f32 %v1197_v32, %v1191_v6 }
 0x357 PF: > { %s4968_s10 = sld [smem:[#allocation22_spill]] }
 0x35d   : > { %p2338_p12 = scmp.le.s32.totalorder %s4968_s10, 0 }
 0x35e   : > { %1227 = vst [vmem:[#allocation2] sm:$0xff] (!%p2338_p12), %v1114_v20  ;;  %1228 = vst [vmem:[#allocation2 + $0x8] sm:$0xff] (!%p2338_p12), %v1115_v31 }
 0x35f   : > { %1226 = sbr.rel (%p2338_p12) target bundleno = 870 (0x366), region = 84 }
 0x366 PF: > { %s4969_s28 = sld [smem:[#allocation22_spill]] }
 0x36c   : > { %p2339_p8 = scmp.ne.s32.totalorder %s4969_s28, 1 }
 0x36d   : > { %v3129_v49 = vmov (!%p2339_p8), 0.0  }
 0x36e   : > { %1232 = sbr.rel (%p2339_p8) target bundleno = 885 (0x375), region = 88  ;;  %1234 = vst [vmem:[#allocation2 + $0x90] sm:$0xff] (!%p2339_p8), %v3129_v49  ;;  %1235 = vst [vmem:[#allocation2 + $0x98] sm:$0xff] (!%p2339_p8), %v3129_v49 }
 0x375 PF: > { %s4970_s7 = sld [smem:[#allocation22_spill]] }
 0x37b   : > { %p2340_p0 = scmp.ge.s32.totalorder %s4970_s7, 1 }
 0x37c   : > { %1241 = vst [vmem:[#allocation2 + $0x90] sm:$0xff] (!%p2340_p0), %v1198_v47  ;;  %1242 = vst [vmem:[#allocation2 + $0x98] sm:$0xff] (!%p2340_p0), %v1199_v48 }
 0x37d   : > { %1239 = sbr.rel (%p2340_p0) target bundleno = 900 (0x384), region = 92 }
 0x384 PF: > { %v2770_v8 = vld [vmem:[#allocation11] sm:$0xff]   ;;  %v1245_v29 = vlaneseq  ;;  %v2771_v3 = vld [vmem:[#allocation11 + $0x8] sm:$0xff]   ;;  %v2772_v11 = vld [vmem:[#allocation11 + $0x10] sm:$0xff]   ;;  %v1272_v55 = vrot.slane %v3987_v33, 7  ;;  %v1280_v56 = vrot.slane %v3998_v1, 7  ;;  %v1347_v26 = vrot.slane %v3987_v33, 1 }
 0x385   : > { %2483 = vmatprep.subr.bf16.mxu1 %v2770_v8  ;;  %v2773_v22 = vld [vmem:[#allocation11 + $0x18] sm:$0xff]   ;;  %s4971_s21 = sld [smem:[#allocation46_spill]]  ;;  %v1355_v58 = vrot.slane %v3998_v1, 1  ;;  %v1422_v52 = vld [vmem:[#allocation2] sm:$0xff]  ;;  %v1423_v0 = vld [vmem:[#allocation2 + $0x8] sm:$0xff]  ;;  %s4973_s0 = sld [smem:[#allocation47_spill]] }
 0x386   : > { %v4075_v7 = vshrl.u32 %v1245_v29, 7  ;;  %2484 = vmatpush3.bf16.msra.mxu1 %v2770_v8  ;;  %v1474_v44 = vrot.slane %v1422_v52, 7  ;;  %v2774_v12 = vld [vmem:[#allocation11 + $0x20] sm:$0xff]   ;;  %v1482_v40 = vrot.slane %v1423_v0, 7  ;;  %v1544_v20 = vrot.slane %v1422_v52, 1  ;;  %v2775_v48 = vld [vmem:[#allocation11 + $0x28] sm:$0xff]  }
 0x387   : > { %2485 = vmatprep.subr.bf16.mxu1 %v2771_v3  ;;  %v4137_v31 = vld [vmem:[#allocation2 + $0x20] sm:$0xff]  ;;  %v1552_v8 = vrot.slane %v1423_v0, 1  ;;  %s4983_s9 = sld [smem:[#allocation49_spill]]  ;;  %s4984_s6 = sld [smem:[#allocation22_spill]] }
 0x388   : > { %v4078_v35 = vadd.s32 8, %v4075_v7  ;;  %vm1248_vm1 = vcmp.ge.s32.totalorder %v4075_v7, 1  ;;  %v1254_v14 = vsub.s32 4, %v4075_v7  ;;  %vm1288_vm3 = vcmp.lt.s32.totalorder %v4075_v7, 1  ;;  %s4985_s8 = sld [smem:[#allocation23_spill]]  ;;  %s2135_s20 = sshll.u32 %s4069_s29, 4  ;;  %s4741_s20 = int_to_ptr.vmem [resolvable:$true] %s2135_s20 }
 0x389   : > { %v1311_v19 = vsub.s32 3, %v4075_v7  ;;  %v1289_v50 = vsel %vm1288_vm3, %v1272_v55, %v1280_v56  ;;  %v1297_v37 = vsel %vm1288_vm3, %v1280_v56, %v1272_v55  ;;  %vm1363_vm4 = vcmp.lt.s32.totalorder %v4075_v7, 7  ;;  %v4148_v55 = vld [vmem:[#allocation2 + $0x28] sm:$0xff]  ;;  %s4987_s1 = sld [smem:[#allocation50_spill]]  ;;  %s2957_s18 = scalar_lea.vmem %s4741_s20, 2048 }
 0x38a   : > { %2486 = vmatpush3.bf16.msra.mxu1 %v2771_v3  ;;  %vm1251_vm2 = vcmp.le.s32.totalorder %v4078_v35, 14  ;;  %v1364_v36 = vsel %vm1363_vm4, %v1347_v26, %v1355_v58  ;;  %v1372_v59 = vsel %vm1363_vm4, %v1355_v58, %v1347_v26  ;;  %v1386_v46 = vsub.s32 5, %v4075_v7  ;;  %p2958_p13 = scmp.ne.s32.totalorder %s4741_s20, %s2957_s18  ;;  %s3130_s4 = smov [#allocation12]  }
 0x38b   : > { %2487 = vmatprep.subr.bf16.mxu1 %v2772_v11  ;;  %s4972_s26 = smov %s4971_s21  ;;  %v4088_v38 = vld [vmem:[%s4971_s21] sm:$0xff]  ;;  %v1440_v61 = vsub.s32 1, %v4075_v7  ;;  %v1508_v4 = vsub.s32 0, %v4075_v7  ;;  %v1490_v30 = vsel %vm1288_vm3, %v1474_v44, %v1482_v40  ;;  %v1498_v18 = vsel %vm1288_vm3, %v1482_v40, %v1474_v44  ;;  %s4986_s21 = sld [smem:[#allocation31_spill]] }
 0x38c   : > { %v4095_v57 = vrot.slane %v4088_v38, %v1254_v14  ;;  %v4103_v51 = vrot.slane %v4088_v38, %v1311_v19  ;;  %v4122_v41 = vrot.slane %v4088_v38, %v1386_v46  ;;  %v1578_v29 = vsub.s32 2, %v4075_v7  ;;  %s2961_s24 = sshll.u32 %s3130_s4, 4  ;;  %s2962_s24 = int_to_ptr.vmem [resolvable:$false] %s2961_s24 }
 0x38d   : > { %v4126_v54 = vrot.slane %v4088_v38, %v1440_v61  ;;  %v4145_v49 = vrot.slane %v4088_v38, %v1508_v4  ;;  %v1633_v56 = vsub.s32 7, %v4075_v7  ;;  %v1667_v26 = vrot.slane %v4137_v31, 7  ;;  %v4175_v61 = vld [vmem:[%s4972_s26 + $0x8] ss:$0 sm:$0xff]  ;;  %s2360_s10 = sshll.u32 %s4984_s6, 4  ;;  %s2963_s23 = scalar_lea.vmem %s2962_s24, 4096 }
 0x38e   : > { %2488 = vmatpush3.bf16.msra.mxu1 %v2772_v11  ;;  %v1256_v13 = vmul.f32 %v4095_v57, %v3987_v33  ;;  %v1257_v34 = vmul.f32 %v4095_v57, %v3998_v1  ;;  %v4118_v23 = vsel %vm1248_vm1, %v4103_v51, 0.0  ;;  %v1316_v60 = vmul.f32 %v4103_v51, %v1289_v50  ;;  %s2355_s28 = sshll.u32 %s4985_s8, 5  ;;  %p2964_p6 = scmp.lt.s32.totalorder %s4741_s20, %s2962_s24 }
 0x38f   : > { %2489 = vmatprep.subr.bf16.mxu1 %v2773_v22  ;;  %v1315_v63 = vmul.f32 %v4118_v23, %v1297_v37  ;;  %v4132_v24 = vsel %vm1251_vm2, %v4122_v41, 0.0  ;;  %v1390_v25 = vmul.f32 %v4122_v41, %v1364_v36  ;;  %v1442_v6 = vmul.f32 %v4126_v54, %v1422_v52  ;;  %v2776_v36 = vld [vmem:[#allocation11 + $0x30] sm:$0xff]   ;;  %s2132_s7 = sadd.s32 %s2360_s10, %s2355_s28  ;;  %p2965_p9 = scmp.lt.s32.totalorder %s2963_s23, %s2957_s18 }
 0x390   : > { %v1332_v62 = vadd.f32 %v1316_v60, %v1257_v34  ;;  %v1391_v47 = vmul.f32 %v4132_v24, %v1372_v59  ;;  %v1443_v32 = vmul.f32 %v4126_v54, %v1423_v0  ;;  %v4155_v14 = vsel %vm1248_vm1, %v4145_v49, 0.0  ;;  %s2356_s3 = sshll.u32 %s2132_s7, 7 }
 0x391   : > { %v1331_v43 = vadd.f32 %v1315_v63, %v1256_v13  ;;  %v1560_v19 = vsel %vm1363_vm4, %v1544_v20, %v1552_v8  ;;  %v1568_v58 = vsel %vm1363_vm4, %v1552_v8, %v1544_v20  ;;  %v1512_v52 = vmul.f32 %v4155_v14, %v1498_v18  ;;  %s4739_s27 = scalar_lea.hbm %s4987_s1, %s2356_s3  ;;  %p4988_p1 = scmp.ne.s32.totalorder %s4986_s21, 0 }
 0x392   : > { %2490 = vmatpush3.bf16.msra.mxu1 %v2773_v22  ;;  %v1407_v11 = vadd.f32 %v1391_v47, %v1332_v62  ;;  %v1513_v22 = vmul.f32 %v4145_v49, %v1490_v30  ;;  %v4164_v0 = vrot.slane %v4088_v38, %v1578_v29  ;;  %v4167_v59 = vrot.slane %v4088_v38, %v1633_v56  ;;  %p2966_p11 = por %p2965_p9, %p2964_p6 }
 0x393   : > { %2491 = vmatprep.subr.bf16.mxu1 %v2774_v12  ;;  %v1406_v3 = vadd.f32 %v1390_v25, %v1331_v43  ;;  %v1675_v46 = vrot.slane %v4148_v55, 7  ;;  %v1701_v13 = vsub.s32 6, %v4075_v7  ;;  %v1737_v34 = vrot.slane %v4137_v31, 1  ;;  %p2959_p2 = pnand %p2958_p13, %p4988_p1 }
 0x394   : > { %v1459_v37 = vadd.f32 %v1443_v32, %v1407_v11  ;;  %v4180_v60 = vsel %vm1251_vm2, %v4164_v0, 0.0  ;;  %v1582_v40 = vmul.f32 %v4164_v0, %v1560_v19  ;;  %v1635_v4 = vmul.f32 %v4167_v59, %v4137_v31  ;;  %v1424_v11 = vld [vmem:[#allocation2 + $0x10] sm:$0xff] }
 0x395   : > { %v1458_v50 = vadd.f32 %v1442_v6, %v1406_v3  ;;  %v1583_v63 = vmul.f32 %v4180_v60, %v1568_v58  ;;  %v1636_v20 = vmul.f32 %v4167_v59, %v4148_v55  ;;  %v4190_v62 = vsel %vm1288_vm3, %v1667_v26, %v1675_v46  ;;  %v2777_v6 = vld [vmem:[#allocation11 + $0x38] sm:$0xff]   ;;  %p2960_p5 = pneg %p2959_p2 }
 0x396   : > { %2492 = vmatpush3.bf16.msra.mxu1 %v2774_v12  ;;  %v1529_v12 = vadd.f32 %v1513_v22, %v1459_v37  ;;  %v4194_v30 = vsel %vm1288_vm3, %v1675_v46, %v1667_v26  ;;  %v4197_v43 = vrot.slane %v4088_v38, %v1701_v13  ;;  %v1745_v47 = vrot.slane %v4148_v55, 1  ;;  %v1425_v58 = vld [vmem:[#allocation2 + $0x18] sm:$0xff] }
 0x397   : > { %2493 = vmatprep.subr.bf16.mxu1 %v2775_v48  ;;  %v1528_v44 = vadd.f32 %v1512_v52, %v1458_v50  ;;  %v4203_v18 = vsel %vm1251_vm2, %v4175_v61, 0.0  ;;  %v1259_v8 = vmul.f32 %v4095_v57, %v3991_v53  ;;  %v1273_v37 = vrot.slane %v3982_v28, 7  ;;  %p2967_p3 = pnand %p2966_p11, %p2960_p5 }
 0x398   : > { %v1599_v32 = vadd.f32 %v1583_v63, %v1529_v12  ;;  %v4212_v38 = vsel %vm1248_vm1, %v4197_v43, 0.0  ;;  %v1706_v3 = vmul.f32 %v4197_v43, %v4190_v62  ;;  %v4218_v35 = vsel %vm1363_vm4, %v1737_v34, %v1745_v47 }
 0x399   : > { %v1598_v25 = vadd.f32 %v1582_v40, %v1528_v44  ;;  %v1705_v26 = vmul.f32 %v4212_v38, %v4194_v30  ;;  %v4224_v22 = vsel %vm1363_vm4, %v1745_v47, %v1737_v34  ;;  %v1775_v19 = vmul.f32 %v4175_v61, %v4218_v35 }
 0x39a   : > { %2494 = vmatpush3.bf16.msra.mxu1 %v2775_v48  ;;  %v1258_v48 = vmul.f32 %v4095_v57, %v3982_v28  ;;  %v1652_v56 = vadd.f32 %v1636_v20, %v1599_v32  ;;  %v1776_v50 = vmul.f32 %v4203_v18, %v4224_v22  ;;  %v1281_v52 = vrot.slane %v3991_v53, 7 }
 0x39b   : > { %2495 = vmatprep.subr.bf16.mxu1 %v2776_v36  ;;  %v1651_v29 = vadd.f32 %v1635_v4, %v1598_v25  ;;  %v1348_v46 = vrot.slane %v3982_v28, 1  ;;  %v1356_v34 = vrot.slane %v3991_v53, 1  ;;  %v1444_v12 = vmul.f32 %v4126_v54, %v1424_v11 }
 0x39c   : > { %v1722_v44 = vadd.f32 %v1706_v3, %v1652_v56  ;;  %v1290_v40 = vsel %vm1288_vm3, %v1273_v37, %v1281_v52  ;;  %v1298_v63 = vsel %vm1288_vm3, %v1281_v52, %v1273_v37  ;;  %v1445_v4 = vmul.f32 %v4126_v54, %v1425_v58 }
 0x39d   : > { %v1721_v13 = vadd.f32 %v1705_v26, %v1651_v29  ;;  %v1475_v20 = vrot.slane %v1424_v11, 7  ;;  %v1317_v32 = vmul.f32 %v4118_v23, %v1298_v63  ;;  %v1318_v29 = vmul.f32 %v4103_v51, %v1290_v40  ;;  %v4259_v40 = vld [vmem:[#allocation2 + $0x30] sm:$0xff] }
 0x39e   : > { %2496 = vmatpush3.bf16.msra.mxu1 %v2776_v36  ;;  %v4238_v36 = vld [vmem:[%s4973_s0] ss:$0 sm:$0xff]  ;;  %v1792_v47 = vadd.f32 %v1776_v50, %v1722_v44  ;;  %v1365_v3 = vsel %vm1363_vm4, %v1348_v46, %v1356_v34  ;;  %v1373_v56 = vsel %vm1363_vm4, %v1356_v34, %v1348_v46  ;;  %v1483_v26 = vrot.slane %v1425_v58, 7  ;;  %v4261_v46 = vld [vmem:[#allocation2 + $0x38] sm:$0xff]  ;;  %s2119_s0 = scalar_lea.sflag [#allocation5], %s3585_s13 }
 0x39f   : > { %2497 = vmatprep.subr.bf16.mxu1 %v2777_v6  ;;  %v1791_v25 = vadd.f32 %v1775_v19, %v1721_v13  ;;  %v1545_v39 = vrot.slane %v1424_v11, 1  ;;  %v1333_v2 = vadd.f32 %v1317_v32, %v1258_v48  ;;  %v1334_v19 = vadd.f32 %v1318_v29, %v1259_v8 }
 0x3a0   : > { %v1815_v52 = vadd.f32 %v4238_v36, %v1792_v47  ;;  %v1392_v50 = vmul.f32 %v4122_v41, %v1365_v3  ;;  %v1393_v13 = vmul.f32 %v4132_v24, %v1373_v56  ;;  %v1499_v44 = vsel %vm1288_vm3, %v1483_v26, %v1475_v20 }
 0x3a1   : > { %v1814_v37 = vadd.f32 %v4238_v36, %v1791_v25  ;;  %v1514_v47 = vmul.f32 %v4155_v14, %v1499_v44  ;;  %v1553_v29 = vrot.slane %v1425_v58, 1  ;;  %v1638_v3 = vmul.f32 %v4167_v59, %v4261_v46 }
 0x3a2   : > { %2498 = vmatpush3.bf16.msra.mxu1 %v2777_v6  ;;  %v1491_v6 = vsel %vm1288_vm3, %v1475_v20, %v1483_v26  ;;  %v4263_v34 = vmul.f32 0.5, %v1815_v52  ;;  %v1847_v48 = vmul.f32 0.70710677, %v1815_v52  ;;  %v1408_v8 = vadd.f32 %v1392_v50, %v1333_v2 }
 0x3a3   : > { %v1830_v11 = vmul.f32 0.5, %v1814_v37  ;;  %v1846_v63 = vmul.f32 0.70710677, %v1814_v37  ;;  %v1409_v25 = vadd.f32 %v1393_v13, %v1334_v19  ;;  %v1515_v32 = vmul.f32 %v4145_v49, %v1491_v6 }
 0x3a4   : > { %v1637_v20 = vmul.f32 %v4167_v59, %v4259_v40  ;;  %v1460_v56 = vadd.f32 %v1444_v12, %v1408_v8  ;;  %v1668_v37 = vrot.slane %v4259_v40, 7  ;;  %v1561_v2 = vsel %vm1363_vm4, %v1545_v39, %v1553_v29 }
 0x3a5   : > { %2778 = verf.f32 %v1846_v63  ;;  %v1461_v26 = vadd.f32 %v1445_v4, %v1409_v25  ;;  %v1569_v52 = vsel %vm1363_vm4, %v1553_v29, %v1545_v39  ;;  %v1676_v19 = vrot.slane %v4261_v46, 7 }
 0x3a6   : > { %2780 = verf.f32 %v1847_v48  ;;  %v1738_v58 = vrot.slane %v4259_v40, 1  ;;  %v1530_v50 = vadd.f32 %v1514_v47, %v1460_v56  ;;  %v1584_v6 = vmul.f32 %v4164_v0, %v1561_v2 }
 0x3a7   : > { %v1531_v13 = vadd.f32 %v1515_v32, %v1461_v26  ;;  %v1585_v44 = vmul.f32 %v4180_v60, %v1569_v52  ;;  %v4282_v12 = vsel %vm1288_vm3, %v1668_v37, %v1676_v19  ;;  %v4286_v4 = vsel %vm1288_vm3, %v1676_v19, %v1668_v37 }
 0x3a8   : > { %v1746_v39 = vrot.slane %v4261_v46, 1  ;;  %v1260_v63 = vmul.f32 %v4095_v57, %v4015_v17  ;;  %v1600_v48 = vadd.f32 %v1584_v6, %v1530_v50  ;;  %v1707_v25 = vmul.f32 %v4212_v38, %v4286_v4 }
 0x3a9   : > { %v1601_v8 = vadd.f32 %v1585_v44, %v1531_v13  ;;  %v1708_v47 = vmul.f32 %v4197_v43, %v4282_v12  ;;  %v1261_v56 = vmul.f32 %v4095_v57, %v4024_v16  ;;  %v1274_v26 = vrot.slane %v4015_v17, 7 }
 0x3aa   : > { %v4297_v32 = vsel %vm1363_vm4, %v1738_v58, %v1746_v39  ;;  %v4301_v29 = vsel %vm1363_vm4, %v1746_v39, %v1738_v58  ;;  %v1653_v37 = vadd.f32 %v1637_v20, %v1600_v48  ;;  %v1282_v50 = vrot.slane %v4024_v16, 7 }
 0x3ab   : > { %v1654_v2 = vadd.f32 %v1638_v3, %v1601_v8  ;;  %v1777_v52 = vmul.f32 %v4175_v61, %v4297_v32  ;;  %v1778_v19 = vmul.f32 %v4203_v18, %v4301_v29  ;;  %v1349_v13 = vrot.slane %v4015_v17, 1 }
 0x3ac   : > { %v1357_v58 = vrot.slane %v4024_v16, 1  ;;  %v1446_v6 = vmul.f32 %v4137_v31, %v4126_v54  ;;  %v1723_v44 = vadd.f32 %v1707_v25, %v1653_v37  ;;  %v1447_v20 = vmul.f32 %v4148_v55, %v4126_v54 }
 0x3ad   : > { %v1724_v39 = vadd.f32 %v1708_v47, %v1654_v2  ;;  %v1516_v3 = vmul.f32 %v4194_v30, %v4155_v14  ;;  %v1291_v8 = vsel %vm1288_vm3, %v1274_v26, %v1282_v50  ;;  %v1299_v45 = vsel %vm1288_vm3, %v1282_v50, %v1274_v26 }
 0x3ae   : > { %v1366_v15 = vsel %vm1363_vm4, %v1349_v13, %v1357_v58  ;;  %v1374_v31 = vsel %vm1363_vm4, %v1357_v58, %v1349_v13  ;;  %v1793_v37 = vadd.f32 %v1777_v52, %v1723_v44  ;;  %v1319_v2 = vmul.f32 %v4118_v23, %v1299_v45 }
 0x3af   : > { %v2779_v48 = vpop.eup %2778  ;;  %v1794_v55 = vadd.f32 %v1778_v19, %v1724_v39  ;;  %v1320_v9 = vmul.f32 %v4103_v51, %v1291_v8  ;;  %v1394_v27 = vmul.f32 %v4122_v41, %v1366_v15  ;;  %v1395_v16 = vmul.f32 %v4132_v24, %v1374_v31  ;;  %v4338_v19 = vld [vmem:[#allocation2 + $0x40] sm:$0xff]  ;;  %v4340_v15 = vld [vmem:[#allocation2 + $0x48] sm:$0xff] }
 0x3b0   : > { %v2781_v25 = vpop.eup %2780  ;;  %v1878_v47 = vadd.f32 1.0, %v2779_v48  ;;  %v1816_v50 = vadd.f32 %v4238_v36, %v1793_v37  ;;  %v1335_v10 = vadd.f32 %v1319_v2, %v1260_v63  ;;  %v1517_v52 = vmul.f32 %v4190_v62, %v4145_v49 }
 0x3b1   : > { %v1879_v30 = vadd.f32 1.0, %v2781_v25  ;;  %v1817_v17 = vadd.f32 %v4238_v36, %v1794_v55  ;;  %v1336_v58 = vadd.f32 %v1320_v9, %v1261_v56  ;;  %v1586_v45 = vmul.f32 %v4218_v35, %v4164_v0 }
 0x3b2   : > { %v1894_v26 = vmul.f32 %v1878_v47, %v1830_v11  ;;  %v1832_v44 = vmul.f32 0.5, %v1816_v50  ;;  %v1848_v48 = vmul.f32 0.70710677, %v1816_v50  ;;  %v1410_v9 = vadd.f32 %v1394_v27, %v1335_v10 }
 0x3b3   : > { %v1895_v13 = vmul.f32 %v1879_v30, %v4263_v34  ;;  %v4343_v39 = vmul.f32 0.5, %v1817_v17  ;;  %v1849_v34 = vmul.f32 0.70710677, %v1817_v17  ;;  %v1411_v56 = vadd.f32 %v1395_v16, %v1336_v58 }
 0x3b4   : > { %v1910_v11 = vadd.f32 %v1894_v26, %v3987_v33  ;;  %2782 = verf.f32 %v1848_v48  ;;  %v1587_v62 = vmul.f32 %v4224_v22, %v4180_v60  ;;  %v1639_v35 = vmul.f32 %v4167_v59, %v4338_v19 }
 0x3b5   : > { %v1911_v63 = vadd.f32 %v1895_v13, %v3998_v1  ;;  %v1640_v8 = vmul.f32 %v4167_v59, %v4340_v15  ;;  %2784 = verf.f32 %v1849_v34  ;;  %v1462_v31 = vadd.f32 %v1446_v6, %v1410_v9 }
 0x3b6   : > { %v1463_v25 = vadd.f32 %v1447_v20, %v1411_v56  ;;  %v1669_v47 = vrot.slane %v4338_v19, 7  ;;  %v1677_v1 = vrot.slane %v4340_v15, 7  ;;  %v1739_v17 = vrot.slane %v4338_v19, 1 }
 0x3b7   : > { %v1926_v33 = vpack.c.bf16 %v1911_v63, %v1910_v11  ;;  %v1747_v16 = vrot.slane %v4340_v15, 1  ;;  %v1532_v27 = vadd.f32 %v1516_v3, %v1462_v31  ;;  %v1262_v22 = vmul.f32 %v4095_v57, %v4010_v5 }
 0x3b8   : > { %v1533_v10 = vadd.f32 %v1517_v52, %v1463_v25  ;;  %v1263_v37 = vmul.f32 %v4095_v57, %v4019_v42  ;;  %v4362_v6 = vsel %vm1288_vm3, %v1669_v47, %v1677_v1  ;;  %v4366_v20 = vsel %vm1288_vm3, %v1677_v1, %v1669_v47 }
 0x3b9   : > { %2499 = vmatprep.mubr.bf16.mxu1 %v1926_v33  ;;  %v4370_v55 = vsel %vm1363_vm4, %v1739_v17, %v1747_v16  ;;  %v4374_v3 = vsel %vm1363_vm4, %v1747_v16, %v1739_v17  ;;  %v1602_v2 = vadd.f32 %v1586_v45, %v1532_v27  ;;  %v1709_v26 = vmul.f32 %v4212_v38, %v4366_v20 }
 0x3ba   : > { %v1603_v30 = vadd.f32 %v1587_v62, %v1533_v10  ;;  %v1710_v50 = vmul.f32 %v4197_v43, %v4362_v6  ;;  %v1779_v13 = vmul.f32 %v4175_v61, %v4370_v55  ;;  %v1780_v58 = vmul.f32 %v4203_v18, %v4374_v3 }
 0x3bb   : > { %v1275_v52 = vrot.slane %v4010_v5, 7  ;;  %v1283_v11 = vrot.slane %v4019_v42, 7  ;;  %v1655_v48 = vadd.f32 %v1639_v35, %v1602_v2  ;;  %v1350_v45 = vrot.slane %v4010_v5, 1 }
 0x3bc   : > { %v1656_v63 = vadd.f32 %v1640_v8, %v1603_v30  ;;  %v1358_v34 = vrot.slane %v4019_v42, 1  ;;  %v1448_v62 = vmul.f32 %v4259_v40, %v4126_v54  ;;  %v1449_v33 = vmul.f32 %v4261_v46, %v4126_v54 }
 0x3bd   : > { %v1292_v9 = vsel %vm1288_vm3, %v1275_v52, %v1283_v11  ;;  %v1300_v56 = vsel %vm1288_vm3, %v1283_v11, %v1275_v52  ;;  %v1725_v31 = vadd.f32 %v1709_v26, %v1655_v48  ;;  %v1518_v16 = vmul.f32 %v4286_v4, %v4155_v14 }
 0x3be   : > { %v1726_v25 = vadd.f32 %v1710_v50, %v1656_v63  ;;  %v1321_v35 = vmul.f32 %v4118_v23, %v1300_v56  ;;  %v1322_v8 = vmul.f32 %v4103_v51, %v1292_v9  ;;  %v2783_v47 = vpop.eup %2782  ;;  %v1367_v1 = vsel %vm1363_vm4, %v1350_v45, %v1358_v34 }
 0x3bf   : > { %v1375_v17 = vsel %vm1363_vm4, %v1358_v34, %v1350_v45  ;;  %v1519_v40 = vmul.f32 %v4282_v12, %v4145_v49  ;;  %v2785_v46 = vpop.eup %2784  ;;  %v1880_v27 = vadd.f32 1.0, %v2783_v47  ;;  %v1795_v10 = vadd.f32 %v1779_v13, %v1725_v31 }
 0x3c0   : > { %v1796_v2 = vadd.f32 %v1780_v58, %v1726_v25  ;;  %v1337_v30 = vadd.f32 %v1321_v35, %v1262_v22  ;;  %v1881_v26 = vadd.f32 1.0, %v2785_v46  ;;  %v1338_v50 = vadd.f32 %v1322_v8, %v1263_v37  ;;  %v4415_v37 = vld [vmem:[#allocation2 + $0x50] sm:$0xff]  ;;  %v4417_v58 = vld [vmem:[#allocation2 + $0x58] sm:$0xff] }
 0x3c1   : > { %v1396_v52 = vmul.f32 %v4122_v41, %v1367_v1  ;;  %v1397_v11 = vmul.f32 %v4132_v24, %v1375_v17  ;;  %v1896_v48 = vmul.f32 %v1880_v27, %v1832_v44  ;;  %v1818_v63 = vadd.f32 %v4238_v36, %v1795_v10 }
 0x3c2   : > { %v1819_v45 = vadd.f32 %v4238_v36, %v1796_v2  ;;  %v1588_v4 = vmul.f32 %v4297_v32, %v4164_v0  ;;  %v1897_v12 = vmul.f32 %v1881_v26, %v4343_v39  ;;  %v1589_v22 = vmul.f32 %v4301_v29, %v4180_v60  ;;  %v4974_v2 = vld [vmem:[#allocation36_spill] sm:$0xff] }
 0x3c3   : > { %v1412_v34 = vadd.f32 %v1396_v52, %v1337_v30  ;;  %v1413_v13 = vadd.f32 %v1397_v11, %v1338_v50  ;;  %v1912_v44 = vadd.f32 %v1896_v48, %v3982_v28  ;;  %v4420_v9 = vmul.f32 0.5, %v1818_v63 }
 0x3c4   : > { %v4422_v56 = vmul.f32 0.5, %v1819_v45  ;;  %v1850_v31 = vmul.f32 0.70710677, %v1818_v63  ;;  %v1913_v32 = vadd.f32 %v1897_v12, %v3991_v53  ;;  %v1851_v25 = vmul.f32 0.70710677, %v1819_v45 }
 0x3c5   : > { %v1464_v39 = vadd.f32 %v1448_v62, %v1412_v34  ;;  %v1465_v35 = vadd.f32 %v1449_v33, %v1413_v13  ;;  %v1641_v29 = vmul.f32 %v4167_v59, %v4415_v37  ;;  %v1642_v8 = vmul.f32 %v4167_v59, %v4417_v58 }
 0x3c6   : > { %2786 = verf.f32 %v1850_v31  ;;  %v1670_v47 = vrot.slane %v4415_v37, 7  ;;  %v1927_v28 = vpack.c.bf16 %v1913_v32, %v1912_v44  ;;  %v1678_v46 = vrot.slane %v4417_v58, 7 }
 0x3c7   : > { %2788 = verf.f32 %v1851_v25  ;;  %v1534_v1 = vadd.f32 %v1518_v16, %v1464_v39  ;;  %v1535_v17 = vadd.f32 %v1519_v40, %v1465_v35  ;;  %v1740_v53 = vrot.slane %v4415_v37, 1 }
 0x3c8   : > { %v1748_v62 = vrot.slane %v4417_v58, 1  ;;  %v1264_v33 = vmul.f32 %v4095_v57, %v4039_v21  ;;  %2500 = vmatmul.mubr.bf16.vlgmr.msra.gmra.mrb[4].mxu1 %v1927_v28  ;;  %v1265_v30 = vmul.f32 %v4095_v57, %v4974_v2  ;;  %v1276_v26 = vrot.slane %v4039_v21, 7 }
 0x3c9   : > { %v1604_v27 = vadd.f32 %v1588_v4, %v1534_v1  ;;  %v1605_v10 = vadd.f32 %v1589_v22, %v1535_v17  ;;  %v4440_v16 = vsel %vm1288_vm3, %v1670_v47, %v1678_v46  ;;  %v4444_v40 = vsel %vm1288_vm3, %v1678_v46, %v1670_v47 }
 0x3ca   : > { %v4448_v50 = vsel %vm1363_vm4, %v1740_v53, %v1748_v62  ;;  %v4452_v52 = vsel %vm1363_vm4, %v1748_v62, %v1740_v53  ;;  %v1711_v63 = vmul.f32 %v4212_v38, %v4444_v40  ;;  %v1712_v45 = vmul.f32 %v4197_v43, %v4440_v16 }
 0x3cb   : > { %v1657_v11 = vadd.f32 %v1641_v29, %v1604_v27  ;;  %v1658_v48 = vadd.f32 %v1642_v8, %v1605_v10  ;;  %v1781_v4 = vmul.f32 %v4175_v61, %v4448_v50  ;;  %v1782_v12 = vmul.f32 %v4203_v18, %v4452_v52 }
 0x3cc   : > { %v1284_v34 = vrot.slane %v4974_v2, 7  ;;  %v1351_v13 = vrot.slane %v4039_v21, 1  ;;  %v1359_v31 = vrot.slane %v4974_v2, 1  ;;  %v1450_v32 = vmul.f32 %v4338_v19, %v4126_v54 }
 0x3cd   : > { %v1727_v22 = vadd.f32 %v1711_v63, %v1657_v11  ;;  %v1728_v44 = vadd.f32 %v1712_v45, %v1658_v48  ;;  %v1451_v35 = vmul.f32 %v4340_v15, %v4126_v54  ;;  %v1520_v29 = vmul.f32 %v4366_v20, %v4155_v14 }
 0x3ce   : > { %v1293_v25 = vsel %vm1288_vm3, %v1276_v26, %v1284_v34  ;;  %v1301_v39 = vsel %vm1288_vm3, %v1284_v34, %v1276_v26  ;;  %v1368_v19 = vsel %vm1363_vm4, %v1351_v13, %v1359_v31  ;;  %v1376_v46 = vsel %vm1363_vm4, %v1359_v31, %v1351_v13  ;;  %v4497_v31 = vld [vmem:[#allocation2 + $0x68] sm:$0xff] }
 0x3cf   : > { %v1797_v8 = vadd.f32 %v1781_v4, %v1727_v22  ;;  %v1798_v47 = vadd.f32 %v1782_v12, %v1728_v44  ;;  %v1323_v28 = vmul.f32 %v4118_v23, %v1301_v39  ;;  %v1324_v1 = vmul.f32 %v4103_v51, %v1293_v25  ;;  %v4489_v4 = vld [vmem:[#allocation2 + $0x60] sm:$0xff] }
 0x3d0   : > { %v2787_v17 = vpop.eup %2786  ;;  %v1521_v53 = vmul.f32 %v4362_v6, %v4145_v49  ;;  %v1590_v15 = vmul.f32 %v4370_v55, %v4164_v0  ;;  %v1398_v63 = vmul.f32 %v4122_v41, %v1368_v19  ;;  %v1399_v45 = vmul.f32 %v4132_v24, %v1376_v46 }
 0x3d1   : > { %v2789_v20 = vpop.eup %2788  ;;  %v1882_v62 = vadd.f32 1.0, %v2787_v17  ;;  %v1820_v27 = vadd.f32 %v4238_v36, %v1797_v8  ;;  %v1821_v10 = vadd.f32 %v4238_v36, %v1798_v47  ;;  %v1339_v26 = vadd.f32 %v1323_v28, %v1264_v33  ;;  %v4976_v8 = vld [vmem:[#allocation33_spill] sm:$0xff] }
 0x3d2   : > { %v1883_v11 = vadd.f32 1.0, %v2789_v20  ;;  %v1340_v48 = vadd.f32 %v1324_v1, %v1265_v30  ;;  %v4975_v30 = vld [vmem:[#allocation32_spill] sm:$0xff]  ;;  %v1591_v39 = vmul.f32 %v4374_v3, %v4180_v60  ;;  %v1671_v17 = vrot.slane %v4489_v4, 7 }
 0x3d3   : > { %v1898_v6 = vmul.f32 %v1882_v62, %v4420_v9  ;;  %v4492_v12 = vmul.f32 0.5, %v1820_v27  ;;  %v4494_v55 = vmul.f32 0.5, %v1821_v10  ;;  %v1852_v34 = vmul.f32 0.70710677, %v1820_v27 }
 0x3d4   : > { %v1899_v13 = vmul.f32 %v1883_v11, %v4422_v56  ;;  %v1853_v22 = vmul.f32 0.70710677, %v1821_v10  ;;  %v1414_v44 = vadd.f32 %v1398_v63, %v1339_v26  ;;  %v1415_v33 = vadd.f32 %v1399_v45, %v1340_v48  ;;  %v4978_v11 = vld [vmem:[#allocation35_spill] sm:$0xff] }
 0x3d5   : > { %v1914_v25 = vadd.f32 %v1898_v6, %v4975_v30  ;;  %2790 = verf.f32 %v1852_v34  ;;  %v1643_v9 = vmul.f32 %v4167_v59, %v4489_v4  ;;  %v1644_v56 = vmul.f32 %v4167_v59, %v4497_v31 }
 0x3d6   : > { %v1915_v47 = vadd.f32 %v1899_v13, %v4976_v8  ;;  %2792 = verf.f32 %v1853_v22  ;;  %v1466_v28 = vadd.f32 %v1450_v32, %v1414_v44  ;;  %v1467_v1 = vadd.f32 %v1451_v35, %v1415_v33  ;;  %v4977_v35 = vld [vmem:[#allocation34_spill] sm:$0xff] }
 0x3d7   : > { %v1679_v19 = vrot.slane %v4497_v31, 7  ;;  %v1741_v46 = vrot.slane %v4489_v4, 1  ;;  %v1749_v27 = vrot.slane %v4497_v31, 1  ;;  %v1266_v26 = vmul.f32 %v4095_v57, %v4977_v35 }
 0x3d8   : > { %v1928_v20 = vpack.c.bf16 %v1915_v47, %v1914_v25  ;;  %v1536_v62 = vadd.f32 %v1520_v29, %v1466_v28  ;;  %v1537_v3 = vadd.f32 %v1521_v53, %v1467_v1  ;;  %v1267_v48 = vmul.f32 %v4095_v57, %v4978_v11 }
 0x3d9   : > { %v4513_v10 = vsel %vm1288_vm3, %v1671_v17, %v1679_v19  ;;  %v4517_v32 = vsel %vm1288_vm3, %v1679_v19, %v1671_v17  ;;  %v4529_v6 = vsel %vm1363_vm4, %v1741_v46, %v1749_v27  ;;  %v4533_v34 = vsel %vm1363_vm4, %v1749_v27, %v1741_v46 }
 0x3da   : > { %2503 = vmatprep.mubr.bf16.mxu1 %v1928_v20  ;;  %v1606_v63 = vadd.f32 %v1590_v15, %v1536_v62  ;;  %v1607_v29 = vadd.f32 %v1591_v39, %v1537_v3  ;;  %v1713_v53 = vmul.f32 %v4212_v38, %v4517_v32  ;;  %v1714_v45 = vmul.f32 %v4197_v43, %v4513_v10 }
 0x3db   : > { %v1277_v13 = vrot.slane %v4977_v35, 7  ;;  %v1285_v22 = vrot.slane %v4978_v11, 7  ;;  %v1783_v33 = vmul.f32 %v4175_v61, %v4529_v6  ;;  %v1784_v30 = vmul.f32 %v4203_v18, %v4533_v34 }
 0x3dc   : > { %v1659_v15 = vadd.f32 %v1643_v9, %v1606_v63  ;;  %v1660_v44 = vadd.f32 %v1644_v56, %v1607_v29  ;;  %v1352_v8 = vrot.slane %v4977_v35, 1  ;;  %v1360_v47 = vrot.slane %v4978_v11, 1 }
 0x3dd   : > { %v1294_v25 = vsel %vm1288_vm3, %v1277_v13, %v1285_v22  ;;  %v1302_v39 = vsel %vm1288_vm3, %v1285_v22, %v1277_v13  ;;  %v1452_v20 = vmul.f32 %v4415_v37, %v4126_v54  ;;  %v1453_v62 = vmul.f32 %v4417_v58, %v4126_v54 }
 0x3de   : > { %v1729_v28 = vadd.f32 %v1713_v53, %v1659_v15  ;;  %v1730_v1 = vadd.f32 %v1714_v45, %v1660_v44  ;;  %v1325_v9 = vmul.f32 %v4118_v23, %v1302_v39  ;;  %v1326_v56 = vmul.f32 %v4103_v51, %v1294_v25 }
 0x3df   : > { %v2791_v17 = vpop.eup %2790  ;;  %v1369_v19 = vsel %vm1363_vm4, %v1352_v8, %v1360_v47  ;;  %v1377_v46 = vsel %vm1363_vm4, %v1360_v47, %v1352_v8  ;;  %v1522_v58 = vmul.f32 %v4444_v40, %v4155_v14  ;;  %v1592_v40 = vmul.f32 %v4448_v50, %v4164_v0 }
 0x3e0   : > { %v2793_v3 = vpop.eup %2792  ;;  %v1884_v27 = vadd.f32 1.0, %v2791_v17  ;;  %v1799_v63 = vadd.f32 %v1783_v33, %v1729_v28  ;;  %v1800_v29 = vadd.f32 %v1784_v30, %v1730_v1  ;;  %v1341_v53 = vadd.f32 %v1325_v9, %v1266_v26  ;;  %v4571_v17 = vld [vmem:[#allocation2 + $0x78] sm:$0xff] }
 0x3e1   : > { %v1885_v45 = vadd.f32 1.0, %v2793_v3  ;;  %v1342_v13 = vadd.f32 %v1326_v56, %v1267_v48  ;;  %v1400_v22 = vmul.f32 %v4122_v41, %v1369_v19  ;;  %v1401_v15 = vmul.f32 %v4132_v24, %v1377_v46  ;;  %v4567_v48 = vld [vmem:[#allocation2 + $0x70] sm:$0xff] }
 0x3e2   : > { %v1900_v44 = vmul.f32 %v1884_v27, %v4492_v12  ;;  %v1822_v25 = vadd.f32 %v4238_v36, %v1799_v63  ;;  %v1823_v37 = vadd.f32 %v4238_v36, %v1800_v29  ;;  %v1523_v26 = vmul.f32 %v4440_v16, %v4145_v49 }
 0x3e3   : > { %v1901_v39 = vmul.f32 %v1885_v45, %v4494_v55  ;;  %v1416_v33 = vadd.f32 %v1400_v22, %v1341_v53  ;;  %v1417_v30 = vadd.f32 %v1401_v15, %v1342_v13  ;;  %v1593_v16 = vmul.f32 %v4452_v52, %v4180_v60  ;;  %v4979_v45 = vld [vmem:[#allocation38_spill] sm:$0xff] }
 0x3e4   : > { %v1916_v8 = vadd.f32 %v1900_v44, %v4010_v5  ;;  %v1838_v47 = vmul.f32 0.5, %v1822_v25  ;;  %v1854_v12 = vmul.f32 0.70710677, %v1822_v25  ;;  %v1855_v1 = vmul.f32 0.70710677, %v1823_v37 }
 0x3e5   : > { %v1917_v28 = vadd.f32 %v1901_v39, %v4019_v42  ;;  %v1468_v9 = vadd.f32 %v1452_v20, %v1416_v33  ;;  %v1469_v56 = vadd.f32 %v1453_v62, %v1417_v30  ;;  %v1645_v55 = vmul.f32 %v4167_v59, %v4567_v48  ;;  %v4980_v33 = vld [vmem:[#allocation40_spill] sm:$0xff] }
 0x3e6   : > { %2794 = verf.f32 %v1854_v12  ;;  %v1646_v42 = vmul.f32 %v4167_v59, %v4571_v17  ;;  %v1672_v20 = vrot.slane %v4567_v48, 7  ;;  %v1680_v62 = vrot.slane %v4571_v17, 7 }
 0x3e7   : > { %v1929_v5 = vpack.c.bf16 %v1917_v28, %v1916_v8  ;;  %2796 = verf.f32 %v1855_v1  ;;  %v1538_v19 = vadd.f32 %v1522_v58, %v1468_v9  ;;  %v1539_v46 = vadd.f32 %v1523_v26, %v1469_v56 }
 0x3e8   : > { %v1742_v3 = vrot.slane %v4567_v48, 1  ;;  %v1839_v50 = vmul.f32 0.5, %v1823_v37  ;;  %v1750_v63 = vrot.slane %v4571_v17, 1  ;;  %v4587_v29 = vsel %vm1288_vm3, %v1672_v20, %v1680_v62 }
 0x3e9   : > { %2504 = vmatmul.mubr.bf16.gmra.mrb[8].mxu1 %v1929_v5  ;;  %v1608_v27 = vadd.f32 %v1592_v40, %v1538_v19  ;;  %v1609_v52 = vadd.f32 %v1593_v16, %v1539_v46  ;;  %v4591_v53 = vsel %vm1288_vm3, %v1680_v62, %v1672_v20  ;;  %v1268_v13 = vmul.f32 %v4095_v57, %v4979_v45 }
 0x3ea   : > { %v1278_v22 = vrot.slane %v4979_v45, 7  ;;  %v1715_v25 = vmul.f32 %v4212_v38, %v4591_v53  ;;  %v1716_v37 = vmul.f32 %v4197_v43, %v4587_v29  ;;  %v4602_v58 = vsel %vm1363_vm4, %v1742_v3, %v1750_v63 }
 0x3eb   : > { %v1661_v15 = vadd.f32 %v1645_v55, %v1608_v27  ;;  %v1662_v44 = vadd.f32 %v1646_v42, %v1609_v52  ;;  %v4606_v39 = vsel %vm1363_vm4, %v1750_v63, %v1742_v3  ;;  %v1286_v30 = vrot.slane %v4980_v33, 7 }
 0x3ec   : > { %v1353_v26 = vrot.slane %v4979_v45, 1  ;;  %v1785_v28 = vmul.f32 %v4175_v61, %v4602_v58  ;;  %v1786_v1 = vmul.f32 %v4203_v18, %v4606_v39  ;;  %v1269_v9 = vmul.f32 %v4095_v57, %v4980_v33 }
 0x3ed   : > { %v1731_v8 = vadd.f32 %v1715_v25, %v1661_v15  ;;  %v1732_v12 = vadd.f32 %v1716_v37, %v1662_v44  ;;  %v1295_v56 = vsel %vm1288_vm3, %v1278_v22, %v1286_v30  ;;  %v1303_v40 = vsel %vm1288_vm3, %v1286_v30, %v1278_v22 }
 0x3ee   : > { %v1361_v16 = vrot.slane %v4980_v33, 1  ;;  %v1327_v19 = vmul.f32 %v4118_v23, %v1303_v40  ;;  %v1328_v46 = vmul.f32 %v4103_v51, %v1295_v56  ;;  %v1454_v3 = vmul.f32 %v4489_v4, %v4126_v54  ;;  %v1627_v40 = vld [vmem:[#allocation2 + $0x80] sm:$0xff] }
 0x3ef   : > { %v1801_v55 = vadd.f32 %v1785_v28, %v1731_v8  ;;  %v1802_v5 = vadd.f32 %v1786_v1, %v1732_v12  ;;  %v1455_v27 = vmul.f32 %v4497_v31, %v4126_v54  ;;  %v1524_v4 = vmul.f32 %v4517_v32, %v4155_v14 }
 0x3f0   : > { %v2795_v42 = vpop.eup %2794  ;;  %v1370_v20 = vsel %vm1363_vm4, %v1353_v26, %v1361_v16  ;;  %v1378_v62 = vsel %vm1363_vm4, %v1361_v16, %v1353_v26  ;;  %v1343_v44 = vadd.f32 %v1327_v19, %v1268_v13  ;;  %v1344_v37 = vadd.f32 %v1328_v46, %v1269_v9  ;;  %v1628_v16 = vld [vmem:[#allocation2 + $0x88] sm:$0xff] }
 0x3f1   : > { %v2797_v52 = vpop.eup %2796  ;;  %v1886_v63 = vadd.f32 1.0, %v2795_v42  ;;  %v1824_v22 = vadd.f32 %v4238_v36, %v1801_v55  ;;  %v1825_v15 = vadd.f32 %v4238_v36, %v1802_v5  ;;  %v1402_v30 = vmul.f32 %v4122_v41, %v1370_v20 }
 0x3f2   : > { %v1887_v25 = vadd.f32 1.0, %v2797_v52  ;;  %v1403_v8 = vmul.f32 %v4132_v24, %v1378_v62  ;;  %v1525_v13 = vmul.f32 %v4513_v10, %v4145_v49  ;;  %v1594_v9 = vmul.f32 %v4529_v6, %v4164_v0 }
 0x3f3   : > { %v1902_v26 = vmul.f32 %v1886_v63, %v1838_v47  ;;  %v1856_v12 = vmul.f32 0.70710677, %v1824_v22  ;;  %v1857_v31 = vmul.f32 0.70710677, %v1825_v15  ;;  %v1418_v1 = vadd.f32 %v1402_v30, %v1343_v44 }
 0x3f4   : > { %v1903_v28 = vmul.f32 %v1887_v25, %v1839_v50  ;;  %v1419_v56 = vadd.f32 %v1403_v8, %v1344_v37  ;;  %v1595_v50 = vmul.f32 %v4533_v34, %v4180_v60  ;;  %v1647_v19 = vmul.f32 %v4167_v59, %v1627_v40 }
 0x3f5   : > { %v1918_v55 = vadd.f32 %v1902_v26, %v4039_v21  ;;  %2798 = verf.f32 %v1856_v12  ;;  %v1470_v5 = vadd.f32 %v1454_v3, %v1418_v1  ;;  %v1648_v46 = vmul.f32 %v4167_v59, %v1628_v16 }
 0x3f6   : > { %v1919_v47 = vadd.f32 %v1903_v28, %v4974_v2  ;;  %2800 = verf.f32 %v1857_v31  ;;  %v1471_v32 = vadd.f32 %v1455_v27, %v1419_v56  ;;  %v1673_v21 = vrot.slane %v1627_v40, 7  ;;  %v4982_v31 = vld [vmem:[#allocation39_spill] sm:$0xff] }
 0x3f7   : > { %v1540_v20 = vadd.f32 %v1524_v4, %v1470_v5  ;;  %v1681_v10 = vrot.slane %v1628_v16, 7  ;;  %v1840_v52 = vmul.f32 0.5, %v1824_v22  ;;  %v1841_v63 = vmul.f32 0.5, %v1825_v15  ;;  %v4981_v4 = vld [vmem:[#allocation37_spill] sm:$0xff] }
 0x3f8   : > { %v1930_v42 = vpack.c.bf16 %v1919_v47, %v1918_v55  ;;  %v1541_v62 = vadd.f32 %v1525_v13, %v1471_v32  ;;  %v1743_v6 = vrot.slane %v1627_v40, 1  ;;  %v1751_v44 = vrot.slane %v1628_v16, 1 }
 0x3f9   : > { %v1610_v2 = vadd.f32 %v1594_v9, %v1540_v20  ;;  %v1689_v27 = vsel %vm1288_vm3, %v1673_v21, %v1681_v10  ;;  %v1697_v34 = vsel %vm1288_vm3, %v1681_v10, %v1673_v21  ;;  %v1279_v28 = vrot.slane %v4981_v4, 7 }
 0x3fa   : > { %2507 = vmatprep.mubr.bf16.mxu1 %v1930_v42  ;;  %v1611_v3 = vadd.f32 %v1595_v50, %v1541_v62  ;;  %v1717_v25 = vmul.f32 %v4212_v38, %v1697_v34  ;;  %v1718_v37 = vmul.f32 %v4197_v43, %v1689_v27  ;;  %v1759_v30 = vsel %vm1363_vm4, %v1743_v6, %v1751_v44 }
 0x3fb   : > { %v1767_v22 = vsel %vm1363_vm4, %v1751_v44, %v1743_v6  ;;  %v1663_v15 = vadd.f32 %v1647_v19, %v1610_v2  ;;  %v1787_v26 = vmul.f32 %v4175_v61, %v1759_v30  ;;  %v1287_v1 = vrot.slane %v4982_v31, 7 }
 0x3fc   : > { %v1664_v8 = vadd.f32 %v1648_v46, %v1611_v3  ;;  %v1788_v12 = vmul.f32 %v4203_v18, %v1767_v22  ;;  %v1354_v56 = vrot.slane %v4981_v4, 1  ;;  %v1362_v40 = vrot.slane %v4982_v31, 1 }
 0x3fd   : > { %v1733_v16 = vadd.f32 %v1717_v25, %v1663_v15  ;;  %v1270_v13 = vmul.f32 %v4095_v57, %v4981_v4  ;;  %v1271_v9 = vmul.f32 %v4095_v57, %v4982_v31  ;;  %v1296_v61 = vsel %vm1288_vm3, %v1279_v28, %v1287_v1 }
 0x3fe   : > { %v1734_v55 = vadd.f32 %v1718_v37, %v1664_v8  ;;  %v1304_v5 = vsel %vm1288_vm3, %v1287_v1, %v1279_v28  ;;  %v1371_v32 = vsel %vm1363_vm4, %v1354_v56, %v1362_v40  ;;  %v1379_v50 = vsel %vm1363_vm4, %v1362_v40, %v1354_v56  ;;  %v1629_v8 = vld [vmem:[#allocation2 + $0x90] sm:$0xff] }
 0x3ff   : > { %v2799_v47 = vpop.eup %2798  ;;  %v1803_v21 = vadd.f32 %v1787_v26, %v1733_v16  ;;  %v1329_v20 = vmul.f32 %v4118_v23, %v1304_v5  ;;  %v1330_v62 = vmul.f32 %v4103_v51, %v1296_v61  ;;  %v1404_v10 = vmul.f32 %v4122_v41, %v1371_v32  ;;  %v1630_v26 = vld [vmem:[#allocation2 + $0x98] sm:$0xff] }
 0x400   : > { %v2801_v19 = vpop.eup %2800  ;;  %v1888_v46 = vadd.f32 1.0, %v2799_v47  ;;  %v1804_v42 = vadd.f32 %v1788_v12, %v1734_v55  ;;  %v1405_v6 = vmul.f32 %v4132_v24, %v1379_v50  ;;  %v1456_v37 = vmul.f32 %v4567_v48, %v4126_v54  ;;  %v2810_v47 = vld [vmem:[%s4972_s26 + $0x8] ss:$0 sm:$0xff] }
 0x401   : > { %v1889_v57 = vadd.f32 1.0, %v2801_v19  ;;  %v1826_v2 = vadd.f32 %v4238_v36, %v1803_v21  ;;  %v1345_v27 = vadd.f32 %v1329_v20, %v1270_v13  ;;  %v1346_v25 = vadd.f32 %v1330_v62, %v1271_v9 }
 0x402   : > { %v1904_v44 = vmul.f32 %v1888_v46, %v1840_v52  ;;  %v1827_v3 = vadd.f32 %v4238_v36, %v1804_v42  ;;  %v1457_v23 = vmul.f32 %v4571_v17, %v4126_v54  ;;  %v1526_v41 = vmul.f32 %v4591_v53, %v4155_v14 }
 0x403   : > { %v1905_v34 = vmul.f32 %v1889_v57, %v1841_v63  ;;  %v1858_v30 = vmul.f32 0.70710677, %v1826_v2  ;;  %v1527_v24 = vmul.f32 %v4587_v29, %v4145_v49  ;;  %v1420_v63 = vadd.f32 %v1404_v10, %v1345_v27 }
 0x404   : > { %v1920_v51 = vadd.f32 %v1904_v44, %v4977_v35  ;;  %v1859_v22 = vmul.f32 0.70710677, %v1827_v3  ;;  %v1421_v15 = vadd.f32 %v1405_v6, %v1346_v25  ;;  %v1596_v54 = vmul.f32 %v4602_v58, %v4164_v0 }
 0x405   : > { %v1921_v52 = vadd.f32 %v1905_v34, %v4978_v11  ;;  %2802 = verf.f32 %v1858_v30  ;;  %v1597_v35 = vmul.f32 %v4606_v39, %v4180_v60  ;;  %v1472_v14 = vadd.f32 %v1456_v37, %v1420_v63 }
 0x406   : > { %2804 = verf.f32 %v1859_v22  ;;  %v1473_v17 = vadd.f32 %v1457_v23, %v1421_v15  ;;  %v1649_v49 = vmul.f32 %v4167_v59, %v1629_v8  ;;  %v1674_v29 = vrot.slane %v1629_v8, 7 }
 0x407   : > { %v1931_v48 = vpack.c.bf16 %v1921_v52, %v1920_v51  ;;  %v1682_v11 = vrot.slane %v1630_v26, 7  ;;  %v1744_v53 = vrot.slane %v1629_v8, 1  ;;  %v1542_v12 = vadd.f32 %v1526_v41, %v1472_v14  ;;  %v2343_v52 = vld [vmem:[%s4983_s9] ss:$0 sm:$0xff] }
 0x408   : > { %v1543_v28 = vadd.f32 %v1527_v24, %v1473_v17  ;;  %v1650_v1 = vmul.f32 %v4167_v59, %v1630_v26  ;;  %v1752_v56 = vrot.slane %v1630_v26, 1  ;;  %v1842_v32 = vmul.f32 0.5, %v1826_v2 }
 0x409   : > { %2508 = vmatmul.mubr.bf16.gmra.mrb[12].mxu1 %v1931_v48  ;;  %v1690_v0 = vsel %vm1288_vm3, %v1674_v29, %v1682_v11  ;;  %v1698_v60 = vsel %vm1288_vm3, %v1682_v11, %v1674_v29  ;;  %v1612_v58 = vadd.f32 %v1596_v54, %v1542_v12 }
 0x40a   : > { %v1613_v39 = vadd.f32 %v1597_v35, %v1543_v28  ;;  %v1719_v40 = vmul.f32 %v4212_v38, %v1698_v60  ;;  %v1720_v16 = vmul.f32 %v4197_v43, %v1690_v0  ;;  %v1760_v55 = vsel %vm1363_vm4, %v1744_v53, %v1752_v56 }
 0x40b   : > { %v1768_v13 = vsel %vm1363_vm4, %v1752_v56, %v1744_v53  ;;  %v1665_v59 = vadd.f32 %v1649_v49, %v1612_v58  ;;  %v1789_v61 = vmul.f32 %v2810_v47, %v1760_v55  ;;  %v1843_v43 = vmul.f32 0.5, %v1827_v3 }
 0x40c   : > { %v1666_v9 = vadd.f32 %v1650_v1, %v1613_v39  ;;  %v1790_v5 = vmul.f32 %v4203_v18, %v1768_v13 }
 0x40d   : > { %v1735_v50 = vadd.f32 %v1719_v40, %v1665_v59 }
 0x40e   : > { %v1736_v38 = vadd.f32 %v1720_v16, %v1666_v9 }
 0x40f   : > { %v2803_v19 = vpop.eup %2802  ;;  %v1805_v42 = vadd.f32 %v1789_v61, %v1735_v50 }
 0x410   : > { %v2805_v46 = vpop.eup %2804  ;;  %v1890_v21 = vadd.f32 1.0, %v2803_v19  ;;  %v1806_v20 = vadd.f32 %v1790_v5, %v1736_v38 }
 0x411   : > { %v1891_v7 = vadd.f32 1.0, %v2805_v46  ;;  %v1828_v62 = vadd.f32 %v4238_v36, %v1805_v42 }
 0x412   : > { %v1906_v57 = vmul.f32 %v1890_v21, %v1842_v32  ;;  %v1829_v10 = vadd.f32 %v4238_v36, %v1806_v20 }
 0x413   : > { %v1907_v6 = vmul.f32 %v1891_v7, %v1843_v43  ;;  %v1860_v27 = vmul.f32 0.70710677, %v1828_v62  ;;  %v1844_v3 = vmul.f32 0.5, %v1828_v62 }
 0x414   : > { %v1922_v44 = vadd.f32 %v1906_v57, %v4979_v45  ;;  %v1861_v2 = vmul.f32 0.70710677, %v1829_v10  ;;  %v1845_v37 = vmul.f32 0.5, %v1829_v10 }
 0x415   : > { %v1923_v18 = vadd.f32 %v1907_v6, %v4980_v33  ;;  %2806 = verf.f32 %v1860_v27 }
 0x416   : > { %2808 = verf.f32 %v1861_v2 }
 0x417   : > { %v1932_v34 = vpack.c.bf16 %v1923_v18, %v1922_v44 }
 0x419   : > { %2511 = vmatprep.mubr.bf16.mxu1 %v1932_v34 }
 0x41f   : > { %v2807_v25 = vpop.eup %2806 }
 0x420   : > { %v2809_v23 = vpop.eup %2808  ;;  %v1892_v51 = vadd.f32 1.0, %v2807_v25 }
 0x421   : > { %v1893_v30 = vadd.f32 1.0, %v2809_v23 }
 0x422   : > { %v1908_v36 = vmul.f32 %v1892_v51, %v1844_v3 }
 0x423   : > { %v1909_v41 = vmul.f32 %v1893_v30, %v1845_v37 }
 0x424   : > { %v1924_v45 = vadd.f32 %v1908_v36, %v4981_v4 }
 0x425   : > { %v1925_v33 = vadd.f32 %v1909_v41, %v4982_v31 }
 0x427   : > { %v1933_v24 = vpack.c.bf16 %v1925_v33, %v1924_v45 }
 0x429   : > { %2512 = vmatmul.mubr.bf16.gmra.mrb[16].mxu1 %v1933_v24 }
 0x49b   : > { %v2501_v22 = vpop.f32.mrb[4].mxu1 }
 0x49c   : > { %v2048_v63 = vadd.f32 %v2501_v22, %v2343_v52  ;;  %v2039_v15 = vpop.f32.mrb[5].mxu1 }
 0x49d   : > { %v2040_v8 = vadd.f32 %v2343_v52, %v2039_v15  ;;  %v2502_v26 = vpop.f32.mrb[6].mxu1 }
 0x49e   : > { %2104 = vst [vmem:[%s4069_s29 + $0x10] sm:$0xff] %v2048_v63  ;;  %v2051_v54 = vadd.f32 %v2502_v26, %v2343_v52  ;;  %v2042_v4 = vpop.f32.mrb[7].mxu1 }
 0x49f   : > { %2102 = vst [vmem:[%s4069_s29] sm:$0xff] %v2040_v8  ;;  %v2043_v31 = vadd.f32 %v2343_v52, %v2042_v4 }
 0x4a0   : > { %2105 = vst [vmem:[%s4069_s29 + $0x18] sm:$0xff] %v2051_v54 }
 0x4a1   : > { %2103 = vst [vmem:[%s4069_s29 + $0x8] sm:$0xff] %v2043_v31 }
 0x4bc   : > { %v2505_v35 = vpop.f32.mrb[8].mxu1 }
 0x4bd   : > { %v2064_v48 = vadd.f32 %v2505_v35, %v2343_v52  ;;  %v2055_v14 = vpop.f32.mrb[9].mxu1 }
 0x4be   : > { %v2056_v17 = vadd.f32 %v2343_v52, %v2055_v14  ;;  %v2506_v49 = vpop.f32.mrb[10].mxu1 }
 0x4bf   : > { %2108 = vst [vmem:[%s4069_s29 + $0x30] sm:$0xff] %v2064_v48  ;;  %v2067_v29 = vadd.f32 %v2506_v49, %v2343_v52  ;;  %v2058_v11 = vpop.f32.mrb[11].mxu1 }
 0x4c0   : > { %2106 = vst [vmem:[%s4069_s29 + $0x20] sm:$0xff] %v2056_v17  ;;  %v2059_v53 = vadd.f32 %v2343_v52, %v2058_v11 }
 0x4c1   : > { %2109 = vst [vmem:[%s4069_s29 + $0x38] sm:$0xff] %v2067_v29 }
 0x4c2   : > { %2107 = vst [vmem:[%s4069_s29 + $0x28] sm:$0xff] %v2059_v53 }
 0x4dc   : > { %v2509_v12 = vpop.f32.mrb[12].mxu1 }
 0x4dd   : > { %v2080_v28 = vadd.f32 %v2509_v12, %v2343_v52  ;;  %v2071_v1 = vpop.f32.mrb[13].mxu1 }
 0x4de   : > { %v2072_v56 = vadd.f32 %v2343_v52, %v2071_v1  ;;  %v2510_v0 = vpop.f32.mrb[14].mxu1 }
 0x4df   : > { %2112 = vst [vmem:[%s4069_s29 + $0x50] sm:$0xff] %v2080_v28  ;;  %v2083_v60 = vadd.f32 %v2510_v0, %v2343_v52  ;;  %v2074_v58 = vpop.f32.mrb[15].mxu1 }
 0x4e0   : > { %2110 = vst [vmem:[%s4069_s29 + $0x40] sm:$0xff] %v2072_v56  ;;  %v2075_v39 = vadd.f32 %v2343_v52, %v2074_v58 }
 0x4e1   : > { %2113 = vst [vmem:[%s4069_s29 + $0x58] sm:$0xff] %v2083_v60 }
 0x4e2   : > { %2111 = vst [vmem:[%s4069_s29 + $0x48] sm:$0xff] %v2075_v39 }
 0x4fc   : > { %v2513_v40 = vpop.f32.mrb[16].mxu1 }
 0x4fd   : > { %v2096_v16 = vadd.f32 %v2513_v40, %v2343_v52  ;;  %v2087_v55 = vpop.f32.mrb[17].mxu1 }
 0x4fe   : > { %v2088_v13 = vadd.f32 %v2343_v52, %v2087_v55  ;;  %v2514_v59 = vpop.f32.mrb[18].mxu1 }
 0x4ff   : > { %2116 = vst [vmem:[%s4069_s29 + $0x70] sm:$0xff] %v2096_v16  ;;  %v2099_v9 = vadd.f32 %v2514_v59, %v2343_v52  ;;  %v2090_v47 = vpop.f32.mrb[19].mxu1 }
 0x500   : > { %2114 = vst [vmem:[%s4069_s29 + $0x60] sm:$0xff] %v2088_v13  ;;  %v2091_v61 = vadd.f32 %v2343_v52, %v2090_v47 }
 0x501   : > { %2117 = vst [vmem:[%s4069_s29 + $0x78] sm:$0xff] %v2099_v9 }
 0x502   : > { %2115 = vst [vmem:[%s4069_s29 + $0x68] sm:$0xff] %v2091_v61 }
 0x503   : > { %2970 = shalt.err (!%p2967_p3)
}
 0x504   : > { %s2971_s29 = scalar_lea.hbm %s4739_s27, 2048  ;;  %s2975_s8 = scalar_lea.hbm %s4987_s1, 8192 }
 0x505   : > { %p2972_p7 = scmp.ne.s32.totalorder %s4739_s27, %s2971_s29  ;;  %p2976_p12 = scmp.lt.u32.totalorder %s4739_s27, %s4987_s1 }
 0x506   : > { %p2977_p8 = scmp.lt.u32.totalorder %s2975_s8, %s2971_s29  ;;  %p2979_p13 = scmp.lt.u32.totalorder %s2971_s29, %s4739_s27 }
 0x507   : > { %p2973_p4 = pnand %p2972_p7, %p4988_p1 }
 0x508   : > { %p2978_p0 = por %p2977_p8, %p2976_p12 }
 0x509   : > { %p2974_p10 = pneg %p2973_p4 }
 0x50a   : > { %p2980_p2 = por %p2979_p13, %p2978_p0 }
 0x50c   : > { %p2981_p5 = pnand %p2980_p2, %p2974_p10 }
 0x50e   : > { %2984 = shalt.err (!%p2981_p5)
}
 0x50f   : > { %s3131_s7 = smov 128   ;;  %s3132_s3 = smov 8  }
 0x510   : > { %2529 = dma.vmem_to_hbm [thread:$0]  (%p4988_p1), %s4741_s20, 2048, %s4739_s27, %s2119_s0, %s3131_s7, %s3131_s7, %s3132_s3  }
 0x511 PF: > { %p2557_p6 = scmp.ge.s32.totalorder %s3115_s22, 2  ;;  %s2150_s30 = sand.u32 1, %s3087_s15  }
 0x512   : > { %p4989_p9 = scmp.ne.s32.totalorder %s4925_s11, 0  ;;  %s2151_s25 = scalar_lea.sflag [#allocation5], %s2150_s30 }
 0x514   : > { %p2549_p11 = pnand %p2557_p6, %p4989_p9 }
 0x516   : > { %3058 = dma.done.wait (!%p2549_p11), %s2151_s25, 2048  }
 0x517   : > { %3060 = vsyncadd (!%p2549_p11), %s2151_s25, 4294965248  ;;  %s29_s22 = sadd.s32 1, %s3115_s22   ;;  %s4991_s30 = sld [smem:[#allocation19_spill]] }
 0x518   : > { %p4775_p3 = scmp.ge.s32.totalorder %s29_s22, 6   ;;  %s4992_s10 = sld [smem:[#allocation20_spill]] }
 0x519   : > { %s4993_s13 = sld [smem:[#allocation21_spill]]  ;;  %s4994_s20 = smov %s3343_s12 }
 0x51a   : > { %s4995_s21 = sld [smem:[#allocation24_spill]]  ;;  %s4996_s27 = sld [smem:[#allocation25_spill]] }
 0x51b   : > { %s4997_s0 = sld [smem:[#allocation27_spill]]  ;;  %s4998_s4 = sld [smem:[#allocation28_spill]] }
 0x51c   : > { %s5000_s11 = smov %s5026_s5  ;;  %s5004_s15 = smov %s3091_s16 }
 0x51d   : > { %s5005_s16 = smov %s3095_s17  ;;  %s5006_s17 = smov %s3434_s19 }
 0x51e   :  { %28 = sbr.rel (!%p4775_p3) target bundleno = 24 (0x18), region = 153 }
 0x51f   : > { %s5001_s12 = smov %s4993_s13  ;;  %s5002_s13 = smov %s3083_s14 }
 0x520   : > { %s5003_s14 = smov %s4994_s20  ;;  %s5007_s18 = smov %s4995_s21 }
 0x521   : > { %s5008_s19 = smov %s4996_s27  ;;  %s5009_s20 = smov %s4997_s0 }
 0x522   : > { %s5010_s21 = smov %s4998_s4 }
 0x525   :  { %2156 = vsyncpa [#allocation4], 1 }
 0x526   :  { %2158 = vsyncpa [#allocation4 + $0x1], 1 }
 0x527   :  { %2159 = vsyncpa [#allocation7], 1 }
 0x528   :  { %2161 = vsyncpa [#allocation7 + $0x1], 1 }
 0x529   :  { %2162 = vsyncpa [#allocation10], 1 }
 0x52a   :  { %2163 = vsyncpa [#allocation5], 1 }
 0x52b   :  { %2165 = vsyncpa [#allocation5 + $0x1], 1 }

</bundles_post_ra>
